<compile_context>
chip_gen: v7x
topology: tpu7x:2x2x1
jax: 0.10.0
libtpu: 0.0.40
codegen_flags: <defaults>
</compile_context>

<pallas_src>
import jax
import jax.numpy as jnp
from jax.experimental import pallas as pl
from jax.experimental.pallas import tpu as pltpu

COMPUTE_DTYPE = jnp.bfloat16          # MXU operand dtype (accumulation stays f32)
BN_EPS = 1e-5                         # torch.nn.BatchNorm2d default
CONV_VMEM_LIMIT = 48 * 1024 * 1024    # conv3x3 keeps one whole padded image per grid step


def _pick_tile(n, target):
    """Largest multiple-of-8 divisor of n that is <= target, else n (full extent)."""
    if n <= target:
        return n
    t = target - (target % 8)
    while t >= 8:
        if n % t == 0:
            return t
        t -= 8
    return n


# ------------------------- tiled matmul (+bias, +ReLU, +residual) -------------------------

def _mm_kernel(relu, has_res, cdt):
    def kernel(*refs):
        if has_res:
            x_ref, w_ref, b_ref, r_ref, o_ref = refs
        else:
            x_ref, w_ref, b_ref, o_ref = refs
            r_ref = None
        y = jnp.dot(x_ref[...].astype(cdt), w_ref[...],
                    preferred_element_type=jnp.float32)
        y = y + b_ref[...]
        if relu:
            y = jnp.maximum(y, 0.0)
        if has_res:
            y = y + r_ref[...]
        o_ref[...] = y.astype(o_ref.dtype)
    return kernel


def matmul_bias(x, w, b, *, relu=False, residual=None, tm=512):
    """x: (M, K) f32, w: (K, N) bf16, b: (1, N) f32 -> (M, N) f32.
    Optional fused ReLU and fused residual add (residual: (M, N) f32, added last)."""
    M, K = x.shape
    N = w.shape[1]
    TM = _pick_tile(M, tm)
    has_res = residual is not None
    in_specs = [pl.BlockSpec((TM, K), lambda i: (i, 0)),
                pl.BlockSpec((K, N), lambda i: (0, 0)),
                pl.BlockSpec((1, N), lambda i: (0, 0))]
    args = [x, w, b]
    if has_res:
        in_specs.append(pl.BlockSpec((TM, N), lambda i: (i, 0)))
        args.append(residual)
    return pl.pallas_call(
        _mm_kernel(relu, has_res, COMPUTE_DTYPE),
        grid=(M // TM,),
        out_shape=jax.ShapeDtypeStruct((M, N), jnp.float32),
        in_specs=in_specs,
        out_specs=pl.BlockSpec((TM, N), lambda i: (i, 0)),
        compiler_params=pltpu.CompilerParams(dimension_semantics=("parallel",)),
    )(*args)


# ------------------- 3x3 "same" conv: deep-K im2col matmul + BN statistics ----------------

def _conv3x3_kernel(H, W, Cin, Cout, ch, cdt):
    n_chunks = H // ch

    def kernel(x_ref, w_ref, b_ref, o_ref, s_ref, patch_ref):
        w = w_ref[...]                                   # (9*Cin, Cout) bf16
        b = b_ref[...]                                   # (1, Cout) f32
        s0 = jnp.zeros((1, Cout), jnp.float32)
        s1 = jnp.zeros((1, Cout), jnp.float32)
        for c in range(n_chunks):
            r0 = c * ch
            # im2col for this row chunk -> VMEM scratch; columns ordered (kh, kw, cin)
            for kh in range(3):
                for kw in range(3):
                    tap = kh * 3 + kw
                    piece = x_ref[0, r0 + kh:r0 + kh + ch, kw:kw + W, :]
                    patch_ref[:, tap * Cin:(tap + 1) * Cin] = piece.reshape(ch * W, Cin)
            # one deep-K MXU matmul (K = 9*Cin), f32 accumulation
            acc = jnp.dot(patch_ref[...].astype(cdt), w,
                          preferred_element_type=jnp.float32) + b
            s0 = s0 + jnp.sum(acc, axis=0, keepdims=True)
            s1 = s1 + jnp.sum(acc * acc, axis=0, keepdims=True)
            o_ref[0, r0:r0 + ch, :, :] = acc.reshape(ch, W, Cout)
        s_ref[0, 0:1, :] = s0
        s_ref[0, 1:2, :] = s1

    return kernel


def conv3x3(x4, wm, b_row):
    """3x3 'same' conv with bias. x4: (N, H, W, Cin) NHWC f32; wm: (9*Cin, Cout) bf16 with
    rows ordered (kh, kw, cin); b_row: (1, Cout) f32.
    Returns (out (N, H, W, Cout) f32, stats (N, 2, Cout) f32 = per-image [sum, sum_sq])."""
    N, H, W, Cin = x4.shape
    Cout = wm.shape[1]
    xp = jnp.pad(x4, ((0, 0), (1, 1), (1, 1), (0, 0)))
    ch = _pick_tile(H, 64)               # in-kernel row chunk bounds the im2col scratch
    return pl.pallas_call(
        _conv3x3_kernel(H, W, Cin, Cout, ch, COMPUTE_DTYPE),
        grid=(N,),
        out_shape=(jax.ShapeDtypeStruct((N, H, W, Cout), jnp.float32),
                   jax.ShapeDtypeStruct((N, 2, Cout), jnp.float32)),
        in_specs=[pl.BlockSpec((1, H + 2, W + 2, Cin), lambda n: (n, 0, 0, 0)),
                  pl.BlockSpec((9 * Cin, Cout), lambda n: (0, 0)),
                  pl.BlockSpec((1, Cout), lambda n: (0, 0))],
        out_specs=(pl.BlockSpec((1, H, W, Cout), lambda n: (n, 0, 0, 0)),
                   pl.BlockSpec((1, 2, Cout), lambda n: (n, 0, 0))),
        scratch_shapes=[pltpu.VMEM((ch * W, 9 * Cin), jnp.float32)],
        compiler_params=pltpu.CompilerParams(
            dimension_semantics=("parallel",),
            vmem_limit_bytes=CONV_VMEM_LIMIT),
    )(xp, wm, b_row)


# -------------- BatchNorm normalize pass (+ReLU, + up to 2 fused residual adds) ------------

def _bn_kernel(relu, n_res, inv_count):
    def kernel(*refs):
        x_ref, s_ref, g_ref, b_ref = refs[:4]
        res_refs = refs[4:4 + n_res]
        o_ref = refs[4 + n_res]
        s = jnp.sum(s_ref[...].astype(jnp.float32), axis=0)    # (2, C): batch [sum, sum_sq]
        mean = s[0:1, :] * inv_count                            # (1, C)
        var = s[1:2, :] * inv_count - mean * mean               # biased var (torch BN, train)
        scale = g_ref[...] * jax.lax.rsqrt(var + BN_EPS)        # (1, C)
        shift = b_ref[...] - mean * scale                       # (1, C)
        y = x_ref[0] * scale.reshape(1, 1, -1) + shift.reshape(1, 1, -1)
        if relu:
            y = jnp.maximum(y, 0.0)
        for r in res_refs:
            y = y + r[0]
        o_ref[0] = y
    return kernel


def batchnorm_act(x, stats, gamma_row, beta_row, *, relu, residuals=()):
    """Training-mode BatchNorm2d normalize (+ optional ReLU, + fused residual adds).
    x: (N, H, W, C) f32; stats: (N, 2, C) per-image [sum, sum_sq] from conv3x3."""
    N, H, W, C = x.shape
    TH = _pick_tile(H, 128)
    inv_count = 1.0 / float(N * H * W)
    n_res = len(residuals)

    def tile_spec():
        return pl.BlockSpec((1, TH, W, C), lambda n, h: (n, h, 0, 0))

    in_specs = [tile_spec(),
                pl.BlockSpec((N, 2, C), lambda n, h: (0, 0, 0)),
                pl.BlockSpec((1, C), lambda n, h: (0, 0)),
                pl.BlockSpec((1, C), lambda n, h: (0, 0))]
    in_specs += [tile_spec() for _ in range(n_res)]
    return pl.pallas_call(
        _bn_kernel(relu, n_res, inv_count),
        grid=(N, H // TH),
        out_shape=jax.ShapeDtypeStruct((N, H, W, C), jnp.float32),
        in_specs=in_specs,
        out_specs=tile_spec(),
        compiler_params=pltpu.CompilerParams(
            dimension_semantics=("parallel", "parallel")),
    )(x, stats, gamma_row, beta_row, *residuals)


# --------------------- stride-2 convs as matmuls (space/depth glue in XLA) -----------------

def conv2x2_s2(x4, wm, b_row, *, relu):
    """Conv2d(k=2, s=2, p=0) (+ReLU) as a row-tiled matmul. x4: (N, H, W, Cin) NHWC.
    wm: (4*Cin, Cout) bf16, rows ordered (kh, kw, cin). Returns flat (N*H/2*W/2, Cout)."""
    N, H, W, Cin = x4.shape
    Hh, Wh = H // 2, W // 2
    xs = x4.reshape(N, Hh, 2, Wh, 2, Cin).transpose(0, 1, 3, 2, 4, 5)
    xs = xs.reshape(N * Hh * Wh, 4 * Cin)
    return matmul_bias(xs, wm, b_row, relu=relu)


def convtranspose2x2_s2(x_flat, wm, b_row, residual_flat, N, Hh, Wh, Cout):
    """ConvTranspose2d(k=2, s=2, p=0) + fused residual add.
    x_flat: (N*Hh*Wh, Cin); wm: (Cin, Cout*4) bf16 with columns ordered (co, kh, kw);
    residual_flat is in the same column layout. Returns NHWC (N, 2*Hh, 2*Wh, Cout)."""
    y = matmul_bias(x_flat, wm, b_row, relu=False, residual=residual_flat)
    y = y.reshape(N, Hh, Wh, Cout, 2, 2).transpose(0, 1, 4, 2, 5, 3)
    return y.reshape(N, Hh * 2, Wh * 2, Cout)


# -------------------------- parameter prep (one-time, outside loops) -----------------------

def _prep_conv3x3(w, b):
    cout, cin = w.shape[0], w.shape[1]
    wm = jnp.transpose(w, (2, 3, 1, 0)).reshape(9 * cin, cout).astype(COMPUTE_DTYPE)
    return wm, b.reshape(1, cout).astype(jnp.float32)


def _prep_conv2x2(w, b):
    cout, cin = w.shape[0], w.shape[1]
    wm = jnp.transpose(w, (2, 3, 1, 0)).reshape(4 * cin, cout).astype(COMPUTE_DTYPE)
    return wm, b.reshape(1, cout).astype(jnp.float32)


def _prep_convtranspose2x2(w, b):
    cin, cout = w.shape[0], w.shape[1]
    wm = w.reshape(cin, cout * 4).astype(COMPUTE_DTYPE)      # columns ordered (co, kh, kw)
    bm = jnp.broadcast_to(b.reshape(cout, 1), (cout, 4)).reshape(1, cout * 4)
    return wm, bm.astype(jnp.float32)


def init_params(key, num_input_channels=1, num_layer_sigma=4, output_features=16,
                num_mid_blocks=2, num_feature_maps=32):
    keys = iter(jax.random.split(key, 16 + 8 * num_mid_blocks))

    def conv_w(k, cout, cin, kh, kw):
        fan_in = cin * kh * kw
        return jax.random.normal(k, (cout, cin, kh, kw), jnp.float32) / jnp.sqrt(fan_in)

    def bias(k, c):
        return 0.01 * jax.random.normal(k, (c,), jnp.float32)

    F = num_feature_maps
    p = {
        'down_w': conv_w(next(keys), output_features, num_input_channels, 2, 2),
        'down_b': bias(next(keys), output_features),
        'down_sigma_w': conv_w(next(keys), num_layer_sigma, num_input_channels, 2, 2),
        'down_sigma_b': bias(next(keys), num_layer_sigma),
        'head_w': conv_w(next(keys), F, output_features + num_layer_sigma, 3, 3),
        'head_b': bias(next(keys), F),
        'head_bn_g': jnp.ones((F,), jnp.float32),
        'head_bn_b': jnp.zeros((F,), jnp.float32),
        'pre_up_w': conv_w(next(keys), output_features, F, 3, 3),
        'pre_up_b': bias(next(keys), output_features),
        'pre_up_bn_g': jnp.ones((output_features,), jnp.float32),
        'pre_up_bn_b': jnp.zeros((output_features,), jnp.float32),
        # ConvTranspose2d weight layout: (in_channels, out_channels, kH, kW)
        'up_w': (jax.random.normal(next(keys),
                                   (output_features, num_input_channels, 2, 2),
                                   jnp.float32) / jnp.sqrt(output_features * 4)),
        'up_b': bias(next(keys), num_input_channels),
        'blocks': [],
    }
    for _ in range(num_mid_blocks):
        p['blocks'].append({
            'c1_w': conv_w(next(keys), F, F, 3, 3),
            'c1_b': bias(next(keys), F),
            'bn1_g': jnp.ones((F,), jnp.float32),
            'bn1_b': jnp.zeros((F,), jnp.float32),
            'c2_w': conv_w(next(keys), F, F, 3, 3),
            'c2_b': bias(next(keys), F),
            'bn2_g': jnp.ones((F,), jnp.float32),
            'bn2_b': jnp.zeros((F,), jnp.float32),
        })
    return p


# ----------------------------------------- forward -----------------------------------------

def genet_gray_forward(params, x, noise_sigma):
    """x: (N, C, H, W) NCHW, noise_sigma: (N,). Returns (N, C, H, W).
    Matches GENetGRAY.forward with BatchNorm in training mode (batch statistics)."""
    N, C, H, W = x.shape
    F = params['head_w'].shape[0]           # num_feature_maps
    OF = params['down_w'].shape[0]          # output_features
    NS = params['down_sigma_w'].shape[0]    # num_layer_sigma

    # one-time weight prep (matmul layouts, bias rows, bf16 cast) — hoisted out of the loop
    down_wm, down_bm = _prep_conv2x2(params['down_w'], params['down_b'])
    dsig_wm, dsig_bm = _prep_conv2x2(params['down_sigma_w'], params['down_sigma_b'])
    head_wm, head_bm = _prep_conv3x3(params['head_w'], params['head_b'])
    preup_wm, preup_bm = _prep_conv3x3(params['pre_up_w'], params['pre_up_b'])
    up_wm, up_bm = _prep_convtranspose2x2(params['up_w'], params['up_b'])
    blocks = [(_prep_conv3x3(blk['c1_w'], blk['c1_b']),
               blk['bn1_g'].reshape(1, F), blk['bn1_b'].reshape(1, F),
               _prep_conv3x3(blk['c2_w'], blk['c2_b']),
               blk['bn2_g'].reshape(1, F), blk['bn2_b'].reshape(1, F))
              for blk in params['blocks']]

    x_nhwc = jnp.transpose(x, (0, 2, 3, 1)).astype(jnp.float32)

    # odd-size handling (replicates row/col -2, exactly as in the PyTorch reference)
    expanded_h = (H % 2 == 1)
    expanded_w = (W % 2 == 1)
    x_ = x_nhwc
    if expanded_h:
        x_ = jnp.concatenate([x_, x_[:, -2:-1, :, :]], axis=1)
    if expanded_w:
        x_ = jnp.concatenate([x_, x_[:, :, -2:-1, :]], axis=2)
    Hp, Wp = x_.shape[1], x_.shape[2]
    Hh, Wh = Hp // 2, Wp // 2
    M = N * Hh * Wh

    # down path: 2x2 stride-2 convs (+ReLU) as tiled matmuls
    down_flat = conv2x2_s2(x_, down_wm, down_bm, relu=True)              # (M, OF)
    sigma_map = jnp.broadcast_to(
        noise_sigma.reshape(N, 1, 1, 1).astype(jnp.float32), (N, Hp, Wp, C))
    dsig_flat = conv2x2_s2(sigma_map, dsig_wm, dsig_bm, relu=True)       # (M, NS)
    concat4 = jnp.concatenate([down_flat, dsig_flat], axis=-1).reshape(N, Hh, Wh, OF + NS)

    # head: conv3x3 -> BN -> ReLU (conv emits the BN statistics)
    t, st = conv3x3(concat4, head_wm, head_bm)
    head = batchnorm_act(t, st, params['head_bn_g'].reshape(1, F),
                         params['head_bn_b'].reshape(1, F), relu=True)

    # residual body; the trailing `body + head` is fused into the last block's BN kernel
    body = head
    n_blk = len(blocks)
    for i, (c1, g1, b1, c2, g2, b2) in enumerate(blocks):
        t, st = conv3x3(body, c1[0], c1[1])
        t = batchnorm_act(t, st, g1, b1, relu=True)
        t, st = conv3x3(t, c2[0], c2[1])
        res = (body, head) if i == n_blk - 1 else (body,)
        body = batchnorm_act(t, st, g2, b2, relu=False, residuals=res)
    if n_blk == 0:
        body = head + head      # degenerate no-block config: body == head, so body + head

    # pre_up: conv3x3 -> BN -> ReLU with the `+ down` residual fused into the BN kernel
    down4 = down_flat.reshape(N, Hh, Wh, OF)
    t, st = conv3x3(body, preup_wm, preup_bm)
    pre_up = batchnorm_act(t, st, params['pre_up_bn_g'].reshape(1, OF),
                           params['pre_up_bn_b'].reshape(1, OF),
                           relu=True, residuals=(down4,))

    # up: ConvTranspose2d(k=2, s=2); the final `up + x` is fused into the matmul epilogue.
    # The residual is x_ rearranged into the matmul's (co, kh, kw) column layout; after
    # depth-to-space and cropping this equals `crop(up) + x` exactly, because x_ only
    # appends replicated rows/cols that the crop removes.
    res_flat = x_.reshape(N, Hh, 2, Wh, 2, C).transpose(0, 1, 3, 5, 2, 4).reshape(M, C * 4)
    up = convtranspose2x2_s2(pre_up.reshape(M, OF), up_wm, up_bm, res_flat, N, Hh, Wh, C)

    if expanded_h:
        up = up[:, :-1, :, :]
    if expanded_w:
        up = up[:, :, :-1, :]
    return jnp.transpose(up, (0, 3, 1, 2))


if __name__ == "__main__":
    key = jax.random.PRNGKey(0)
    pkey, xkey, skey = jax.random.split(key, 3)

    # Small config consistent with the module: 1 input channel, 4 sigma planes,
    # 16 output features, 2 mid ResBlocks, 32 feature maps.
    params = init_params(pkey, num_input_channels=1, num_layer_sigma=4,
                         output_features=16, num_mid_blocks=2, num_feature_maps=32)

    x = jax.random.normal(xkey, (2, 1, 16, 16), jnp.float32)
    noise_sigma = jax.random.uniform(skey, (2,), jnp.float32, 0.0, 0.2)

    fwd = jax.jit(genet_gray_forward)
    out = jax.block_until_ready(fwd(params, x, noise_sigma))
    assert out.shape == x.shape and out.dtype == jnp.float32
    print("KERNEL_OK")
</pallas_src>

<mosaic_0001>
module attributes {stable_mosaic.version = 11 : i64} {
  func.func @kernel(%arg0: i32, %arg1: memref<128x4xf32, #tpu.memory_space<vmem>>, %arg2: memref<4x16xbf16, #tpu.memory_space<vmem>>, %arg3: memref<1x16xf32, #tpu.memory_space<vmem>>, %arg4: memref<128x16xf32, #tpu.memory_space<vmem>>) attributes {dimension_semantics = [#tpu.dimension_semantics<parallel>], iteration_bounds = array<i64: 1>, scalar_prefetch = 0 : i64, scratch_operands = 0 : i64, tpu.core_type = #tpu.core_type<tc>, window_params = [{transform_indices = @transform_0, window_bounds = array<i64: 128, 4>}, {pipeline_mode = #tpu.pipeline_mode<synchronous>, transform_indices = @transform_1, window_bounds = array<i64: 4, 16>}, {pipeline_mode = #tpu.pipeline_mode<synchronous>, transform_indices = @transform_2, window_bounds = array<i64: 1, 16>}, {transform_indices = @transform_3, window_bounds = array<i64: 128, 16>}]} {
    %c0 = arith.constant 0 : index
    %c0_0 = arith.constant 0 : index
    %0 = vector.load %arg1[%c0, %c0_0] : memref<128x4xf32, #tpu.memory_space<vmem>>, vector<128x4xf32>
    %1 = arith.truncf %0 : vector<128x4xf32> to vector<128x4xbf16>
    %c0_1 = arith.constant 0 : index
    %c0_2 = arith.constant 0 : index
    %2 = vector.load %arg2[%c0_1, %c0_2] : memref<4x16xbf16, #tpu.memory_space<vmem>>, vector<4x16xbf16>
    %cst = arith.constant dense<0.000000e+00> : vector<128x16xf32>
    %3 = tpu.matmul %1, %2, %cst {dimension_numbers = #tpu.dot_dimension_numbers<[1], [0], [0], [1], [0, 0, 1, 1], [], []>} : vector<128x4xbf16>, vector<4x16xbf16>, vector<128x16xf32> -> vector<128x16xf32>
    %c0_3 = arith.constant 0 : index
    %c0_4 = arith.constant 0 : index
    %4 = vector.load %arg3[%c0_3, %c0_4] : memref<1x16xf32, #tpu.memory_space<vmem>>, vector<1x16xf32>
    %5 = vector.broadcast %4 : vector<1x16xf32> to vector<128x16xf32>
    %6 = arith.addf %3, %5 : vector<128x16xf32>
    %cst_5 = arith.constant 0.000000e+00 : f32
    %7 = vector.broadcast %cst_5 : f32 to vector<128x16xf32>
    %8 = arith.maximumf %6, %7 : vector<128x16xf32>
    %c0_6 = arith.constant 0 : index
    %c0_7 = arith.constant 0 : index
    %9 = vector.load %arg4[%c0_6, %c0_7] : memref<128x16xf32, #tpu.memory_space<vmem>>, vector<128x16xf32>
    tpu.vector_store %arg4[%c0_6, %c0_7], %8 {strides = array<i32>} : memref<128x16xf32, #tpu.memory_space<vmem>>, vector<128x16xf32>,
    return
  }
  func.func @transform_0(%arg0: i32) -> (i32, i32) {
    %c0_i32 = arith.constant 0 : i32
    %c0_i32_0 = arith.constant 0 : i32
    return %arg0, %c0_i32 : i32, i32
  }
  func.func @transform_1(%arg0: i32) -> (i32, i32) {
    %c0_i32 = arith.constant 0 : i32
    %c0_i32_0 = arith.constant 0 : i32
    %c0_i32_1 = arith.constant 0 : i32
    return %c0_i32, %c0_i32_0 : i32, i32
  }
  func.func @transform_2(%arg0: i32) -> (i32, i32) {
    %c0_i32 = arith.constant 0 : i32
    %c0_i32_0 = arith.constant 0 : i32
    %c0_i32_1 = arith.constant 0 : i32
    return %c0_i32, %c0_i32_0 : i32, i32
  }
  func.func @transform_3(%arg0: i32) -> (i32, i32) {
    %c0_i32 = arith.constant 0 : i32
    %c0_i32_0 = arith.constant 0 : i32
    return %arg0, %c0_i32 : i32, i32
  }
}

module attributes {stable_mosaic.version = 11 : i64} {
  func.func @kernel(%arg0: i32, %arg1: memref<128x4xf32, #tpu.memory_space<vmem>>, %arg2: memref<4x4xbf16, #tpu.memory_space<vmem>>, %arg3: memref<1x4xf32, #tpu.memory_space<vmem>>, %arg4: memref<128x4xf32, #tpu.memory_space<vmem>>) attributes {dimension_semantics = [#tpu.dimension_semantics<parallel>], iteration_bounds = array<i64: 1>, scalar_prefetch = 0 : i64, scratch_operands = 0 : i64, tpu.core_type = #tpu.core_type<tc>, window_params = [{transform_indices = @transform_0, window_bounds = array<i64: 128, 4>}, {pipeline_mode = #tpu.pipeline_mode<synchronous>, transform_indices = @transform_1, window_bounds = array<i64: 4, 4>}, {pipeline_mode = #tpu.pipeline_mode<synchronous>, transform_indices = @transform_2, window_bounds = array<i64: 1, 4>}, {transform_indices = @transform_3, window_bounds = array<i64: 128, 4>}]} {
    %c0 = arith.constant 0 : index
    %c0_0 = arith.constant 0 : index
    %0 = vector.load %arg1[%c0, %c0_0] : memref<128x4xf32, #tpu.memory_space<vmem>>, vector<128x4xf32>
    %1 = arith.truncf %0 : vector<128x4xf32> to vector<128x4xbf16>
    %c0_1 = arith.constant 0 : index
    %c0_2 = arith.constant 0 : index
    %2 = vector.load %arg2[%c0_1, %c0_2] : memref<4x4xbf16, #tpu.memory_space<vmem>>, vector<4x4xbf16>
    %cst = arith.constant dense<0.000000e+00> : vector<128x4xf32>
    %3 = tpu.matmul %1, %2, %cst {dimension_numbers = #tpu.dot_dimension_numbers<[1], [0], [0], [1], [0, 0, 1, 1], [], []>} : vector<128x4xbf16>, vector<4x4xbf16>, vector<128x4xf32> -> vector<128x4xf32>
    %c0_3 = arith.constant 0 : index
    %c0_4 = arith.constant 0 : index
    %4 = vector.load %arg3[%c0_3, %c0_4] : memref<1x4xf32, #tpu.memory_space<vmem>>, vector<1x4xf32>
    %5 = vector.broadcast %4 : vector<1x4xf32> to vector<128x4xf32>
    %6 = arith.addf %3, %5 : vector<128x4xf32>
    %cst_5 = arith.constant 0.000000e+00 : f32
    %7 = vector.broadcast %cst_5 : f32 to vector<128x4xf32>
    %8 = arith.maximumf %6, %7 : vector<128x4xf32>
    %c0_6 = arith.constant 0 : index
    %c0_7 = arith.constant 0 : index
    %9 = vector.load %arg4[%c0_6, %c0_7] : memref<128x4xf32, #tpu.memory_space<vmem>>, vector<128x4xf32>
    tpu.vector_store %arg4[%c0_6, %c0_7], %8 {strides = array<i32>} : memref<128x4xf32, #tpu.memory_space<vmem>>, vector<128x4xf32>,
    return
  }
  func.func @transform_0(%arg0: i32) -> (i32, i32) {
    %c0_i32 = arith.constant 0 : i32
    %c0_i32_0 = arith.constant 0 : i32
    return %arg0, %c0_i32 : i32, i32
  }
  func.func @transform_1(%arg0: i32) -> (i32, i32) {
    %c0_i32 = arith.constant 0 : i32
    %c0_i32_0 = arith.constant 0 : i32
    %c0_i32_1 = arith.constant 0 : i32
    return %c0_i32, %c0_i32_0 : i32, i32
  }
  func.func @transform_2(%arg0: i32) -> (i32, i32) {
    %c0_i32 = arith.constant 0 : i32
    %c0_i32_0 = arith.constant 0 : i32
    %c0_i32_1 = arith.constant 0 : i32
    return %c0_i32, %c0_i32_0 : i32, i32
  }
  func.func @transform_3(%arg0: i32) -> (i32, i32) {
    %c0_i32 = arith.constant 0 : i32
    %c0_i32_0 = arith.constant 0 : i32
    return %arg0, %c0_i32 : i32, i32
  }
}

module attributes {stable_mosaic.version = 11 : i64} {
  func.func @kernel(%arg0: i32, %arg1: memref<1x10x10x20xf32, #tpu.memory_space<vmem>>, %arg2: memref<180x32xbf16, #tpu.memory_space<vmem>>, %arg3: memref<1x32xf32, #tpu.memory_space<vmem>>, %arg4: memref<1x8x8x32xf32, #tpu.memory_space<vmem>>, %arg5: memref<1x2x32xf32, #tpu.memory_space<vmem>>, %arg6: memref<64x180xf32, #tpu.memory_space<vmem>>) attributes {dimension_semantics = [#tpu.dimension_semantics<parallel>], iteration_bounds = array<i64: 2>, scalar_prefetch = 0 : i64, scratch_operands = 1 : i64, tpu.core_type = #tpu.core_type<tc>, window_params = [{transform_indices = @transform_0, window_bounds = array<i64: 1, 10, 10, 20>}, {pipeline_mode = #tpu.pipeline_mode<synchronous>, transform_indices = @transform_1, window_bounds = array<i64: 180, 32>}, {pipeline_mode = #tpu.pipeline_mode<synchronous>, transform_indices = @transform_2, window_bounds = array<i64: 1, 32>}, {transform_indices = @transform_3, window_bounds = array<i64: 1, 8, 8, 32>}, {transform_indices = @transform_4, window_bounds = array<i64: 1, 2, 32>}]} {
    %c0 = arith.constant 0 : index
    %c0_0 = arith.constant 0 : index
    %0 = vector.load %arg2[%c0, %c0_0] : memref<180x32xbf16, #tpu.memory_space<vmem>>, vector<180x32xbf16>
    %c0_1 = arith.constant 0 : index
    %c0_2 = arith.constant 0 : index
    %1 = vector.load %arg3[%c0_1, %c0_2] : memref<1x32xf32, #tpu.memory_space<vmem>>, vector<1x32xf32>
    %cst = arith.constant 0.000000e+00 : f32
    %2 = vector.broadcast %cst : f32 to vector<1x32xf32>
    %cst_3 = arith.constant 0.000000e+00 : f32
    %3 = vector.broadcast %cst_3 : f32 to vector<1x32xf32>
    %c0_4 = arith.constant 0 : index
    %c0_5 = arith.constant 0 : index
    %c0_6 = arith.constant 0 : index
    %c0_7 = arith.constant 0 : index
    %4 = vector.load %arg1[%c0_4, %c0_5, %c0_6, %c0_7] : memref<1x10x10x20xf32, #tpu.memory_space<vmem>>, vector<1x8x8x20xf32>
    %5 = vector.shape_cast %4 : vector<1x8x8x20xf32> to vector<8x8x20xf32>
    %6 = vector.shape_cast %5 : vector<8x8x20xf32> to vector<64x20xf32>
    %c0_8 = arith.constant 0 : index
    %c0_9 = arith.constant 0 : index
    %7 = vector.load %arg6[%c0_8, %c0_9] : memref<64x180xf32, #tpu.memory_space<vmem>>, vector<64x20xf32>
    tpu.vector_store %arg6[%c0_8, %c0_9], %6 {strides = array<i32>} : memref<64x180xf32, #tpu.memory_space<vmem>>, vector<64x20xf32>,
    %c0_10 = arith.constant 0 : index
    %c0_11 = arith.constant 0 : index
    %c1 = arith.constant 1 : index
    %c0_12 = arith.constant 0 : index
    %8 = vector.load %arg1[%c0_10, %c0_11, %c1, %c0_12] : memref<1x10x10x20xf32, #tpu.memory_space<vmem>>, vector<1x8x8x20xf32>
    %9 = vector.shape_cast %8 : vector<1x8x8x20xf32> to vector<8x8x20xf32>
    %10 = vector.shape_cast %9 : vector<8x8x20xf32> to vector<64x20xf32>
    %c0_13 = arith.constant 0 : index
    %c20 = arith.constant 20 : index
    %11 = vector.load %arg6[%c0_13, %c20] : memref<64x180xf32, #tpu.memory_space<vmem>>, vector<64x20xf32>
    tpu.vector_store %arg6[%c0_13, %c20], %10 {strides = array<i32>} : memref<64x180xf32, #tpu.memory_space<vmem>>, vector<64x20xf32>,
    %c0_14 = arith.constant 0 : index
    %c0_15 = arith.constant 0 : index
    %c2 = arith.constant 2 : index
    %c0_16 = arith.constant 0 : index
    %12 = vector.load %arg1[%c0_14, %c0_15, %c2, %c0_16] : memref<1x10x10x20xf32, #tpu.memory_space<vmem>>, vector<1x8x8x20xf32>
    %13 = vector.shape_cast %12 : vector<1x8x8x20xf32> to vector<8x8x20xf32>
    %14 = vector.shape_cast %13 : vector<8x8x20xf32> to vector<64x20xf32>
    %c0_17 = arith.constant 0 : index
    %c40 = arith.constant 40 : index
    %15 = vector.load %arg6[%c0_17, %c40] : memref<64x180xf32, #tpu.memory_space<vmem>>, vector<64x20xf32>
    tpu.vector_store %arg6[%c0_17, %c40], %14 {strides = array<i32>} : memref<64x180xf32, #tpu.memory_space<vmem>>, vector<64x20xf32>,
    %c0_18 = arith.constant 0 : index
    %c1_19 = arith.constant 1 : index
    %c0_20 = arith.constant 0 : index
    %c0_21 = arith.constant 0 : index
    %16 = vector.load %arg1[%c0_18, %c1_19, %c0_20, %c0_21] : memref<1x10x10x20xf32, #tpu.memory_space<vmem>>, vector<1x8x8x20xf32>
    %17 = vector.shape_cast %16 : vector<1x8x8x20xf32> to vector<8x8x20xf32>
    %18 = vector.shape_cast %17 : vector<8x8x20xf32> to vector<64x20xf32>
    %c0_22 = arith.constant 0 : index
    %c60 = arith.constant 60 : index
    %19 = vector.load %arg6[%c0_22, %c60] : memref<64x180xf32, #tpu.memory_space<vmem>>, vector<64x20xf32>
    tpu.vector_store %arg6[%c0_22, %c60], %18 {strides = array<i32>} : memref<64x180xf32, #tpu.memory_space<vmem>>, vector<64x20xf32>,
    %c0_23 = arith.constant 0 : index
    %c1_24 = arith.constant 1 : index
    %c1_25 = arith.constant 1 : index
    %c0_26 = arith.constant 0 : index
    %20 = vector.load %arg1[%c0_23, %c1_24, %c1_25, %c0_26] : memref<1x10x10x20xf32, #tpu.memory_space<vmem>>, vector<1x8x8x20xf32>
    %21 = vector.shape_cast %20 : vector<1x8x8x20xf32> to vector<8x8x20xf32>
    %22 = vector.shape_cast %21 : vector<8x8x20xf32> to vector<64x20xf32>
    %c0_27 = arith.constant 0 : index
    %c80 = arith.constant 80 : index
    %23 = vector.load %arg6[%c0_27, %c80] : memref<64x180xf32, #tpu.memory_space<vmem>>, vector<64x20xf32>
    tpu.vector_store %arg6[%c0_27, %c80], %22 {strides = array<i32>} : memref<64x180xf32, #tpu.memory_space<vmem>>, vector<64x20xf32>,
    %c0_28 = arith.constant 0 : index
    %c1_29 = arith.constant 1 : index
    %c2_30 = arith.constant 2 : index
    %c0_31 = arith.constant 0 : index
    %24 = vector.load %arg1[%c0_28, %c1_29, %c2_30, %c0_31] : memref<1x10x10x20xf32, #tpu.memory_space<vmem>>, vector<1x8x8x20xf32>
    %25 = vector.shape_cast %24 : vector<1x8x8x20xf32> to vector<8x8x20xf32>
    %26 = vector.shape_cast %25 : vector<8x8x20xf32> to vector<64x20xf32>
    %c0_32 = arith.constant 0 : index
    %c100 = arith.constant 100 : index
    %27 = vector.load %arg6[%c0_32, %c100] : memref<64x180xf32, #tpu.memory_space<vmem>>, vector<64x20xf32>
    tpu.vector_store %arg6[%c0_32, %c100], %26 {strides = array<i32>} : memref<64x180xf32, #tpu.memory_space<vmem>>, vector<64x20xf32>,
    %c0_33 = arith.constant 0 : index
    %c2_34 = arith.constant 2 : index
    %c0_35 = arith.constant 0 : index
    %c0_36 = arith.constant 0 : index
    %28 = vector.load %arg1[%c0_33, %c2_34, %c0_35, %c0_36] : memref<1x10x10x20xf32, #tpu.memory_space<vmem>>, vector<1x8x8x20xf32>
    %29 = vector.shape_cast %28 : vector<1x8x8x20xf32> to vector<8x8x20xf32>
    %30 = vector.shape_cast %29 : vector<8x8x20xf32> to vector<64x20xf32>
    %c0_37 = arith.constant 0 : index
    %c120 = arith.constant 120 : index
    %31 = vector.load %arg6[%c0_37, %c120] : memref<64x180xf32, #tpu.memory_space<vmem>>, vector<64x20xf32>
    tpu.vector_store %arg6[%c0_37, %c120], %30 {strides = array<i32>} : memref<64x180xf32, #tpu.memory_space<vmem>>, vector<64x20xf32>,
    %c0_38 = arith.constant 0 : index
    %c2_39 = arith.constant 2 : index
    %c1_40 = arith.constant 1 : index
    %c0_41 = arith.constant 0 : index
    %32 = vector.load %arg1[%c0_38, %c2_39, %c1_40, %c0_41] : memref<1x10x10x20xf32, #tpu.memory_space<vmem>>, vector<1x8x8x20xf32>
    %33 = vector.shape_cast %32 : vector<1x8x8x20xf32> to vector<8x8x20xf32>
    %34 = vector.shape_cast %33 : vector<8x8x20xf32> to vector<64x20xf32>
    %c0_42 = arith.constant 0 : index
    %c140 = arith.constant 140 : index
    %35 = vector.load %arg6[%c0_42, %c140] : memref<64x180xf32, #tpu.memory_space<vmem>>, vector<64x20xf32>
    tpu.vector_store %arg6[%c0_42, %c140], %34 {strides = array<i32>} : memref<64x180xf32, #tpu.memory_space<vmem>>, vector<64x20xf32>,
    %c0_43 = arith.constant 0 : index
    %c2_44 = arith.constant 2 : index
    %c2_45 = arith.constant 2 : index
    %c0_46 = arith.constant 0 : index
    %36 = vector.load %arg1[%c0_43, %c2_44, %c2_45, %c0_46] : memref<1x10x10x20xf32, #tpu.memory_space<vmem>>, vector<1x8x8x20xf32>
    %37 = vector.shape_cast %36 : vector<1x8x8x20xf32> to vector<8x8x20xf32>
    %38 = vector.shape_cast %37 : vector<8x8x20xf32> to vector<64x20xf32>
    %c0_47 = arith.constant 0 : index
    %c160 = arith.constant 160 : index
    %39 = vector.load %arg6[%c0_47, %c160] : memref<64x180xf32, #tpu.memory_space<vmem>>, vector<64x20xf32>
    tpu.vector_store %arg6[%c0_47, %c160], %38 {strides = array<i32>} : memref<64x180xf32, #tpu.memory_space<vmem>>, vector<64x20xf32>,
    %c0_48 = arith.constant 0 : index
    %c0_49 = arith.constant 0 : index
    %40 = vector.load %arg6[%c0_48, %c0_49] : memref<64x180xf32, #tpu.memory_space<vmem>>, vector<64x180xf32>
    %41 = arith.truncf %40 : vector<64x180xf32> to vector<64x180xbf16>
    %cst_50 = arith.constant dense<0.000000e+00> : vector<64x32xf32>
    %42 = tpu.matmul %41, %0, %cst_50 {dimension_numbers = #tpu.dot_dimension_numbers<[1], [0], [0], [1], [0, 0, 1, 1], [], []>} : vector<64x180xbf16>, vector<180x32xbf16>, vector<64x32xf32> -> vector<64x32xf32>
    %43 = vector.broadcast %1 : vector<1x32xf32> to vector<64x32xf32>
    %44 = arith.addf %42, %43 : vector<64x32xf32>
    %cst_51 = arith.constant dense<0.000000e+00> : vector<32xf32>
    %45 = vector.multi_reduction <add>, %44, %cst_51 [0] : vector<64x32xf32> to vector<32xf32>
    %46 = vector.shape_cast %45 : vector<32xf32> to vector<1x32xf32>
    %47 = arith.addf %2, %46 : vector<1x32xf32>
    %48 = arith.mulf %44, %44 : vector<64x32xf32>
    %cst_52 = arith.constant dense<0.000000e+00> : vector<32xf32>
    %49 = vector.multi_reduction <add>, %48, %cst_52 [0] : vector<64x32xf32> to vector<32xf32>
    %50 = vector.shape_cast %49 : vector<32xf32> to vector<1x32xf32>
    %51 = arith.addf %3, %50 : vector<1x32xf32>
    %52 = vector.shape_cast %44 : vector<64x32xf32> to vector<8x8x32xf32>
    %c0_53 = arith.constant 0 : index
    %c0_54 = arith.constant 0 : index
    %c0_55 = arith.constant 0 : index
    %c0_56 = arith.constant 0 : index
    %53 = vector.load %arg4[%c0_53, %c0_54, %c0_55, %c0_56] : memref<1x8x8x32xf32, #tpu.memory_space<vmem>>, vector<1x8x8x32xf32>
    %54 = vector.shape_cast %53 : vector<1x8x8x32xf32> to vector<8x8x32xf32>
    %55 = vector.shape_cast %52 : vector<8x8x32xf32> to vector<1x8x8x32xf32>
    tpu.vector_store %arg4[%c0_53, %c0_54, %c0_55, %c0_56], %55 {strides = array<i32>} : memref<1x8x8x32xf32, #tpu.memory_space<vmem>>, vector<1x8x8x32xf32>,
    %c0_57 = arith.constant 0 : index
    %c0_58 = arith.constant 0 : index
    %c0_59 = arith.constant 0 : index
    %56 = vector.load %arg5[%c0_57, %c0_58, %c0_59] : memref<1x2x32xf32, #tpu.memory_space<vmem>>, vector<1x1x32xf32>
    %57 = vector.shape_cast %56 : vector<1x1x32xf32> to vector<1x32xf32>
    %58 = vector.shape_cast %47 : vector<1x32xf32> to vector<1x1x32xf32>
    tpu.vector_store %arg5[%c0_57, %c0_58, %c0_59], %58 {strides = array<i32>} : memref<1x2x32xf32, #tpu.memory_space<vmem>>, vector<1x1x32xf32>,
    %c0_60 = arith.constant 0 : index
    %c1_61 = arith.constant 1 : index
    %c0_62 = arith.constant 0 : index
    %59 = vector.load %arg5[%c0_60, %c1_61, %c0_62] : memref<1x2x32xf32, #tpu.memory_space<vmem>>, vector<1x1x32xf32>
    %60 = vector.shape_cast %59 : vector<1x1x32xf32> to vector<1x32xf32>
    %61 = vector.shape_cast %51 : vector<1x32xf32> to vector<1x1x32xf32>
    tpu.vector_store %arg5[%c0_60, %c1_61, %c0_62], %61 {strides = array<i32>} : memref<1x2x32xf32, #tpu.memory_space<vmem>>, vector<1x1x32xf32>,
    return
  }
  func.func @transform_0(%arg0: i32) -> (i32, i32, i32, i32) {
    %c0_i32 = arith.constant 0 : i32
    %c0_i32_0 = arith.constant 0 : i32
    %c0_i32_1 = arith.constant 0 : i32
    %c0_i32_2 = arith.constant 0 : i32
    return %arg0, %c0_i32, %c0_i32_0, %c0_i32_1 : i32, i32, i32, i32
  }
  func.func @transform_1(%arg0: i32) -> (i32, i32) {
    %c0_i32 = arith.constant 0 : i32
    %c0_i32_0 = arith.constant 0 : i32
    %c0_i32_1 = arith.constant 0 : i32
    return %c0_i32, %c0_i32_0 : i32, i32
  }
  func.func @transform_2(%arg0: i32) -> (i32, i32) {
    %c0_i32 = arith.constant 0 : i32
    %c0_i32_0 = arith.constant 0 : i32
    %c0_i32_1 = arith.constant 0 : i32
    return %c0_i32, %c0_i32_0 : i32, i32
  }
  func.func @transform_3(%arg0: i32) -> (i32, i32, i32, i32) {
    %c0_i32 = arith.constant 0 : i32
    %c0_i32_0 = arith.constant 0 : i32
    %c0_i32_1 = arith.constant 0 : i32
    %c0_i32_2 = arith.constant 0 : i32
    return %arg0, %c0_i32, %c0_i32_0, %c0_i32_1 : i32, i32, i32, i32
  }
  func.func @transform_4(%arg0: i32) -> (i32, i32, i32) {
    %c0_i32 = arith.constant 0 : i32
    %c0_i32_0 = arith.constant 0 : i32
    %c0_i32_1 = arith.constant 0 : i32
    return %arg0, %c0_i32, %c0_i32_0 : i32, i32, i32
  }
}

module attributes {stable_mosaic.version = 11 : i64} {
  func.func @kernel(%arg0: i32, %arg1: i32, %arg2: memref<1x8x8x32xf32, #tpu.memory_space<vmem>>, %arg3: memref<2x2x32xf32, #tpu.memory_space<vmem>>, %arg4: memref<1x32xf32, #tpu.memory_space<vmem>>, %arg5: memref<1x32xf32, #tpu.memory_space<vmem>>, %arg6: memref<1x8x8x32xf32, #tpu.memory_space<vmem>>) attributes {dimension_semantics = [#tpu.dimension_semantics<parallel>, #tpu.dimension_semantics<parallel>], iteration_bounds = array<i64: 2, 1>, scalar_prefetch = 0 : i64, scratch_operands = 0 : i64, tpu.core_type = #tpu.core_type<tc>, window_params = [{transform_indices = @transform_0, window_bounds = array<i64: 1, 8, 8, 32>}, {pipeline_mode = #tpu.pipeline_mode<synchronous>, transform_indices = @transform_1, window_bounds = array<i64: 2, 2, 32>}, {pipeline_mode = #tpu.pipeline_mode<synchronous>, transform_indices = @transform_2, window_bounds = array<i64: 1, 32>}, {pipeline_mode = #tpu.pipeline_mode<synchronous>, transform_indices = @transform_3, window_bounds = array<i64: 1, 32>}, {transform_indices = @transform_4, window_bounds = array<i64: 1, 8, 8, 32>}]} {
    %c0 = arith.constant 0 : index
    %c0_0 = arith.constant 0 : index
    %c0_1 = arith.constant 0 : index
    %0 = vector.load %arg3[%c0, %c0_0, %c0_1] : memref<2x2x32xf32, #tpu.memory_space<vmem>>, vector<2x2x32xf32>
    %cst = arith.constant dense<0.000000e+00> : vector<2x32xf32>
    %1 = vector.multi_reduction <add>, %0, %cst [0] : vector<2x2x32xf32> to vector<2x32xf32>
    %2 = vector.extract_strided_slice %1 {offsets = [0, 0], sizes = [1, 32], strides = [1, 1]} : vector<2x32xf32> to vector<1x32xf32>
    %cst_2 = arith.constant 7.812500e-03 : f32
    %3 = vector.broadcast %cst_2 : f32 to vector<1x32xf32>
    %4 = arith.mulf %2, %3 : vector<1x32xf32>
    %5 = vector.extract_strided_slice %1 {offsets = [1, 0], sizes = [1, 32], strides = [1, 1]} : vector<2x32xf32> to vector<1x32xf32>
    %cst_3 = arith.constant 7.812500e-03 : f32
    %6 = vector.broadcast %cst_3 : f32 to vector<1x32xf32>
    %7 = arith.mulf %5, %6 : vector<1x32xf32>
    %8 = arith.mulf %4, %4 : vector<1x32xf32>
    %9 = arith.subf %7, %8 : vector<1x32xf32>
    %c0_4 = arith.constant 0 : index
    %c0_5 = arith.constant 0 : index
    %10 = vector.load %arg4[%c0_4, %c0_5] : memref<1x32xf32, #tpu.memory_space<vmem>>, vector<1x32xf32>
    %cst_6 = arith.constant 9.99999974E-6 : f32
    %11 = vector.broadcast %cst_6 : f32 to vector<1x32xf32>
    %12 = arith.addf %9, %11 : vector<1x32xf32>
    %13 = math.rsqrt %12 : vector<1x32xf32>
    %14 = arith.mulf %10, %13 : vector<1x32xf32>
    %c0_7 = arith.constant 0 : index
    %c0_8 = arith.constant 0 : index
    %15 = vector.load %arg5[%c0_7, %c0_8] : memref<1x32xf32, #tpu.memory_space<vmem>>, vector<1x32xf32>
    %16 = arith.mulf %4, %14 : vector<1x32xf32>
    %17 = arith.subf %15, %16 : vector<1x32xf32>
    %c0_9 = arith.constant 0 : index
    %c0_10 = arith.constant 0 : index
    %c0_11 = arith.constant 0 : index
    %c0_12 = arith.constant 0 : index
    %18 = vector.load %arg2[%c0_9, %c0_10, %c0_11, %c0_12] : memref<1x8x8x32xf32, #tpu.memory_space<vmem>>, vector<1x8x8x32xf32>
    %19 = vector.shape_cast %18 : vector<1x8x8x32xf32> to vector<8x8x32xf32>
    %20 = vector.shape_cast %14 : vector<1x32xf32> to vector<1x1x32xf32>
    %21 = vector.broadcast %20 : vector<1x1x32xf32> to vector<8x8x32xf32>
    %22 = arith.mulf %19, %21 : vector<8x8x32xf32>
    %23 = vector.shape_cast %17 : vector<1x32xf32> to vector<1x1x32xf32>
    %24 = vector.broadcast %23 : vector<1x1x32xf32> to vector<8x8x32xf32>
    %25 = arith.addf %22, %24 : vector<8x8x32xf32>
    %cst_13 = arith.constant 0.000000e+00 : f32
    %26 = vector.broadcast %cst_13 : f32 to vector<8x8x32xf32>
    %27 = arith.maximumf %25, %26 : vector<8x8x32xf32>
    %c0_14 = arith.constant 0 : index
    %c0_15 = arith.constant 0 : index
    %c0_16 = arith.constant 0 : index
    %c0_17 = arith.constant 0 : index
    %28 = vector.load %arg6[%c0_14, %c0_15, %c0_16, %c0_17] : memref<1x8x8x32xf32, #tpu.memory_space<vmem>>, vector<1x8x8x32xf32>
    %29 = vector.shape_cast %28 : vector<1x8x8x32xf32> to vector<8x8x32xf32>
    %30 = vector.shape_cast %27 : vector<8x8x32xf32> to vector<1x8x8x32xf32>
    tpu.vector_store %arg6[%c0_14, %c0_15, %c0_16, %c0_17], %30 {strides = array<i32>} : memref<1x8x8x32xf32, #tpu.memory_space<vmem>>, vector<1x8x8x32xf32>,
    return
  }
  func.func @transform_0(%arg0: i32, %arg1: i32) -> (i32, i32, i32, i32) {
    %c0_i32 = arith.constant 0 : i32
    %c0_i32_0 = arith.constant 0 : i32
    %c0_i32_1 = arith.constant 0 : i32
    return %arg0, %arg1, %c0_i32, %c0_i32_0 : i32, i32, i32, i32
  }
  func.func @transform_1(%arg0: i32, %arg1: i32) -> (i32, i32, i32) {
    %c0_i32 = arith.constant 0 : i32
    %c0_i32_0 = arith.constant 0 : i32
    %c0_i32_1 = arith.constant 0 : i32
    %c0_i32_2 = arith.constant 0 : i32
    return %c0_i32, %c0_i32_0, %c0_i32_1 : i32, i32, i32
  }
  func.func @transform_2(%arg0: i32, %arg1: i32) -> (i32, i32) {
    %c0_i32 = arith.constant 0 : i32
    %c0_i32_0 = arith.constant 0 : i32
    %c0_i32_1 = arith.constant 0 : i32
    return %c0_i32, %c0_i32_0 : i32, i32
  }
  func.func @transform_3(%arg0: i32, %arg1: i32) -> (i32, i32) {
    %c0_i32 = arith.constant 0 : i32
    %c0_i32_0 = arith.constant 0 : i32
    %c0_i32_1 = arith.constant 0 : i32
    return %c0_i32, %c0_i32_0 : i32, i32
  }
  func.func @transform_4(%arg0: i32, %arg1: i32) -> (i32, i32, i32, i32) {
    %c0_i32 = arith.constant 0 : i32
    %c0_i32_0 = arith.constant 0 : i32
    %c0_i32_1 = arith.constant 0 : i32
    return %arg0, %arg1, %c0_i32, %c0_i32_0 : i32, i32, i32, i32
  }
}

module attributes {stable_mosaic.version = 11 : i64} {
  func.func @kernel(%arg0: i32, %arg1: i32, %arg2: memref<1x8x8x32xf32, #tpu.memory_space<vmem>>, %arg3: memref<2x2x32xf32, #tpu.memory_space<vmem>>, %arg4: memref<1x32xf32, #tpu.memory_space<vmem>>, %arg5: memref<1x32xf32, #tpu.memory_space<vmem>>, %arg6: memref<1x8x8x32xf32, #tpu.memory_space<vmem>>, %arg7: memref<1x8x8x32xf32, #tpu.memory_space<vmem>>) attributes {dimension_semantics = [#tpu.dimension_semantics<parallel>, #tpu.dimension_semantics<parallel>], iteration_bounds = array<i64: 2, 1>, scalar_prefetch = 0 : i64, scratch_operands = 0 : i64, tpu.core_type = #tpu.core_type<tc>, window_params = [{transform_indices = @transform_0, window_bounds = array<i64: 1, 8, 8, 32>}, {pipeline_mode = #tpu.pipeline_mode<synchronous>, transform_indices = @transform_1, window_bounds = array<i64: 2, 2, 32>}, {pipeline_mode = #tpu.pipeline_mode<synchronous>, transform_indices = @transform_2, window_bounds = array<i64: 1, 32>}, {pipeline_mode = #tpu.pipeline_mode<synchronous>, transform_indices = @transform_3, window_bounds = array<i64: 1, 32>}, {transform_indices = @transform_4, window_bounds = array<i64: 1, 8, 8, 32>}, {transform_indices = @transform_5, window_bounds = array<i64: 1, 8, 8, 32>}]} {
    %c0 = arith.constant 0 : index
    %c0_0 = arith.constant 0 : index
    %c0_1 = arith.constant 0 : index
    %0 = vector.load %arg3[%c0, %c0_0, %c0_1] : memref<2x2x32xf32, #tpu.memory_space<vmem>>, vector<2x2x32xf32>
    %cst = arith.constant dense<0.000000e+00> : vector<2x32xf32>
    %1 = vector.multi_reduction <add>, %0, %cst [0] : vector<2x2x32xf32> to vector<2x32xf32>
    %2 = vector.extract_strided_slice %1 {offsets = [0, 0], sizes = [1, 32], strides = [1, 1]} : vector<2x32xf32> to vector<1x32xf32>
    %cst_2 = arith.constant 7.812500e-03 : f32
    %3 = vector.broadcast %cst_2 : f32 to vector<1x32xf32>
    %4 = arith.mulf %2, %3 : vector<1x32xf32>
    %5 = vector.extract_strided_slice %1 {offsets = [1, 0], sizes = [1, 32], strides = [1, 1]} : vector<2x32xf32> to vector<1x32xf32>
    %cst_3 = arith.constant 7.812500e-03 : f32
    %6 = vector.broadcast %cst_3 : f32 to vector<1x32xf32>
    %7 = arith.mulf %5, %6 : vector<1x32xf32>
    %8 = arith.mulf %4, %4 : vector<1x32xf32>
    %9 = arith.subf %7, %8 : vector<1x32xf32>
    %c0_4 = arith.constant 0 : index
    %c0_5 = arith.constant 0 : index
    %10 = vector.load %arg4[%c0_4, %c0_5] : memref<1x32xf32, #tpu.memory_space<vmem>>, vector<1x32xf32>
    %cst_6 = arith.constant 9.99999974E-6 : f32
    %11 = vector.broadcast %cst_6 : f32 to vector<1x32xf32>
    %12 = arith.addf %9, %11 : vector<1x32xf32>
    %13 = math.rsqrt %12 : vector<1x32xf32>
    %14 = arith.mulf %10, %13 : vector<1x32xf32>
    %c0_7 = arith.constant 0 : index
    %c0_8 = arith.constant 0 : index
    %15 = vector.load %arg5[%c0_7, %c0_8] : memref<1x32xf32, #tpu.memory_space<vmem>>, vector<1x32xf32>
    %16 = arith.mulf %4, %14 : vector<1x32xf32>
    %17 = arith.subf %15, %16 : vector<1x32xf32>
    %c0_9 = arith.constant 0 : index
    %c0_10 = arith.constant 0 : index
    %c0_11 = arith.constant 0 : index
    %c0_12 = arith.constant 0 : index
    %18 = vector.load %arg2[%c0_9, %c0_10, %c0_11, %c0_12] : memref<1x8x8x32xf32, #tpu.memory_space<vmem>>, vector<1x8x8x32xf32>
    %19 = vector.shape_cast %18 : vector<1x8x8x32xf32> to vector<8x8x32xf32>
    %20 = vector.shape_cast %14 : vector<1x32xf32> to vector<1x1x32xf32>
    %21 = vector.broadcast %20 : vector<1x1x32xf32> to vector<8x8x32xf32>
    %22 = arith.mulf %19, %21 : vector<8x8x32xf32>
    %23 = vector.shape_cast %17 : vector<1x32xf32> to vector<1x1x32xf32>
    %24 = vector.broadcast %23 : vector<1x1x32xf32> to vector<8x8x32xf32>
    %25 = arith.addf %22, %24 : vector<8x8x32xf32>
    %c0_13 = arith.constant 0 : index
    %c0_14 = arith.constant 0 : index
    %c0_15 = arith.constant 0 : index
    %c0_16 = arith.constant 0 : index
    %26 = vector.load %arg6[%c0_13, %c0_14, %c0_15, %c0_16] : memref<1x8x8x32xf32, #tpu.memory_space<vmem>>, vector<1x8x8x32xf32>
    %27 = vector.shape_cast %26 : vector<1x8x8x32xf32> to vector<8x8x32xf32>
    %28 = arith.addf %25, %27 : vector<8x8x32xf32>
    %c0_17 = arith.constant 0 : index
    %c0_18 = arith.constant 0 : index
    %c0_19 = arith.constant 0 : index
    %c0_20 = arith.constant 0 : index
    %29 = vector.load %arg7[%c0_17, %c0_18, %c0_19, %c0_20] : memref<1x8x8x32xf32, #tpu.memory_space<vmem>>, vector<1x8x8x32xf32>
    %30 = vector.shape_cast %29 : vector<1x8x8x32xf32> to vector<8x8x32xf32>
    %31 = vector.shape_cast %28 : vector<8x8x32xf32> to vector<1x8x8x32xf32>
    tpu.vector_store %arg7[%c0_17, %c0_18, %c0_19, %c0_20], %31 {strides = array<i32>} : memref<1x8x8x32xf32, #tpu.memory_space<vmem>>, vector<1x8x8x32xf32>,
    return
  }
  func.func @transform_0(%arg0: i32, %arg1: i32) -> (i32, i32, i32, i32) {
    %c0_i32 = arith.constant 0 : i32
    %c0_i32_0 = arith.constant 0 : i32
    %c0_i32_1 = arith.constant 0 : i32
    return %arg0, %arg1, %c0_i32, %c0_i32_0 : i32, i32, i32, i32
  }
  func.func @transform_1(%arg0: i32, %arg1: i32) -> (i32, i32, i32) {
    %c0_i32 = arith.constant 0 : i32
    %c0_i32_0 = arith.constant 0 : i32
    %c0_i32_1 = arith.constant 0 : i32
    %c0_i32_2 = arith.constant 0 : i32
    return %c0_i32, %c0_i32_0, %c0_i32_1 : i32, i32, i32
  }
  func.func @transform_2(%arg0: i32, %arg1: i32) -> (i32, i32) {
    %c0_i32 = arith.constant 0 : i32
    %c0_i32_0 = arith.constant 0 : i32
    %c0_i32_1 = arith.constant 0 : i32
    return %c0_i32, %c0_i32_0 : i32, i32
  }
  func.func @transform_3(%arg0: i32, %arg1: i32) -> (i32, i32) {
    %c0_i32 = arith.constant 0 : i32
    %c0_i32_0 = arith.constant 0 : i32
    %c0_i32_1 = arith.constant 0 : i32
    return %c0_i32, %c0_i32_0 : i32, i32
  }
  func.func @transform_4(%arg0: i32, %arg1: i32) -> (i32, i32, i32, i32) {
    %c0_i32 = arith.constant 0 : i32
    %c0_i32_0 = arith.constant 0 : i32
    %c0_i32_1 = arith.constant 0 : i32
    return %arg0, %arg1, %c0_i32, %c0_i32_0 : i32, i32, i32, i32
  }
  func.func @transform_5(%arg0: i32, %arg1: i32) -> (i32, i32, i32, i32) {
    %c0_i32 = arith.constant 0 : i32
    %c0_i32_0 = arith.constant 0 : i32
    %c0_i32_1 = arith.constant 0 : i32
    return %arg0, %arg1, %c0_i32, %c0_i32_0 : i32, i32, i32, i32
  }
}

module attributes {stable_mosaic.version = 11 : i64} {
  func.func @kernel(%arg0: i32, %arg1: memref<1x10x10x32xf32, #tpu.memory_space<vmem>>, %arg2: memref<288x32xbf16, #tpu.memory_space<vmem>>, %arg3: memref<1x32xf32, #tpu.memory_space<vmem>>, %arg4: memref<1x8x8x32xf32, #tpu.memory_space<vmem>>, %arg5: memref<1x2x32xf32, #tpu.memory_space<vmem>>, %arg6: memref<64x288xf32, #tpu.memory_space<vmem>>) attributes {dimension_semantics = [#tpu.dimension_semantics<parallel>], iteration_bounds = array<i64: 2>, scalar_prefetch = 0 : i64, scratch_operands = 1 : i64, tpu.core_type = #tpu.core_type<tc>, window_params = [{transform_indices = @transform_0, window_bounds = array<i64: 1, 10, 10, 32>}, {pipeline_mode = #tpu.pipeline_mode<synchronous>, transform_indices = @transform_1, window_bounds = array<i64: 288, 32>}, {pipeline_mode = #tpu.pipeline_mode<synchronous>, transform_indices = @transform_2, window_bounds = array<i64: 1, 32>}, {transform_indices = @transform_3, window_bounds = array<i64: 1, 8, 8, 32>}, {transform_indices = @transform_4, window_bounds = array<i64: 1, 2, 32>}]} {
    %c0 = arith.constant 0 : index
    %c0_0 = arith.constant 0 : index
    %0 = vector.load %arg2[%c0, %c0_0] : memref<288x32xbf16, #tpu.memory_space<vmem>>, vector<288x32xbf16>
    %c0_1 = arith.constant 0 : index
    %c0_2 = arith.constant 0 : index
    %1 = vector.load %arg3[%c0_1, %c0_2] : memref<1x32xf32, #tpu.memory_space<vmem>>, vector<1x32xf32>
    %cst = arith.constant 0.000000e+00 : f32
    %2 = vector.broadcast %cst : f32 to vector<1x32xf32>
    %cst_3 = arith.constant 0.000000e+00 : f32
    %3 = vector.broadcast %cst_3 : f32 to vector<1x32xf32>
    %c0_4 = arith.constant 0 : index
    %c0_5 = arith.constant 0 : index
    %c0_6 = arith.constant 0 : index
    %c0_7 = arith.constant 0 : index
    %4 = vector.load %arg1[%c0_4, %c0_5, %c0_6, %c0_7] : memref<1x10x10x32xf32, #tpu.memory_space<vmem>>, vector<1x8x8x32xf32>
    %5 = vector.shape_cast %4 : vector<1x8x8x32xf32> to vector<8x8x32xf32>
    %6 = vector.shape_cast %5 : vector<8x8x32xf32> to vector<64x32xf32>
    %c0_8 = arith.constant 0 : index
    %c0_9 = arith.constant 0 : index
    %7 = vector.load %arg6[%c0_8, %c0_9] : memref<64x288xf32, #tpu.memory_space<vmem>>, vector<64x32xf32>
    tpu.vector_store %arg6[%c0_8, %c0_9], %6 {strides = array<i32>} : memref<64x288xf32, #tpu.memory_space<vmem>>, vector<64x32xf32>,
    %c0_10 = arith.constant 0 : index
    %c0_11 = arith.constant 0 : index
    %c1 = arith.constant 1 : index
    %c0_12 = arith.constant 0 : index
    %8 = vector.load %arg1[%c0_10, %c0_11, %c1, %c0_12] : memref<1x10x10x32xf32, #tpu.memory_space<vmem>>, vector<1x8x8x32xf32>
    %9 = vector.shape_cast %8 : vector<1x8x8x32xf32> to vector<8x8x32xf32>
    %10 = vector.shape_cast %9 : vector<8x8x32xf32> to vector<64x32xf32>
    %c0_13 = arith.constant 0 : index
    %c32 = arith.constant 32 : index
    %11 = vector.load %arg6[%c0_13, %c32] : memref<64x288xf32, #tpu.memory_space<vmem>>, vector<64x32xf32>
    tpu.vector_store %arg6[%c0_13, %c32], %10 {strides = array<i32>} : memref<64x288xf32, #tpu.memory_space<vmem>>, vector<64x32xf32>,
    %c0_14 = arith.constant 0 : index
    %c0_15 = arith.constant 0 : index
    %c2 = arith.constant 2 : index
    %c0_16 = arith.constant 0 : index
    %12 = vector.load %arg1[%c0_14, %c0_15, %c2, %c0_16] : memref<1x10x10x32xf32, #tpu.memory_space<vmem>>, vector<1x8x8x32xf32>
    %13 = vector.shape_cast %12 : vector<1x8x8x32xf32> to vector<8x8x32xf32>
    %14 = vector.shape_cast %13 : vector<8x8x32xf32> to vector<64x32xf32>
    %c0_17 = arith.constant 0 : index
    %c64 = arith.constant 64 : index
    %15 = vector.load %arg6[%c0_17, %c64] : memref<64x288xf32, #tpu.memory_space<vmem>>, vector<64x32xf32>
    tpu.vector_store %arg6[%c0_17, %c64], %14 {strides = array<i32>} : memref<64x288xf32, #tpu.memory_space<vmem>>, vector<64x32xf32>,
    %c0_18 = arith.constant 0 : index
    %c1_19 = arith.constant 1 : index
    %c0_20 = arith.constant 0 : index
    %c0_21 = arith.constant 0 : index
    %16 = vector.load %arg1[%c0_18, %c1_19, %c0_20, %c0_21] : memref<1x10x10x32xf32, #tpu.memory_space<vmem>>, vector<1x8x8x32xf32>
    %17 = vector.shape_cast %16 : vector<1x8x8x32xf32> to vector<8x8x32xf32>
    %18 = vector.shape_cast %17 : vector<8x8x32xf32> to vector<64x32xf32>
    %c0_22 = arith.constant 0 : index
    %c96 = arith.constant 96 : index
    %19 = vector.load %arg6[%c0_22, %c96] : memref<64x288xf32, #tpu.memory_space<vmem>>, vector<64x32xf32>
    tpu.vector_store %arg6[%c0_22, %c96], %18 {strides = array<i32>} : memref<64x288xf32, #tpu.memory_space<vmem>>, vector<64x32xf32>,
    %c0_23 = arith.constant 0 : index
    %c1_24 = arith.constant 1 : index
    %c1_25 = arith.constant 1 : index
    %c0_26 = arith.constant 0 : index
    %20 = vector.load %arg1[%c0_23, %c1_24, %c1_25, %c0_26] : memref<1x10x10x32xf32, #tpu.memory_space<vmem>>, vector<1x8x8x32xf32>
    %21 = vector.shape_cast %20 : vector<1x8x8x32xf32> to vector<8x8x32xf32>
    %22 = vector.shape_cast %21 : vector<8x8x32xf32> to vector<64x32xf32>
    %c0_27 = arith.constant 0 : index
    %c128 = arith.constant 128 : index
    %23 = vector.load %arg6[%c0_27, %c128] : memref<64x288xf32, #tpu.memory_space<vmem>>, vector<64x32xf32>
    tpu.vector_store %arg6[%c0_27, %c128], %22 {strides = array<i32>} : memref<64x288xf32, #tpu.memory_space<vmem>>, vector<64x32xf32>,
    %c0_28 = arith.constant 0 : index
    %c1_29 = arith.constant 1 : index
    %c2_30 = arith.constant 2 : index
    %c0_31 = arith.constant 0 : index
    %24 = vector.load %arg1[%c0_28, %c1_29, %c2_30, %c0_31] : memref<1x10x10x32xf32, #tpu.memory_space<vmem>>, vector<1x8x8x32xf32>
    %25 = vector.shape_cast %24 : vector<1x8x8x32xf32> to vector<8x8x32xf32>
    %26 = vector.shape_cast %25 : vector<8x8x32xf32> to vector<64x32xf32>
    %c0_32 = arith.constant 0 : index
    %c160 = arith.constant 160 : index
    %27 = vector.load %arg6[%c0_32, %c160] : memref<64x288xf32, #tpu.memory_space<vmem>>, vector<64x32xf32>
    tpu.vector_store %arg6[%c0_32, %c160], %26 {strides = array<i32>} : memref<64x288xf32, #tpu.memory_space<vmem>>, vector<64x32xf32>,
    %c0_33 = arith.constant 0 : index
    %c2_34 = arith.constant 2 : index
    %c0_35 = arith.constant 0 : index
    %c0_36 = arith.constant 0 : index
    %28 = vector.load %arg1[%c0_33, %c2_34, %c0_35, %c0_36] : memref<1x10x10x32xf32, #tpu.memory_space<vmem>>, vector<1x8x8x32xf32>
    %29 = vector.shape_cast %28 : vector<1x8x8x32xf32> to vector<8x8x32xf32>
    %30 = vector.shape_cast %29 : vector<8x8x32xf32> to vector<64x32xf32>
    %c0_37 = arith.constant 0 : index
    %c192 = arith.constant 192 : index
    %31 = vector.load %arg6[%c0_37, %c192] : memref<64x288xf32, #tpu.memory_space<vmem>>, vector<64x32xf32>
    tpu.vector_store %arg6[%c0_37, %c192], %30 {strides = array<i32>} : memref<64x288xf32, #tpu.memory_space<vmem>>, vector<64x32xf32>,
    %c0_38 = arith.constant 0 : index
    %c2_39 = arith.constant 2 : index
    %c1_40 = arith.constant 1 : index
    %c0_41 = arith.constant 0 : index
    %32 = vector.load %arg1[%c0_38, %c2_39, %c1_40, %c0_41] : memref<1x10x10x32xf32, #tpu.memory_space<vmem>>, vector<1x8x8x32xf32>
    %33 = vector.shape_cast %32 : vector<1x8x8x32xf32> to vector<8x8x32xf32>
    %34 = vector.shape_cast %33 : vector<8x8x32xf32> to vector<64x32xf32>
    %c0_42 = arith.constant 0 : index
    %c224 = arith.constant 224 : index
    %35 = vector.load %arg6[%c0_42, %c224] : memref<64x288xf32, #tpu.memory_space<vmem>>, vector<64x32xf32>
    tpu.vector_store %arg6[%c0_42, %c224], %34 {strides = array<i32>} : memref<64x288xf32, #tpu.memory_space<vmem>>, vector<64x32xf32>,
    %c0_43 = arith.constant 0 : index
    %c2_44 = arith.constant 2 : index
    %c2_45 = arith.constant 2 : index
    %c0_46 = arith.constant 0 : index
    %36 = vector.load %arg1[%c0_43, %c2_44, %c2_45, %c0_46] : memref<1x10x10x32xf32, #tpu.memory_space<vmem>>, vector<1x8x8x32xf32>
    %37 = vector.shape_cast %36 : vector<1x8x8x32xf32> to vector<8x8x32xf32>
    %38 = vector.shape_cast %37 : vector<8x8x32xf32> to vector<64x32xf32>
    %c0_47 = arith.constant 0 : index
    %c256 = arith.constant 256 : index
    %39 = vector.load %arg6[%c0_47, %c256] : memref<64x288xf32, #tpu.memory_space<vmem>>, vector<64x32xf32>
    tpu.vector_store %arg6[%c0_47, %c256], %38 {strides = array<i32>} : memref<64x288xf32, #tpu.memory_space<vmem>>, vector<64x32xf32>,
    %c0_48 = arith.constant 0 : index
    %c0_49 = arith.constant 0 : index
    %40 = vector.load %arg6[%c0_48, %c0_49] : memref<64x288xf32, #tpu.memory_space<vmem>>, vector<64x288xf32>
    %41 = arith.truncf %40 : vector<64x288xf32> to vector<64x288xbf16>
    %cst_50 = arith.constant dense<0.000000e+00> : vector<64x32xf32>
    %42 = tpu.matmul %41, %0, %cst_50 {dimension_numbers = #tpu.dot_dimension_numbers<[1], [0], [0], [1], [0, 0, 1, 1], [], []>} : vector<64x288xbf16>, vector<288x32xbf16>, vector<64x32xf32> -> vector<64x32xf32>
    %43 = vector.broadcast %1 : vector<1x32xf32> to vector<64x32xf32>
    %44 = arith.addf %42, %43 : vector<64x32xf32>
    %cst_51 = arith.constant dense<0.000000e+00> : vector<32xf32>
    %45 = vector.multi_reduction <add>, %44, %cst_51 [0] : vector<64x32xf32> to vector<32xf32>
    %46 = vector.shape_cast %45 : vector<32xf32> to vector<1x32xf32>
    %47 = arith.addf %2, %46 : vector<1x32xf32>
    %48 = arith.mulf %44, %44 : vector<64x32xf32>
    %cst_52 = arith.constant dense<0.000000e+00> : vector<32xf32>
    %49 = vector.multi_reduction <add>, %48, %cst_52 [0] : vector<64x32xf32> to vector<32xf32>
    %50 = vector.shape_cast %49 : vector<32xf32> to vector<1x32xf32>
    %51 = arith.addf %3, %50 : vector<1x32xf32>
    %52 = vector.shape_cast %44 : vector<64x32xf32> to vector<8x8x32xf32>
    %c0_53 = arith.constant 0 : index
    %c0_54 = arith.constant 0 : index
    %c0_55 = arith.constant 0 : index
    %c0_56 = arith.constant 0 : index
    %53 = vector.load %arg4[%c0_53, %c0_54, %c0_55, %c0_56] : memref<1x8x8x32xf32, #tpu.memory_space<vmem>>, vector<1x8x8x32xf32>
    %54 = vector.shape_cast %53 : vector<1x8x8x32xf32> to vector<8x8x32xf32>
    %55 = vector.shape_cast %52 : vector<8x8x32xf32> to vector<1x8x8x32xf32>
    tpu.vector_store %arg4[%c0_53, %c0_54, %c0_55, %c0_56], %55 {strides = array<i32>} : memref<1x8x8x32xf32, #tpu.memory_space<vmem>>, vector<1x8x8x32xf32>,
    %c0_57 = arith.constant 0 : index
    %c0_58 = arith.constant 0 : index
    %c0_59 = arith.constant 0 : index
    %56 = vector.load %arg5[%c0_57, %c0_58, %c0_59] : memref<1x2x32xf32, #tpu.memory_space<vmem>>, vector<1x1x32xf32>
    %57 = vector.shape_cast %56 : vector<1x1x32xf32> to vector<1x32xf32>
    %58 = vector.shape_cast %47 : vector<1x32xf32> to vector<1x1x32xf32>
    tpu.vector_store %arg5[%c0_57, %c0_58, %c0_59], %58 {strides = array<i32>} : memref<1x2x32xf32, #tpu.memory_space<vmem>>, vector<1x1x32xf32>,
    %c0_60 = arith.constant 0 : index
    %c1_61 = arith.constant 1 : index
    %c0_62 = arith.constant 0 : index
    %59 = vector.load %arg5[%c0_60, %c1_61, %c0_62] : memref<1x2x32xf32, #tpu.memory_space<vmem>>, vector<1x1x32xf32>
    %60 = vector.shape_cast %59 : vector<1x1x32xf32> to vector<1x32xf32>
    %61 = vector.shape_cast %51 : vector<1x32xf32> to vector<1x1x32xf32>
    tpu.vector_store %arg5[%c0_60, %c1_61, %c0_62], %61 {strides = array<i32>} : memref<1x2x32xf32, #tpu.memory_space<vmem>>, vector<1x1x32xf32>,
    return
  }
  func.func @transform_0(%arg0: i32) -> (i32, i32, i32, i32) {
    %c0_i32 = arith.constant 0 : i32
    %c0_i32_0 = arith.constant 0 : i32
    %c0_i32_1 = arith.constant 0 : i32
    %c0_i32_2 = arith.constant 0 : i32
    return %arg0, %c0_i32, %c0_i32_0, %c0_i32_1 : i32, i32, i32, i32
  }
  func.func @transform_1(%arg0: i32) -> (i32, i32) {
    %c0_i32 = arith.constant 0 : i32
    %c0_i32_0 = arith.constant 0 : i32
    %c0_i32_1 = arith.constant 0 : i32
    return %c0_i32, %c0_i32_0 : i32, i32
  }
  func.func @transform_2(%arg0: i32) -> (i32, i32) {
    %c0_i32 = arith.constant 0 : i32
    %c0_i32_0 = arith.constant 0 : i32
    %c0_i32_1 = arith.constant 0 : i32
    return %c0_i32, %c0_i32_0 : i32, i32
  }
  func.func @transform_3(%arg0: i32) -> (i32, i32, i32, i32) {
    %c0_i32 = arith.constant 0 : i32
    %c0_i32_0 = arith.constant 0 : i32
    %c0_i32_1 = arith.constant 0 : i32
    %c0_i32_2 = arith.constant 0 : i32
    return %arg0, %c0_i32, %c0_i32_0, %c0_i32_1 : i32, i32, i32, i32
  }
  func.func @transform_4(%arg0: i32) -> (i32, i32, i32) {
    %c0_i32 = arith.constant 0 : i32
    %c0_i32_0 = arith.constant 0 : i32
    %c0_i32_1 = arith.constant 0 : i32
    return %arg0, %c0_i32, %c0_i32_0 : i32, i32, i32
  }
}

module attributes {stable_mosaic.version = 11 : i64} {
  func.func @kernel(%arg0: i32, %arg1: i32, %arg2: memref<1x8x8x32xf32, #tpu.memory_space<vmem>>, %arg3: memref<2x2x32xf32, #tpu.memory_space<vmem>>, %arg4: memref<1x32xf32, #tpu.memory_space<vmem>>, %arg5: memref<1x32xf32, #tpu.memory_space<vmem>>, %arg6: memref<1x8x8x32xf32, #tpu.memory_space<vmem>>, %arg7: memref<1x8x8x32xf32, #tpu.memory_space<vmem>>, %arg8: memref<1x8x8x32xf32, #tpu.memory_space<vmem>>) attributes {dimension_semantics = [#tpu.dimension_semantics<parallel>, #tpu.dimension_semantics<parallel>], iteration_bounds = array<i64: 2, 1>, scalar_prefetch = 0 : i64, scratch_operands = 0 : i64, tpu.core_type = #tpu.core_type<tc>, window_params = [{transform_indices = @transform_0, window_bounds = array<i64: 1, 8, 8, 32>}, {pipeline_mode = #tpu.pipeline_mode<synchronous>, transform_indices = @transform_1, window_bounds = array<i64: 2, 2, 32>}, {pipeline_mode = #tpu.pipeline_mode<synchronous>, transform_indices = @transform_2, window_bounds = array<i64: 1, 32>}, {pipeline_mode = #tpu.pipeline_mode<synchronous>, transform_indices = @transform_3, window_bounds = array<i64: 1, 32>}, {transform_indices = @transform_4, window_bounds = array<i64: 1, 8, 8, 32>}, {transform_indices = @transform_5, window_bounds = array<i64: 1, 8, 8, 32>}, {transform_indices = @transform_6, window_bounds = array<i64: 1, 8, 8, 32>}]} {
    %c0 = arith.constant 0 : index
    %c0_0 = arith.constant 0 : index
    %c0_1 = arith.constant 0 : index
    %0 = vector.load %arg3[%c0, %c0_0, %c0_1] : memref<2x2x32xf32, #tpu.memory_space<vmem>>, vector<2x2x32xf32>
    %cst = arith.constant dense<0.000000e+00> : vector<2x32xf32>
    %1 = vector.multi_reduction <add>, %0, %cst [0] : vector<2x2x32xf32> to vector<2x32xf32>
    %2 = vector.extract_strided_slice %1 {offsets = [0, 0], sizes = [1, 32], strides = [1, 1]} : vector<2x32xf32> to vector<1x32xf32>
    %cst_2 = arith.constant 7.812500e-03 : f32
    %3 = vector.broadcast %cst_2 : f32 to vector<1x32xf32>
    %4 = arith.mulf %2, %3 : vector<1x32xf32>
    %5 = vector.extract_strided_slice %1 {offsets = [1, 0], sizes = [1, 32], strides = [1, 1]} : vector<2x32xf32> to vector<1x32xf32>
    %cst_3 = arith.constant 7.812500e-03 : f32
    %6 = vector.broadcast %cst_3 : f32 to vector<1x32xf32>
    %7 = arith.mulf %5, %6 : vector<1x32xf32>
    %8 = arith.mulf %4, %4 : vector<1x32xf32>
    %9 = arith.subf %7, %8 : vector<1x32xf32>
    %c0_4 = arith.constant 0 : index
    %c0_5 = arith.constant 0 : index
    %10 = vector.load %arg4[%c0_4, %c0_5] : memref<1x32xf32, #tpu.memory_space<vmem>>, vector<1x32xf32>
    %cst_6 = arith.constant 9.99999974E-6 : f32
    %11 = vector.broadcast %cst_6 : f32 to vector<1x32xf32>
    %12 = arith.addf %9, %11 : vector<1x32xf32>
    %13 = math.rsqrt %12 : vector<1x32xf32>
    %14 = arith.mulf %10, %13 : vector<1x32xf32>
    %c0_7 = arith.constant 0 : index
    %c0_8 = arith.constant 0 : index
    %15 = vector.load %arg5[%c0_7, %c0_8] : memref<1x32xf32, #tpu.memory_space<vmem>>, vector<1x32xf32>
    %16 = arith.mulf %4, %14 : vector<1x32xf32>
    %17 = arith.subf %15, %16 : vector<1x32xf32>
    %c0_9 = arith.constant 0 : index
    %c0_10 = arith.constant 0 : index
    %c0_11 = arith.constant 0 : index
    %c0_12 = arith.constant 0 : index
    %18 = vector.load %arg2[%c0_9, %c0_10, %c0_11, %c0_12] : memref<1x8x8x32xf32, #tpu.memory_space<vmem>>, vector<1x8x8x32xf32>
    %19 = vector.shape_cast %18 : vector<1x8x8x32xf32> to vector<8x8x32xf32>
    %20 = vector.shape_cast %14 : vector<1x32xf32> to vector<1x1x32xf32>
    %21 = vector.broadcast %20 : vector<1x1x32xf32> to vector<8x8x32xf32>
    %22 = arith.mulf %19, %21 : vector<8x8x32xf32>
    %23 = vector.shape_cast %17 : vector<1x32xf32> to vector<1x1x32xf32>
    %24 = vector.broadcast %23 : vector<1x1x32xf32> to vector<8x8x32xf32>
    %25 = arith.addf %22, %24 : vector<8x8x32xf32>
    %c0_13 = arith.constant 0 : index
    %c0_14 = arith.constant 0 : index
    %c0_15 = arith.constant 0 : index
    %c0_16 = arith.constant 0 : index
    %26 = vector.load %arg6[%c0_13, %c0_14, %c0_15, %c0_16] : memref<1x8x8x32xf32, #tpu.memory_space<vmem>>, vector<1x8x8x32xf32>
    %27 = vector.shape_cast %26 : vector<1x8x8x32xf32> to vector<8x8x32xf32>
    %28 = arith.addf %25, %27 : vector<8x8x32xf32>
    %c0_17 = arith.constant 0 : index
    %c0_18 = arith.constant 0 : index
    %c0_19 = arith.constant 0 : index
    %c0_20 = arith.constant 0 : index
    %29 = vector.load %arg7[%c0_17, %c0_18, %c0_19, %c0_20] : memref<1x8x8x32xf32, #tpu.memory_space<vmem>>, vector<1x8x8x32xf32>
    %30 = vector.shape_cast %29 : vector<1x8x8x32xf32> to vector<8x8x32xf32>
    %31 = arith.addf %28, %30 : vector<8x8x32xf32>
    %c0_21 = arith.constant 0 : index
    %c0_22 = arith.constant 0 : index
    %c0_23 = arith.constant 0 : index
    %c0_24 = arith.constant 0 : index
    %32 = vector.load %arg8[%c0_21, %c0_22, %c0_23, %c0_24] : memref<1x8x8x32xf32, #tpu.memory_space<vmem>>, vector<1x8x8x32xf32>
    %33 = vector.shape_cast %32 : vector<1x8x8x32xf32> to vector<8x8x32xf32>
    %34 = vector.shape_cast %31 : vector<8x8x32xf32> to vector<1x8x8x32xf32>
    tpu.vector_store %arg8[%c0_21, %c0_22, %c0_23, %c0_24], %34 {strides = array<i32>} : memref<1x8x8x32xf32, #tpu.memory_space<vmem>>, vector<1x8x8x32xf32>,
    return
  }
  func.func @transform_0(%arg0: i32, %arg1: i32) -> (i32, i32, i32, i32) {
    %c0_i32 = arith.constant 0 : i32
    %c0_i32_0 = arith.constant 0 : i32
    %c0_i32_1 = arith.constant 0 : i32
    return %arg0, %arg1, %c0_i32, %c0_i32_0 : i32, i32, i32, i32
  }
  func.func @transform_1(%arg0: i32, %arg1: i32) -> (i32, i32, i32) {
    %c0_i32 = arith.constant 0 : i32
    %c0_i32_0 = arith.constant 0 : i32
    %c0_i32_1 = arith.constant 0 : i32
    %c0_i32_2 = arith.constant 0 : i32
    return %c0_i32, %c0_i32_0, %c0_i32_1 : i32, i32, i32
  }
  func.func @transform_2(%arg0: i32, %arg1: i32) -> (i32, i32) {
    %c0_i32 = arith.constant 0 : i32
    %c0_i32_0 = arith.constant 0 : i32
    %c0_i32_1 = arith.constant 0 : i32
    return %c0_i32, %c0_i32_0 : i32, i32
  }
  func.func @transform_3(%arg0: i32, %arg1: i32) -> (i32, i32) {
    %c0_i32 = arith.constant 0 : i32
    %c0_i32_0 = arith.constant 0 : i32
    %c0_i32_1 = arith.constant 0 : i32
    return %c0_i32, %c0_i32_0 : i32, i32
  }
  func.func @transform_4(%arg0: i32, %arg1: i32) -> (i32, i32, i32, i32) {
    %c0_i32 = arith.constant 0 : i32
    %c0_i32_0 = arith.constant 0 : i32
    %c0_i32_1 = arith.constant 0 : i32
    return %arg0, %arg1, %c0_i32, %c0_i32_0 : i32, i32, i32, i32
  }
  func.func @transform_5(%arg0: i32, %arg1: i32) -> (i32, i32, i32, i32) {
    %c0_i32 = arith.constant 0 : i32
    %c0_i32_0 = arith.constant 0 : i32
    %c0_i32_1 = arith.constant 0 : i32
    return %arg0, %arg1, %c0_i32, %c0_i32_0 : i32, i32, i32, i32
  }
  func.func @transform_6(%arg0: i32, %arg1: i32) -> (i32, i32, i32, i32) {
    %c0_i32 = arith.constant 0 : i32
    %c0_i32_0 = arith.constant 0 : i32
    %c0_i32_1 = arith.constant 0 : i32
    return %arg0, %arg1, %c0_i32, %c0_i32_0 : i32, i32, i32, i32
  }
}

module attributes {stable_mosaic.version = 11 : i64} {
  func.func @kernel(%arg0: i32, %arg1: memref<1x10x10x32xf32, #tpu.memory_space<vmem>>, %arg2: memref<288x16xbf16, #tpu.memory_space<vmem>>, %arg3: memref<1x16xf32, #tpu.memory_space<vmem>>, %arg4: memref<1x8x8x16xf32, #tpu.memory_space<vmem>>, %arg5: memref<1x2x16xf32, #tpu.memory_space<vmem>>, %arg6: memref<64x288xf32, #tpu.memory_space<vmem>>) attributes {dimension_semantics = [#tpu.dimension_semantics<parallel>], iteration_bounds = array<i64: 2>, scalar_prefetch = 0 : i64, scratch_operands = 1 : i64, tpu.core_type = #tpu.core_type<tc>, window_params = [{transform_indices = @transform_0, window_bounds = array<i64: 1, 10, 10, 32>}, {pipeline_mode = #tpu.pipeline_mode<synchronous>, transform_indices = @transform_1, window_bounds = array<i64: 288, 16>}, {pipeline_mode = #tpu.pipeline_mode<synchronous>, transform_indices = @transform_2, window_bounds = array<i64: 1, 16>}, {transform_indices = @transform_3, window_bounds = array<i64: 1, 8, 8, 16>}, {transform_indices = @transform_4, window_bounds = array<i64: 1, 2, 16>}]} {
    %c0 = arith.constant 0 : index
    %c0_0 = arith.constant 0 : index
    %0 = vector.load %arg2[%c0, %c0_0] : memref<288x16xbf16, #tpu.memory_space<vmem>>, vector<288x16xbf16>
    %c0_1 = arith.constant 0 : index
    %c0_2 = arith.constant 0 : index
    %1 = vector.load %arg3[%c0_1, %c0_2] : memref<1x16xf32, #tpu.memory_space<vmem>>, vector<1x16xf32>
    %cst = arith.constant 0.000000e+00 : f32
    %2 = vector.broadcast %cst : f32 to vector<1x16xf32>
    %cst_3 = arith.constant 0.000000e+00 : f32
    %3 = vector.broadcast %cst_3 : f32 to vector<1x16xf32>
    %c0_4 = arith.constant 0 : index
    %c0_5 = arith.constant 0 : index
    %c0_6 = arith.constant 0 : index
    %c0_7 = arith.constant 0 : index
    %4 = vector.load %arg1[%c0_4, %c0_5, %c0_6, %c0_7] : memref<1x10x10x32xf32, #tpu.memory_space<vmem>>, vector<1x8x8x32xf32>
    %5 = vector.shape_cast %4 : vector<1x8x8x32xf32> to vector<8x8x32xf32>
    %6 = vector.shape_cast %5 : vector<8x8x32xf32> to vector<64x32xf32>
    %c0_8 = arith.constant 0 : index
    %c0_9 = arith.constant 0 : index
    %7 = vector.load %arg6[%c0_8, %c0_9] : memref<64x288xf32, #tpu.memory_space<vmem>>, vector<64x32xf32>
    tpu.vector_store %arg6[%c0_8, %c0_9], %6 {strides = array<i32>} : memref<64x288xf32, #tpu.memory_space<vmem>>, vector<64x32xf32>,
    %c0_10 = arith.constant 0 : index
    %c0_11 = arith.constant 0 : index
    %c1 = arith.constant 1 : index
    %c0_12 = arith.constant 0 : index
    %8 = vector.load %arg1[%c0_10, %c0_11, %c1, %c0_12] : memref<1x10x10x32xf32, #tpu.memory_space<vmem>>, vector<1x8x8x32xf32>
    %9 = vector.shape_cast %8 : vector<1x8x8x32xf32> to vector<8x8x32xf32>
    %10 = vector.shape_cast %9 : vector<8x8x32xf32> to vector<64x32xf32>
    %c0_13 = arith.constant 0 : index
    %c32 = arith.constant 32 : index
    %11 = vector.load %arg6[%c0_13, %c32] : memref<64x288xf32, #tpu.memory_space<vmem>>, vector<64x32xf32>
    tpu.vector_store %arg6[%c0_13, %c32], %10 {strides = array<i32>} : memref<64x288xf32, #tpu.memory_space<vmem>>, vector<64x32xf32>,
    %c0_14 = arith.constant 0 : index
    %c0_15 = arith.constant 0 : index
    %c2 = arith.constant 2 : index
    %c0_16 = arith.constant 0 : index
    %12 = vector.load %arg1[%c0_14, %c0_15, %c2, %c0_16] : memref<1x10x10x32xf32, #tpu.memory_space<vmem>>, vector<1x8x8x32xf32>
    %13 = vector.shape_cast %12 : vector<1x8x8x32xf32> to vector<8x8x32xf32>
    %14 = vector.shape_cast %13 : vector<8x8x32xf32> to vector<64x32xf32>
    %c0_17 = arith.constant 0 : index
    %c64 = arith.constant 64 : index
    %15 = vector.load %arg6[%c0_17, %c64] : memref<64x288xf32, #tpu.memory_space<vmem>>, vector<64x32xf32>
    tpu.vector_store %arg6[%c0_17, %c64], %14 {strides = array<i32>} : memref<64x288xf32, #tpu.memory_space<vmem>>, vector<64x32xf32>,
    %c0_18 = arith.constant 0 : index
    %c1_19 = arith.constant 1 : index
    %c0_20 = arith.constant 0 : index
    %c0_21 = arith.constant 0 : index
    %16 = vector.load %arg1[%c0_18, %c1_19, %c0_20, %c0_21] : memref<1x10x10x32xf32, #tpu.memory_space<vmem>>, vector<1x8x8x32xf32>
    %17 = vector.shape_cast %16 : vector<1x8x8x32xf32> to vector<8x8x32xf32>
    %18 = vector.shape_cast %17 : vector<8x8x32xf32> to vector<64x32xf32>
    %c0_22 = arith.constant 0 : index
    %c96 = arith.constant 96 : index
    %19 = vector.load %arg6[%c0_22, %c96] : memref<64x288xf32, #tpu.memory_space<vmem>>, vector<64x32xf32>
    tpu.vector_store %arg6[%c0_22, %c96], %18 {strides = array<i32>} : memref<64x288xf32, #tpu.memory_space<vmem>>, vector<64x32xf32>,
    %c0_23 = arith.constant 0 : index
    %c1_24 = arith.constant 1 : index
    %c1_25 = arith.constant 1 : index
    %c0_26 = arith.constant 0 : index
    %20 = vector.load %arg1[%c0_23, %c1_24, %c1_25, %c0_26] : memref<1x10x10x32xf32, #tpu.memory_space<vmem>>, vector<1x8x8x32xf32>
    %21 = vector.shape_cast %20 : vector<1x8x8x32xf32> to vector<8x8x32xf32>
    %22 = vector.shape_cast %21 : vector<8x8x32xf32> to vector<64x32xf32>
    %c0_27 = arith.constant 0 : index
    %c128 = arith.constant 128 : index
    %23 = vector.load %arg6[%c0_27, %c128] : memref<64x288xf32, #tpu.memory_space<vmem>>, vector<64x32xf32>
    tpu.vector_store %arg6[%c0_27, %c128], %22 {strides = array<i32>} : memref<64x288xf32, #tpu.memory_space<vmem>>, vector<64x32xf32>,
    %c0_28 = arith.constant 0 : index
    %c1_29 = arith.constant 1 : index
    %c2_30 = arith.constant 2 : index
    %c0_31 = arith.constant 0 : index
    %24 = vector.load %arg1[%c0_28, %c1_29, %c2_30, %c0_31] : memref<1x10x10x32xf32, #tpu.memory_space<vmem>>, vector<1x8x8x32xf32>
    %25 = vector.shape_cast %24 : vector<1x8x8x32xf32> to vector<8x8x32xf32>
    %26 = vector.shape_cast %25 : vector<8x8x32xf32> to vector<64x32xf32>
    %c0_32 = arith.constant 0 : index
    %c160 = arith.constant 160 : index
    %27 = vector.load %arg6[%c0_32, %c160] : memref<64x288xf32, #tpu.memory_space<vmem>>, vector<64x32xf32>
    tpu.vector_store %arg6[%c0_32, %c160], %26 {strides = array<i32>} : memref<64x288xf32, #tpu.memory_space<vmem>>, vector<64x32xf32>,
    %c0_33 = arith.constant 0 : index
    %c2_34 = arith.constant 2 : index
    %c0_35 = arith.constant 0 : index
    %c0_36 = arith.constant 0 : index
    %28 = vector.load %arg1[%c0_33, %c2_34, %c0_35, %c0_36] : memref<1x10x10x32xf32, #tpu.memory_space<vmem>>, vector<1x8x8x32xf32>
    %29 = vector.shape_cast %28 : vector<1x8x8x32xf32> to vector<8x8x32xf32>
    %30 = vector.shape_cast %29 : vector<8x8x32xf32> to vector<64x32xf32>
    %c0_37 = arith.constant 0 : index
    %c192 = arith.constant 192 : index
    %31 = vector.load %arg6[%c0_37, %c192] : memref<64x288xf32, #tpu.memory_space<vmem>>, vector<64x32xf32>
    tpu.vector_store %arg6[%c0_37, %c192], %30 {strides = array<i32>} : memref<64x288xf32, #tpu.memory_space<vmem>>, vector<64x32xf32>,
    %c0_38 = arith.constant 0 : index
    %c2_39 = arith.constant 2 : index
    %c1_40 = arith.constant 1 : index
    %c0_41 = arith.constant 0 : index
    %32 = vector.load %arg1[%c0_38, %c2_39, %c1_40, %c0_41] : memref<1x10x10x32xf32, #tpu.memory_space<vmem>>, vector<1x8x8x32xf32>
    %33 = vector.shape_cast %32 : vector<1x8x8x32xf32> to vector<8x8x32xf32>
    %34 = vector.shape_cast %33 : vector<8x8x32xf32> to vector<64x32xf32>
    %c0_42 = arith.constant 0 : index
    %c224 = arith.constant 224 : index
    %35 = vector.load %arg6[%c0_42, %c224] : memref<64x288xf32, #tpu.memory_space<vmem>>, vector<64x32xf32>
    tpu.vector_store %arg6[%c0_42, %c224], %34 {strides = array<i32>} : memref<64x288xf32, #tpu.memory_space<vmem>>, vector<64x32xf32>,
    %c0_43 = arith.constant 0 : index
    %c2_44 = arith.constant 2 : index
    %c2_45 = arith.constant 2 : index
    %c0_46 = arith.constant 0 : index
    %36 = vector.load %arg1[%c0_43, %c2_44, %c2_45, %c0_46] : memref<1x10x10x32xf32, #tpu.memory_space<vmem>>, vector<1x8x8x32xf32>
    %37 = vector.shape_cast %36 : vector<1x8x8x32xf32> to vector<8x8x32xf32>
    %38 = vector.shape_cast %37 : vector<8x8x32xf32> to vector<64x32xf32>
    %c0_47 = arith.constant 0 : index
    %c256 = arith.constant 256 : index
    %39 = vector.load %arg6[%c0_47, %c256] : memref<64x288xf32, #tpu.memory_space<vmem>>, vector<64x32xf32>
    tpu.vector_store %arg6[%c0_47, %c256], %38 {strides = array<i32>} : memref<64x288xf32, #tpu.memory_space<vmem>>, vector<64x32xf32>,
    %c0_48 = arith.constant 0 : index
    %c0_49 = arith.constant 0 : index
    %40 = vector.load %arg6[%c0_48, %c0_49] : memref<64x288xf32, #tpu.memory_space<vmem>>, vector<64x288xf32>
    %41 = arith.truncf %40 : vector<64x288xf32> to vector<64x288xbf16>
    %cst_50 = arith.constant dense<0.000000e+00> : vector<64x16xf32>
    %42 = tpu.matmul %41, %0, %cst_50 {dimension_numbers = #tpu.dot_dimension_numbers<[1], [0], [0], [1], [0, 0, 1, 1], [], []>} : vector<64x288xbf16>, vector<288x16xbf16>, vector<64x16xf32> -> vector<64x16xf32>
    %43 = vector.broadcast %1 : vector<1x16xf32> to vector<64x16xf32>
    %44 = arith.addf %42, %43 : vector<64x16xf32>
    %cst_51 = arith.constant dense<0.000000e+00> : vector<16xf32>
    %45 = vector.multi_reduction <add>, %44, %cst_51 [0] : vector<64x16xf32> to vector<16xf32>
    %46 = vector.shape_cast %45 : vector<16xf32> to vector<1x16xf32>
    %47 = arith.addf %2, %46 : vector<1x16xf32>
    %48 = arith.mulf %44, %44 : vector<64x16xf32>
    %cst_52 = arith.constant dense<0.000000e+00> : vector<16xf32>
    %49 = vector.multi_reduction <add>, %48, %cst_52 [0] : vector<64x16xf32> to vector<16xf32>
    %50 = vector.shape_cast %49 : vector<16xf32> to vector<1x16xf32>
    %51 = arith.addf %3, %50 : vector<1x16xf32>
    %52 = vector.shape_cast %44 : vector<64x16xf32> to vector<8x8x16xf32>
    %c0_53 = arith.constant 0 : index
    %c0_54 = arith.constant 0 : index
    %c0_55 = arith.constant 0 : index
    %c0_56 = arith.constant 0 : index
    %53 = vector.load %arg4[%c0_53, %c0_54, %c0_55, %c0_56] : memref<1x8x8x16xf32, #tpu.memory_space<vmem>>, vector<1x8x8x16xf32>
    %54 = vector.shape_cast %53 : vector<1x8x8x16xf32> to vector<8x8x16xf32>
    %55 = vector.shape_cast %52 : vector<8x8x16xf32> to vector<1x8x8x16xf32>
    tpu.vector_store %arg4[%c0_53, %c0_54, %c0_55, %c0_56], %55 {strides = array<i32>} : memref<1x8x8x16xf32, #tpu.memory_space<vmem>>, vector<1x8x8x16xf32>,
    %c0_57 = arith.constant 0 : index
    %c0_58 = arith.constant 0 : index
    %c0_59 = arith.constant 0 : index
    %56 = vector.load %arg5[%c0_57, %c0_58, %c0_59] : memref<1x2x16xf32, #tpu.memory_space<vmem>>, vector<1x1x16xf32>
    %57 = vector.shape_cast %56 : vector<1x1x16xf32> to vector<1x16xf32>
    %58 = vector.shape_cast %47 : vector<1x16xf32> to vector<1x1x16xf32>
    tpu.vector_store %arg5[%c0_57, %c0_58, %c0_59], %58 {strides = array<i32>} : memref<1x2x16xf32, #tpu.memory_space<vmem>>, vector<1x1x16xf32>,
    %c0_60 = arith.constant 0 : index
    %c1_61 = arith.constant 1 : index
    %c0_62 = arith.constant 0 : index
    %59 = vector.load %arg5[%c0_60, %c1_61, %c0_62] : memref<1x2x16xf32, #tpu.memory_space<vmem>>, vector<1x1x16xf32>
    %60 = vector.shape_cast %59 : vector<1x1x16xf32> to vector<1x16xf32>
    %61 = vector.shape_cast %51 : vector<1x16xf32> to vector<1x1x16xf32>
    tpu.vector_store %arg5[%c0_60, %c1_61, %c0_62], %61 {strides = array<i32>} : memref<1x2x16xf32, #tpu.memory_space<vmem>>, vector<1x1x16xf32>,
    return
  }
  func.func @transform_0(%arg0: i32) -> (i32, i32, i32, i32) {
    %c0_i32 = arith.constant 0 : i32
    %c0_i32_0 = arith.constant 0 : i32
    %c0_i32_1 = arith.constant 0 : i32
    %c0_i32_2 = arith.constant 0 : i32
    return %arg0, %c0_i32, %c0_i32_0, %c0_i32_1 : i32, i32, i32, i32
  }
  func.func @transform_1(%arg0: i32) -> (i32, i32) {
    %c0_i32 = arith.constant 0 : i32
    %c0_i32_0 = arith.constant 0 : i32
    %c0_i32_1 = arith.constant 0 : i32
    return %c0_i32, %c0_i32_0 : i32, i32
  }
  func.func @transform_2(%arg0: i32) -> (i32, i32) {
    %c0_i32 = arith.constant 0 : i32
    %c0_i32_0 = arith.constant 0 : i32
    %c0_i32_1 = arith.constant 0 : i32
    return %c0_i32, %c0_i32_0 : i32, i32
  }
  func.func @transform_3(%arg0: i32) -> (i32, i32, i32, i32) {
    %c0_i32 = arith.constant 0 : i32
    %c0_i32_0 = arith.constant 0 : i32
    %c0_i32_1 = arith.constant 0 : i32
    %c0_i32_2 = arith.constant 0 : i32
    return %arg0, %c0_i32, %c0_i32_0, %c0_i32_1 : i32, i32, i32, i32
  }
  func.func @transform_4(%arg0: i32) -> (i32, i32, i32) {
    %c0_i32 = arith.constant 0 : i32
    %c0_i32_0 = arith.constant 0 : i32
    %c0_i32_1 = arith.constant 0 : i32
    return %arg0, %c0_i32, %c0_i32_0 : i32, i32, i32
  }
}

module attributes {stable_mosaic.version = 11 : i64} {
  func.func @kernel(%arg0: i32, %arg1: i32, %arg2: memref<1x8x8x16xf32, #tpu.memory_space<vmem>>, %arg3: memref<2x2x16xf32, #tpu.memory_space<vmem>>, %arg4: memref<1x16xf32, #tpu.memory_space<vmem>>, %arg5: memref<1x16xf32, #tpu.memory_space<vmem>>, %arg6: memref<1x8x8x16xf32, #tpu.memory_space<vmem>>, %arg7: memref<1x8x8x16xf32, #tpu.memory_space<vmem>>) attributes {dimension_semantics = [#tpu.dimension_semantics<parallel>, #tpu.dimension_semantics<parallel>], iteration_bounds = array<i64: 2, 1>, scalar_prefetch = 0 : i64, scratch_operands = 0 : i64, tpu.core_type = #tpu.core_type<tc>, window_params = [{transform_indices = @transform_0, window_bounds = array<i64: 1, 8, 8, 16>}, {pipeline_mode = #tpu.pipeline_mode<synchronous>, transform_indices = @transform_1, window_bounds = array<i64: 2, 2, 16>}, {pipeline_mode = #tpu.pipeline_mode<synchronous>, transform_indices = @transform_2, window_bounds = array<i64: 1, 16>}, {pipeline_mode = #tpu.pipeline_mode<synchronous>, transform_indices = @transform_3, window_bounds = array<i64: 1, 16>}, {transform_indices = @transform_4, window_bounds = array<i64: 1, 8, 8, 16>}, {transform_indices = @transform_5, window_bounds = array<i64: 1, 8, 8, 16>}]} {
    %c0 = arith.constant 0 : index
    %c0_0 = arith.constant 0 : index
    %c0_1 = arith.constant 0 : index
    %0 = vector.load %arg3[%c0, %c0_0, %c0_1] : memref<2x2x16xf32, #tpu.memory_space<vmem>>, vector<2x2x16xf32>
    %cst = arith.constant dense<0.000000e+00> : vector<2x16xf32>
    %1 = vector.multi_reduction <add>, %0, %cst [0] : vector<2x2x16xf32> to vector<2x16xf32>
    %2 = vector.extract_strided_slice %1 {offsets = [0, 0], sizes = [1, 16], strides = [1, 1]} : vector<2x16xf32> to vector<1x16xf32>
    %cst_2 = arith.constant 7.812500e-03 : f32
    %3 = vector.broadcast %cst_2 : f32 to vector<1x16xf32>
    %4 = arith.mulf %2, %3 : vector<1x16xf32>
    %5 = vector.extract_strided_slice %1 {offsets = [1, 0], sizes = [1, 16], strides = [1, 1]} : vector<2x16xf32> to vector<1x16xf32>
    %cst_3 = arith.constant 7.812500e-03 : f32
    %6 = vector.broadcast %cst_3 : f32 to vector<1x16xf32>
    %7 = arith.mulf %5, %6 : vector<1x16xf32>
    %8 = arith.mulf %4, %4 : vector<1x16xf32>
    %9 = arith.subf %7, %8 : vector<1x16xf32>
    %c0_4 = arith.constant 0 : index
    %c0_5 = arith.constant 0 : index
    %10 = vector.load %arg4[%c0_4, %c0_5] : memref<1x16xf32, #tpu.memory_space<vmem>>, vector<1x16xf32>
    %cst_6 = arith.constant 9.99999974E-6 : f32
    %11 = vector.broadcast %cst_6 : f32 to vector<1x16xf32>
    %12 = arith.addf %9, %11 : vector<1x16xf32>
    %13 = math.rsqrt %12 : vector<1x16xf32>
    %14 = arith.mulf %10, %13 : vector<1x16xf32>
    %c0_7 = arith.constant 0 : index
    %c0_8 = arith.constant 0 : index
    %15 = vector.load %arg5[%c0_7, %c0_8] : memref<1x16xf32, #tpu.memory_space<vmem>>, vector<1x16xf32>
    %16 = arith.mulf %4, %14 : vector<1x16xf32>
    %17 = arith.subf %15, %16 : vector<1x16xf32>
    %c0_9 = arith.constant 0 : index
    %c0_10 = arith.constant 0 : index
    %c0_11 = arith.constant 0 : index
    %c0_12 = arith.constant 0 : index
    %18 = vector.load %arg2[%c0_9, %c0_10, %c0_11, %c0_12] : memref<1x8x8x16xf32, #tpu.memory_space<vmem>>, vector<1x8x8x16xf32>
    %19 = vector.shape_cast %18 : vector<1x8x8x16xf32> to vector<8x8x16xf32>
    %20 = vector.shape_cast %14 : vector<1x16xf32> to vector<1x1x16xf32>
    %21 = vector.broadcast %20 : vector<1x1x16xf32> to vector<8x8x16xf32>
    %22 = arith.mulf %19, %21 : vector<8x8x16xf32>
    %23 = vector.shape_cast %17 : vector<1x16xf32> to vector<1x1x16xf32>
    %24 = vector.broadcast %23 : vector<1x1x16xf32> to vector<8x8x16xf32>
    %25 = arith.addf %22, %24 : vector<8x8x16xf32>
    %cst_13 = arith.constant 0.000000e+00 : f32
    %26 = vector.broadcast %cst_13 : f32 to vector<8x8x16xf32>
    %27 = arith.maximumf %25, %26 : vector<8x8x16xf32>
    %c0_14 = arith.constant 0 : index
    %c0_15 = arith.constant 0 : index
    %c0_16 = arith.constant 0 : index
    %c0_17 = arith.constant 0 : index
    %28 = vector.load %arg6[%c0_14, %c0_15, %c0_16, %c0_17] : memref<1x8x8x16xf32, #tpu.memory_space<vmem>>, vector<1x8x8x16xf32>
    %29 = vector.shape_cast %28 : vector<1x8x8x16xf32> to vector<8x8x16xf32>
    %30 = arith.addf %27, %29 : vector<8x8x16xf32>
    %c0_18 = arith.constant 0 : index
    %c0_19 = arith.constant 0 : index
    %c0_20 = arith.constant 0 : index
    %c0_21 = arith.constant 0 : index
    %31 = vector.load %arg7[%c0_18, %c0_19, %c0_20, %c0_21] : memref<1x8x8x16xf32, #tpu.memory_space<vmem>>, vector<1x8x8x16xf32>
    %32 = vector.shape_cast %31 : vector<1x8x8x16xf32> to vector<8x8x16xf32>
    %33 = vector.shape_cast %30 : vector<8x8x16xf32> to vector<1x8x8x16xf32>
    tpu.vector_store %arg7[%c0_18, %c0_19, %c0_20, %c0_21], %33 {strides = array<i32>} : memref<1x8x8x16xf32, #tpu.memory_space<vmem>>, vector<1x8x8x16xf32>,
    return
  }
  func.func @transform_0(%arg0: i32, %arg1: i32) -> (i32, i32, i32, i32) {
    %c0_i32 = arith.constant 0 : i32
    %c0_i32_0 = arith.constant 0 : i32
    %c0_i32_1 = arith.constant 0 : i32
    return %arg0, %arg1, %c0_i32, %c0_i32_0 : i32, i32, i32, i32
  }
  func.func @transform_1(%arg0: i32, %arg1: i32) -> (i32, i32, i32) {
    %c0_i32 = arith.constant 0 : i32
    %c0_i32_0 = arith.constant 0 : i32
    %c0_i32_1 = arith.constant 0 : i32
    %c0_i32_2 = arith.constant 0 : i32
    return %c0_i32, %c0_i32_0, %c0_i32_1 : i32, i32, i32
  }
  func.func @transform_2(%arg0: i32, %arg1: i32) -> (i32, i32) {
    %c0_i32 = arith.constant 0 : i32
    %c0_i32_0 = arith.constant 0 : i32
    %c0_i32_1 = arith.constant 0 : i32
    return %c0_i32, %c0_i32_0 : i32, i32
  }
  func.func @transform_3(%arg0: i32, %arg1: i32) -> (i32, i32) {
    %c0_i32 = arith.constant 0 : i32
    %c0_i32_0 = arith.constant 0 : i32
    %c0_i32_1 = arith.constant 0 : i32
    return %c0_i32, %c0_i32_0 : i32, i32
  }
  func.func @transform_4(%arg0: i32, %arg1: i32) -> (i32, i32, i32, i32) {
    %c0_i32 = arith.constant 0 : i32
    %c0_i32_0 = arith.constant 0 : i32
    %c0_i32_1 = arith.constant 0 : i32
    return %arg0, %arg1, %c0_i32, %c0_i32_0 : i32, i32, i32, i32
  }
  func.func @transform_5(%arg0: i32, %arg1: i32) -> (i32, i32, i32, i32) {
    %c0_i32 = arith.constant 0 : i32
    %c0_i32_0 = arith.constant 0 : i32
    %c0_i32_1 = arith.constant 0 : i32
    return %arg0, %arg1, %c0_i32, %c0_i32_0 : i32, i32, i32, i32
  }
}

module attributes {stable_mosaic.version = 11 : i64} {
  func.func @kernel(%arg0: i32, %arg1: memref<128x16xf32, #tpu.memory_space<vmem>>, %arg2: memref<16x4xbf16, #tpu.memory_space<vmem>>, %arg3: memref<1x4xf32, #tpu.memory_space<vmem>>, %arg4: memref<128x4xf32, #tpu.memory_space<vmem>>, %arg5: memref<128x4xf32, #tpu.memory_space<vmem>>) attributes {dimension_semantics = [#tpu.dimension_semantics<parallel>], iteration_bounds = array<i64: 1>, scalar_prefetch = 0 : i64, scratch_operands = 0 : i64, tpu.core_type = #tpu.core_type<tc>, window_params = [{transform_indices = @transform_0, window_bounds = array<i64: 128, 16>}, {pipeline_mode = #tpu.pipeline_mode<synchronous>, transform_indices = @transform_1, window_bounds = array<i64: 16, 4>}, {pipeline_mode = #tpu.pipeline_mode<synchronous>, transform_indices = @transform_2, window_bounds = array<i64: 1, 4>}, {transform_indices = @transform_3, window_bounds = array<i64: 128, 4>}, {transform_indices = @transform_4, window_bounds = array<i64: 128, 4>}]} {
    %c0 = arith.constant 0 : index
    %c0_0 = arith.constant 0 : index
    %0 = vector.load %arg1[%c0, %c0_0] : memref<128x16xf32, #tpu.memory_space<vmem>>, vector<128x16xf32>
    %1 = arith.truncf %0 : vector<128x16xf32> to vector<128x16xbf16>
    %c0_1 = arith.constant 0 : index
    %c0_2 = arith.constant 0 : index
    %2 = vector.load %arg2[%c0_1, %c0_2] : memref<16x4xbf16, #tpu.memory_space<vmem>>, vector<16x4xbf16>
    %cst = arith.constant dense<0.000000e+00> : vector<128x4xf32>
    %3 = tpu.matmul %1, %2, %cst {dimension_numbers = #tpu.dot_dimension_numbers<[1], [0], [0], [1], [0, 0, 1, 1], [], []>} : vector<128x16xbf16>, vector<16x4xbf16>, vector<128x4xf32> -> vector<128x4xf32>
    %c0_3 = arith.constant 0 : index
    %c0_4 = arith.constant 0 : index
    %4 = vector.load %arg3[%c0_3, %c0_4] : memref<1x4xf32, #tpu.memory_space<vmem>>, vector<1x4xf32>
    %5 = vector.broadcast %4 : vector<1x4xf32> to vector<128x4xf32>
    %6 = arith.addf %3, %5 : vector<128x4xf32>
    %c0_5 = arith.constant 0 : index
    %c0_6 = arith.constant 0 : index
    %7 = vector.load %arg4[%c0_5, %c0_6] : memref<128x4xf32, #tpu.memory_space<vmem>>, vector<128x4xf32>
    %8 = arith.addf %6, %7 : vector<128x4xf32>
    %c0_7 = arith.constant 0 : index
    %c0_8 = arith.constant 0 : index
    %9 = vector.load %arg5[%c0_7, %c0_8] : memref<128x4xf32, #tpu.memory_space<vmem>>, vector<128x4xf32>
    tpu.vector_store %arg5[%c0_7, %c0_8], %8 {strides = array<i32>} : memref<128x4xf32, #tpu.memory_space<vmem>>, vector<128x4xf32>,
    return
  }
  func.func @transform_0(%arg0: i32) -> (i32, i32) {
    %c0_i32 = arith.constant 0 : i32
    %c0_i32_0 = arith.constant 0 : i32
    return %arg0, %c0_i32 : i32, i32
  }
  func.func @transform_1(%arg0: i32) -> (i32, i32) {
    %c0_i32 = arith.constant 0 : i32
    %c0_i32_0 = arith.constant 0 : i32
    %c0_i32_1 = arith.constant 0 : i32
    return %c0_i32, %c0_i32_0 : i32, i32
  }
  func.func @transform_2(%arg0: i32) -> (i32, i32) {
    %c0_i32 = arith.constant 0 : i32
    %c0_i32_0 = arith.constant 0 : i32
    %c0_i32_1 = arith.constant 0 : i32
    return %c0_i32, %c0_i32_0 : i32, i32
  }
  func.func @transform_3(%arg0: i32) -> (i32, i32) {
    %c0_i32 = arith.constant 0 : i32
    %c0_i32_0 = arith.constant 0 : i32
    return %arg0, %c0_i32 : i32, i32
  }
  func.func @transform_4(%arg0: i32) -> (i32, i32) {
    %c0_i32 = arith.constant 0 : i32
    %c0_i32_0 = arith.constant 0 : i32
    return %arg0, %c0_i32 : i32, i32
  }
}

</mosaic_0001>

<bundles_post_ra>
// kernel: genet_gray_forward.16
= control target key start
LH: loop header
LB: loop body
LE: loop exit
PB: predicated region body
PF: predicated region fallthrough
CT: control target
= control target key end

     0   :  { %vm72_vm0 = vcmask 1041408   ;;  %vm47_vm1 = vcmask 31744   ;;  %s395_s1 = inlined_call_operand.vmem [shape: bf16[4,4], index: 1, kind: input, shape index: {}]   ;;  %s396_s0 = inlined_call_operand.vmem [shape: f32[128,4], index: 0, kind: input, shape index: {}]   ;;  %s397_s2 = inlined_call_operand.vmem [shape: f32[1,4], index: 2, kind: input, shape index: {}]   ;;  %s398_s3 = inlined_call_operand.vmem [shape: f32[128,4], index: 3, kind: output, shape index: {}]  }
   0x1   :  { %v39_v0 = vld [vmem:[%s395_s1] sm:$0x3]  ;;  %v16_v2 = vld [vmem:[%s396_s0 + $0x8] sm:$0xff]  ;;  %v17_v7 = vld [vmem:[%s396_s0 + $0x10] sm:$0xff] }
   0x2   :  { %v15_v1 = vld [vmem:[%s396_s0] sm:$0xff]  ;;  %247 = vmatprep.subr.msk.bf16.mxu0 %vm72_vm0, %v39_v0  ;;  %248 = vmatprep.subr.msk.bf16.mxu1 %vm72_vm0, %v39_v0  ;;  %v74_v3 = vsel %vm72_vm0, %v39_v0, 0  ;;  %v24_v6 = vld [vmem:[%s396_s0 + $0x48] sm:$0xff]  ;;  %v18_v9 = vld [vmem:[%s396_s0 + $0x18] sm:$0xff] }
   0x3   :  { %v31_v4 = vpack.c.bf16 %v16_v2, %v15_v1  ;;  %v23_v5 = vld [vmem:[%s396_s0 + $0x40] sm:$0xff]  ;;  %228 = vmatpush3.bf16.msra.mxu0 %v74_v3  ;;  %246 = vmatpush3.bf16.msra.mxu1 %v74_v3  ;;  %v25_v10 = vld [vmem:[%s396_s0 + $0x50] sm:$0xff]  ;;  %v26_v11 = vld [vmem:[%s396_s0 + $0x58] sm:$0xff]  ;;  %v32_v12 = vpack.c.bf16 %v18_v9, %v17_v7 }
   0x4   :  { %v35_v8 = vpack.c.bf16 %v24_v6, %v23_v5  ;;  %v36_v13 = vpack.c.bf16 %v26_v11, %v25_v10  ;;  %v19_v14 = vld [vmem:[%s396_s0 + $0x20] sm:$0xff]  ;;  %v20_v15 = vld [vmem:[%s396_s0 + $0x28] sm:$0xff]  ;;  %v21_v20 = vld [vmem:[%s396_s0 + $0x30] sm:$0xff] }
   0x5   :  { %229 = vmatprep.mubr.msk.bf16.mxu0 %vm47_vm1, %v31_v4  ;;  %v27_v16 = vld [vmem:[%s396_s0 + $0x60] sm:$0xff]  ;;  %v33_v17 = vpack.c.bf16 %v20_v15, %v19_v14  ;;  %v28_v18 = vld [vmem:[%s396_s0 + $0x68] sm:$0xff]  ;;  %v22_v21 = vld [vmem:[%s396_s0 + $0x38] sm:$0xff] }
   0x6   :  { %237 = vmatprep.mubr.msk.bf16.mxu1 %vm47_vm1, %v35_v8  ;;  %230 = vmatmul.mubr.msk.bf16.vlgmr.msra.gmra.mrb[0].mxu0 %vm47_vm1, %v32_v12  ;;  %v37_v19 = vpack.c.bf16 %v28_v18, %v27_v16  ;;  %v29_v22 = vld [vmem:[%s396_s0 + $0x70] sm:$0xff]  ;;  %v30_v23 = vld [vmem:[%s396_s0 + $0x78] sm:$0xff]  ;;  %v34_v24 = vpack.c.bf16 %v22_v21, %v21_v20  ;;  %v209_v26 = vld [vmem:[%s397_s2] ss:$0 sm:$0xff] }
   0x7   :  { %238 = vmatmul.mubr.msk.bf16.vlgmr.msra.gmra.mrb[0].mxu1 %vm47_vm1, %v36_v13  ;;  %233 = vmatprep.mubr.msk.bf16.mxu0 %vm47_vm1, %v33_v17  ;;  %v38_v25 = vpack.c.bf16 %v30_v23, %v29_v22 }
   0x8   :  { %241 = vmatprep.mubr.msk.bf16.mxu1 %vm47_vm1, %v37_v19 }
   0xe   :  { %234 = vmatmul.mubr.msk.bf16.gmra.mrb[4].mxu0 %vm47_vm1, %v34_v24 }
   0xf   :  { %242 = vmatmul.mubr.msk.bf16.gmra.mrb[4].mxu1 %vm47_vm1, %v38_v25 }
  0xd9   :  { %v231_v27 = vpop.f32.mrb[0].mxu0 }
  0xda   :  { %v239_v28 = vpop.f32.mrb[0].mxu1  ;;  %v119_v29 = vadd.f32 %v231_v27, %v209_v26  ;;  %v110_v31 = vpop.f32.mrb[1].mxu0 }
  0xdb   :  { %v151_v30 = vadd.f32 %v239_v28, %v209_v26  ;;  %v142_v32 = vpop.f32.mrb[1].mxu1  ;;  %v111_v33 = vadd.f32 %v209_v26, %v110_v31  ;;  %v232_v35 = vpop.f32.mrb[2].mxu0 }
  0xdc   :  { %v143_v34 = vadd.f32 %v209_v26, %v142_v32  ;;  %v240_v36 = vpop.f32.mrb[2].mxu1  ;;  %v175_v37 = vmax.f32 %v119_v29, 0.0  ;;  %v122_v39 = vadd.f32 %v232_v35, %v209_v26  ;;  %v113_v41 = vpop.f32.mrb[3].mxu0 }
  0xdd   :  { %v183_v38 = vmax.f32 %v151_v30, 0.0  ;;  %v154_v40 = vadd.f32 %v240_v36, %v209_v26  ;;  %v145_v42 = vpop.f32.mrb[3].mxu1  ;;  %v173_v43 = vmax.f32 %v111_v33, 0.0  ;;  %v114_v45 = vadd.f32 %v209_v26, %v113_v41 }
  0xde   :  { %v181_v44 = vmax.f32 %v143_v34, 0.0  ;;  %v146_v46 = vadd.f32 %v209_v26, %v145_v42  ;;  %191 = vst.msk [vmem:[%s398_s3 + $0x10] sm:$0xff] %vm47_vm1, %v175_v37  ;;  %v176_v47 = vmax.f32 %v122_v39, 0.0 }
  0xdf   :  { %199 = vst.msk [vmem:[%s398_s3 + $0x50] sm:$0xff] %vm47_vm1, %v183_v38  ;;  %v184_v48 = vmax.f32 %v154_v40, 0.0  ;;  %189 = vst.msk [vmem:[%s398_s3] sm:$0xff] %vm47_vm1, %v173_v43  ;;  %v174_v49 = vmax.f32 %v114_v45, 0.0 }
  0xe0   :  { %197 = vst.msk [vmem:[%s398_s3 + $0x40] sm:$0xff] %vm47_vm1, %v181_v44  ;;  %v182_v50 = vmax.f32 %v146_v46, 0.0  ;;  %192 = vst.msk [vmem:[%s398_s3 + $0x18] sm:$0xff] %vm47_vm1, %v176_v47 }
  0xe1   :  { %200 = vst.msk [vmem:[%s398_s3 + $0x58] sm:$0xff] %vm47_vm1, %v184_v48  ;;  %190 = vst.msk [vmem:[%s398_s3 + $0x8] sm:$0xff] %vm47_vm1, %v174_v49  ;;  %v235_v51 = vpop.f32.mrb[4].mxu0 }
  0xe2   :  { %198 = vst.msk [vmem:[%s398_s3 + $0x48] sm:$0xff] %vm47_vm1, %v182_v50  ;;  %v243_v52 = vpop.f32.mrb[4].mxu1  ;;  %v135_v53 = vadd.f32 %v235_v51, %v209_v26  ;;  %v126_v55 = vpop.f32.mrb[5].mxu0 }
  0xe3   :  { %v167_v54 = vadd.f32 %v243_v52, %v209_v26  ;;  %v158_v56 = vpop.f32.mrb[5].mxu1  ;;  %v127_v57 = vadd.f32 %v209_v26, %v126_v55  ;;  %v236_v59 = vpop.f32.mrb[6].mxu0 }
  0xe4   :  { %v159_v58 = vadd.f32 %v209_v26, %v158_v56  ;;  %v244_v60 = vpop.f32.mrb[6].mxu1  ;;  %v179_v61 = vmax.f32 %v135_v53, 0.0  ;;  %v138_v63 = vadd.f32 %v236_v59, %v209_v26  ;;  %v129_v1 = vpop.f32.mrb[7].mxu0 }
  0xe5   :  { %v187_v62 = vmax.f32 %v167_v54, 0.0  ;;  %v170_v0 = vadd.f32 %v244_v60, %v209_v26  ;;  %v161_v2 = vpop.f32.mrb[7].mxu1  ;;  %v177_v3 = vmax.f32 %v127_v57, 0.0  ;;  %v130_v5 = vadd.f32 %v209_v26, %v129_v1 }
  0xe6   :  { %v185_v4 = vmax.f32 %v159_v58, 0.0  ;;  %v162_v6 = vadd.f32 %v209_v26, %v161_v2  ;;  %195 = vst.msk [vmem:[%s398_s3 + $0x30] sm:$0xff] %vm47_vm1, %v179_v61  ;;  %v180_v7 = vmax.f32 %v138_v63, 0.0 }
  0xe7   :  { %203 = vst.msk [vmem:[%s398_s3 + $0x70] sm:$0xff] %vm47_vm1, %v187_v62  ;;  %v188_v8 = vmax.f32 %v170_v0, 0.0  ;;  %193 = vst.msk [vmem:[%s398_s3 + $0x20] sm:$0xff] %vm47_vm1, %v177_v3  ;;  %v178_v9 = vmax.f32 %v130_v5, 0.0 }
  0xe8   :  { %201 = vst.msk [vmem:[%s398_s3 + $0x60] sm:$0xff] %vm47_vm1, %v185_v4  ;;  %v186_v10 = vmax.f32 %v162_v6, 0.0  ;;  %196 = vst.msk [vmem:[%s398_s3 + $0x38] sm:$0xff] %vm47_vm1, %v180_v7 }
  0xe9   :  { %204 = vst.msk [vmem:[%s398_s3 + $0x78] sm:$0xff] %vm47_vm1, %v188_v8  ;;  %194 = vst.msk [vmem:[%s398_s3 + $0x28] sm:$0xff] %vm47_vm1, %v178_v9 }
  0xea   :  { %202 = vst.msk [vmem:[%s398_s3 + $0x68] sm:$0xff] %vm47_vm1, %v186_v10 }

// kernel: genet_gray_forward.15
= control target key start
LH: loop header
LB: loop body
LE: loop exit
PB: predicated region body
PF: predicated region fallthrough
CT: control target
= control target key end

     0   :  { %vm72_vm0 = vcmask 1041408   ;;  %vm47_vm1 = vcmask 31744   ;;  %vm189_vm2 = vcmask 130048   ;;  %s396_s1 = inlined_call_operand.vmem [shape: bf16[4,16], index: 1, kind: input, shape index: {}]   ;;  %s397_s0 = inlined_call_operand.vmem [shape: f32[128,4], index: 0, kind: input, shape index: {}]   ;;  %s398_s2 = inlined_call_operand.vmem [shape: f32[1,16], index: 2, kind: input, shape index: {}]   ;;  %s399_s3 = inlined_call_operand.vmem [shape: f32[128,16], index: 3, kind: output, shape index: {}]  }
   0x1   :  { %v39_v0 = vld [vmem:[%s396_s1] sm:$0x3]  ;;  %v16_v2 = vld [vmem:[%s397_s0 + $0x8] sm:$0xff]  ;;  %v17_v7 = vld [vmem:[%s397_s0 + $0x10] sm:$0xff] }
   0x2   :  { %v15_v1 = vld [vmem:[%s397_s0] sm:$0xff]  ;;  %248 = vmatprep.subr.msk.bf16.mxu0 %vm72_vm0, %v39_v0  ;;  %249 = vmatprep.subr.msk.bf16.mxu1 %vm72_vm0, %v39_v0  ;;  %v74_v3 = vsel %vm72_vm0, %v39_v0, 0  ;;  %v24_v6 = vld [vmem:[%s397_s0 + $0x48] sm:$0xff]  ;;  %v18_v9 = vld [vmem:[%s397_s0 + $0x18] sm:$0xff] }
   0x3   :  { %v31_v4 = vpack.c.bf16 %v16_v2, %v15_v1  ;;  %v23_v5 = vld [vmem:[%s397_s0 + $0x40] sm:$0xff]  ;;  %229 = vmatpush3.bf16.msra.mxu0 %v74_v3  ;;  %247 = vmatpush3.bf16.msra.mxu1 %v74_v3  ;;  %v25_v10 = vld [vmem:[%s397_s0 + $0x50] sm:$0xff]  ;;  %v26_v11 = vld [vmem:[%s397_s0 + $0x58] sm:$0xff]  ;;  %v32_v12 = vpack.c.bf16 %v18_v9, %v17_v7 }
   0x4   :  { %v35_v8 = vpack.c.bf16 %v24_v6, %v23_v5  ;;  %v36_v13 = vpack.c.bf16 %v26_v11, %v25_v10  ;;  %v19_v14 = vld [vmem:[%s397_s0 + $0x20] sm:$0xff]  ;;  %v20_v15 = vld [vmem:[%s397_s0 + $0x28] sm:$0xff]  ;;  %v21_v20 = vld [vmem:[%s397_s0 + $0x30] sm:$0xff] }
   0x5   :  { %230 = vmatprep.mubr.msk.bf16.mxu0 %vm47_vm1, %v31_v4  ;;  %v27_v16 = vld [vmem:[%s397_s0 + $0x60] sm:$0xff]  ;;  %v33_v17 = vpack.c.bf16 %v20_v15, %v19_v14  ;;  %v28_v18 = vld [vmem:[%s397_s0 + $0x68] sm:$0xff]  ;;  %v22_v21 = vld [vmem:[%s397_s0 + $0x38] sm:$0xff] }
   0x6   :  { %238 = vmatprep.mubr.msk.bf16.mxu1 %vm47_vm1, %v35_v8  ;;  %231 = vmatmul.mubr.msk.bf16.vlgmr.msra.gmra.mrb[0].mxu0 %vm47_vm1, %v32_v12  ;;  %v37_v19 = vpack.c.bf16 %v28_v18, %v27_v16  ;;  %v29_v22 = vld [vmem:[%s397_s0 + $0x70] sm:$0xff]  ;;  %v30_v23 = vld [vmem:[%s397_s0 + $0x78] sm:$0xff]  ;;  %v34_v24 = vpack.c.bf16 %v22_v21, %v21_v20  ;;  %v210_v26 = vld [vmem:[%s398_s2] ss:$0 sm:$0xff] }
   0x7   :  { %239 = vmatmul.mubr.msk.bf16.vlgmr.msra.gmra.mrb[0].mxu1 %vm47_vm1, %v36_v13  ;;  %234 = vmatprep.mubr.msk.bf16.mxu0 %vm47_vm1, %v33_v17  ;;  %v38_v25 = vpack.c.bf16 %v30_v23, %v29_v22 }
   0x8   :  { %242 = vmatprep.mubr.msk.bf16.mxu1 %vm47_vm1, %v37_v19 }
   0xe   :  { %235 = vmatmul.mubr.msk.bf16.gmra.mrb[4].mxu0 %vm47_vm1, %v34_v24 }
   0xf   :  { %243 = vmatmul.mubr.msk.bf16.gmra.mrb[4].mxu1 %vm47_vm1, %v38_v25 }
  0xd9   :  { %v232_v27 = vpop.f32.mrb[0].mxu0 }
  0xda   :  { %v240_v28 = vpop.f32.mrb[0].mxu1  ;;  %v119_v29 = vadd.f32 %v232_v27, %v210_v26  ;;  %v110_v31 = vpop.f32.mrb[1].mxu0 }
  0xdb   :  { %v151_v30 = vadd.f32 %v240_v28, %v210_v26  ;;  %v142_v32 = vpop.f32.mrb[1].mxu1  ;;  %v111_v33 = vadd.f32 %v210_v26, %v110_v31  ;;  %v233_v35 = vpop.f32.mrb[2].mxu0 }
  0xdc   :  { %v143_v34 = vadd.f32 %v210_v26, %v142_v32  ;;  %v241_v36 = vpop.f32.mrb[2].mxu1  ;;  %v175_v37 = vmax.f32 %v119_v29, 0.0  ;;  %v122_v39 = vadd.f32 %v233_v35, %v210_v26  ;;  %v113_v41 = vpop.f32.mrb[3].mxu0 }
  0xdd   :  { %v183_v38 = vmax.f32 %v151_v30, 0.0  ;;  %v154_v40 = vadd.f32 %v241_v36, %v210_v26  ;;  %v145_v42 = vpop.f32.mrb[3].mxu1  ;;  %v173_v43 = vmax.f32 %v111_v33, 0.0  ;;  %v114_v45 = vadd.f32 %v210_v26, %v113_v41 }
  0xde   :  { %v181_v44 = vmax.f32 %v143_v34, 0.0  ;;  %v146_v46 = vadd.f32 %v210_v26, %v145_v42  ;;  %192 = vst.msk [vmem:[%s399_s3 + $0x10] sm:$0xff] %vm189_vm2, %v175_v37  ;;  %v176_v47 = vmax.f32 %v122_v39, 0.0 }
  0xdf   :  { %200 = vst.msk [vmem:[%s399_s3 + $0x50] sm:$0xff] %vm189_vm2, %v183_v38  ;;  %v184_v48 = vmax.f32 %v154_v40, 0.0  ;;  %190 = vst.msk [vmem:[%s399_s3] sm:$0xff] %vm189_vm2, %v173_v43  ;;  %v174_v49 = vmax.f32 %v114_v45, 0.0 }
  0xe0   :  { %198 = vst.msk [vmem:[%s399_s3 + $0x40] sm:$0xff] %vm189_vm2, %v181_v44  ;;  %v182_v50 = vmax.f32 %v146_v46, 0.0  ;;  %193 = vst.msk [vmem:[%s399_s3 + $0x18] sm:$0xff] %vm189_vm2, %v176_v47 }
  0xe1   :  { %201 = vst.msk [vmem:[%s399_s3 + $0x58] sm:$0xff] %vm189_vm2, %v184_v48  ;;  %191 = vst.msk [vmem:[%s399_s3 + $0x8] sm:$0xff] %vm189_vm2, %v174_v49  ;;  %v236_v51 = vpop.f32.mrb[4].mxu0 }
  0xe2   :  { %199 = vst.msk [vmem:[%s399_s3 + $0x48] sm:$0xff] %vm189_vm2, %v182_v50  ;;  %v244_v52 = vpop.f32.mrb[4].mxu1  ;;  %v135_v53 = vadd.f32 %v236_v51, %v210_v26  ;;  %v126_v55 = vpop.f32.mrb[5].mxu0 }
  0xe3   :  { %v167_v54 = vadd.f32 %v244_v52, %v210_v26  ;;  %v158_v56 = vpop.f32.mrb[5].mxu1  ;;  %v127_v57 = vadd.f32 %v210_v26, %v126_v55  ;;  %v237_v59 = vpop.f32.mrb[6].mxu0 }
  0xe4   :  { %v159_v58 = vadd.f32 %v210_v26, %v158_v56  ;;  %v245_v60 = vpop.f32.mrb[6].mxu1  ;;  %v179_v61 = vmax.f32 %v135_v53, 0.0  ;;  %v138_v63 = vadd.f32 %v237_v59, %v210_v26  ;;  %v129_v1 = vpop.f32.mrb[7].mxu0 }
  0xe5   :  { %v187_v62 = vmax.f32 %v167_v54, 0.0  ;;  %v170_v0 = vadd.f32 %v245_v60, %v210_v26  ;;  %v161_v2 = vpop.f32.mrb[7].mxu1  ;;  %v177_v3 = vmax.f32 %v127_v57, 0.0  ;;  %v130_v5 = vadd.f32 %v210_v26, %v129_v1 }
  0xe6   :  { %v185_v4 = vmax.f32 %v159_v58, 0.0  ;;  %v162_v6 = vadd.f32 %v210_v26, %v161_v2  ;;  %196 = vst.msk [vmem:[%s399_s3 + $0x30] sm:$0xff] %vm189_vm2, %v179_v61  ;;  %v180_v7 = vmax.f32 %v138_v63, 0.0 }
  0xe7   :  { %204 = vst.msk [vmem:[%s399_s3 + $0x70] sm:$0xff] %vm189_vm2, %v187_v62  ;;  %v188_v8 = vmax.f32 %v170_v0, 0.0  ;;  %194 = vst.msk [vmem:[%s399_s3 + $0x20] sm:$0xff] %vm189_vm2, %v177_v3  ;;  %v178_v9 = vmax.f32 %v130_v5, 0.0 }
  0xe8   :  { %202 = vst.msk [vmem:[%s399_s3 + $0x60] sm:$0xff] %vm189_vm2, %v185_v4  ;;  %v186_v10 = vmax.f32 %v162_v6, 0.0  ;;  %197 = vst.msk [vmem:[%s399_s3 + $0x38] sm:$0xff] %vm189_vm2, %v180_v7 }
  0xe9   :  { %205 = vst.msk [vmem:[%s399_s3 + $0x78] sm:$0xff] %vm189_vm2, %v188_v8  ;;  %195 = vst.msk [vmem:[%s399_s3 + $0x28] sm:$0xff] %vm189_vm2, %v178_v9 }
  0xea   :  { %203 = vst.msk [vmem:[%s399_s3 + $0x68] sm:$0xff] %vm189_vm2, %v186_v10 }

// kernel: genet_gray_forward.18
= control target key start
LH: loop header
LB: loop body
LE: loop exit
PB: predicated region body
PF: predicated region fallthrough
CT: control target
= control target key end

     0   :  { %s503_s15 = smov 0   ;;  %s505_s16 = smov 0   ;;  %s563_s0 = inlined_call_operand.vmem [shape: f32[2,8,8,32], index: 0, kind: input, shape index: {}]   ;;  %s564_s1 = inlined_call_operand.vmem [shape: f32[2,2,32], index: 1, kind: input, shape index: {}]   ;;  %s565_s2 = inlined_call_operand.vmem [shape: f32[1,32], index: 2, kind: input, shape index: {}]   ;;  %s566_s3 = inlined_call_operand.vmem [shape: f32[1,32], index: 3, kind: input, shape index: {}]   ;;  %s567_s4 = inlined_call_operand.vmem [shape: f32[2,8,8,32], index: 4, kind: output, shape index: {}]  }
   0x1   :  { %s507_s17 = smov 0  }
   0x2 LB: > { %s26_s18 = sadd.s32 1, %s471_s16  ;;  %p417_p0 = scmp.ge.s32.totalorder %s475_s17, 1  ;;  %s475_s17 = sphi %s507_s17, %s14_s17   ;;  %s471_s16 = sphi %s505_s16, %s569_s16   ;;  %s467_s15 = sphi %s503_s15, %s568_s15  }
   0x3   : > { %p28_p1 = scmp.ge.s32.totalorder %s26_s18, 2  ;;  %p183_p2 = scmp.lt.s32.totalorder %s475_s17, 3 }
   0x5   : > { %s571_s18 = smov (%p28_p1, %s26_s18), 0  ;;  %p184_p3 = pnand %p417_p0, %p183_p2 }
   0x6   : > { %v237_v0 = vld [vmem:[%s564_s1] sm:$0x3] (!%p184_p3)  ;;  %v238_v1 = vld [vmem:[%s564_s1 + $0x2] sm:$0x3] (!%p184_p3)  ;;  %vm239_vm0 = vcmask (!%p184_p3), 254976   ;;  %v256_v12 = vlaneseq (!%p184_p3)  ;;  %p218_p4 = scmp.lt.s32.totalorder (!%p184_p3), %s467_s15, 1 }
   0x7   : > { %187 = sbr.rel (%p184_p3) target bundleno = 53 (0x35), region = 36  ;;  %v240_v2 = vsel (!%p184_p3), %vm239_vm0, %v237_v0, 0.0  ;;  %v241_v3 = vsel (!%p184_p3), %vm239_vm0, %v238_v1, 0.0  ;;  %v477_v10 = vmov (!%p184_p3), 1966171168   ;;  %vm317_vm1 = vcmask (!%p184_p3), 261120  }
   0x8   : > { %v242_v4 = vadd.f32 (!%p184_p3), %v241_v3, %v240_v2  ;;  %v254_v11 = vunpack.c.l.s4 (!%p184_p3), %v477_v10  ;;  %v257_v14 = vshrl.u32 (!%p184_p3), %v256_v12, 7  ;;  %v249_v19 = vld [vmem:[%s565_s2] sm:$0x1] (!%p184_p3) }
   0x9   : > { %v270_v23 = vld [vmem:[%s566_s3] sm:$0x1] (!%p184_p3) }
   0xa   : > { %v243_v5 = vmul.f32 (!%p184_p3), 0.0078125, %v242_v4  ;;  %v255_v13 = vunpack.c.0.s8 (!%p184_p3), %v254_v11  ;;  %v284_v21 = vsub.s32 (!%p184_p3), 0, %v257_v14 }
   0xc   : > { %v244_v6 = vmul.f32 (!%p184_p3), %v243_v5, %v243_v5  ;;  %v258_v15 = vsub.s32 (!%p184_p3), %v255_v13, %v257_v14 }
   0xe   : > { %v246_v7 = vrot.slane %v244_v6, 7  ;;  %s573_s15 = smov (!%p218_p4, %s467_s15), 1 }
   0xf   : > { %s424_s23 = sshll.u32 %s573_s15, 6 }
  0x10   : > { %v248_v8 = vsub.f32 %v243_v5, %v246_v7  ;;  %s225_s26 = scalar_lea.vmem %s563_s0, %s424_s23  ;;  %s235_s7 = scalar_lea.vmem %s567_s4, %s424_s23 }
  0x11   : > { %v273_v24 = vld [vmem:[%s225_s26] sm:$0xff]  ;;  %v274_v25 = vld [vmem:[%s225_s26 + $0x8] sm:$0xff]  ;;  %v275_v26 = vld [vmem:[%s225_s26 + $0x10] sm:$0xff] }
  0x12   : > { %v250_v9 = vadd.f32 1e-05, %v248_v8  ;;  %v276_v27 = vld [vmem:[%s225_s26 + $0x18] sm:$0xff]  ;;  %v277_v30 = vld [vmem:[%s225_s26 + $0x20] sm:$0xff]  ;;  %v278_v31 = vld [vmem:[%s225_s26 + $0x28] sm:$0xff] }
  0x13   : > { %v279_v32 = vld [vmem:[%s225_s26 + $0x30] sm:$0xff]  ;;  %v280_v33 = vld [vmem:[%s225_s26 + $0x38] sm:$0xff] }
  0x14   : > { %451 = vrsqrt.f32 %v250_v9 }
  0x1e   : > { %v452_v16 = vpop.eup %451 }
  0x1f   : > { %v259_v17 = vrot.slane %v452_v16, %v258_v15 }
  0x21   : > { %v260_v18 = vcombine.high %v259_v17, %v259_v17 }
  0x23   : > { %v267_v20 = vrot.slane %v260_v18, %v258_v15 }
  0x25   : > { %v269_v22 = vmul.f32 %v267_v20, %v249_v19 }
  0x27   : > { %v271_v28 = vmul.f32 %v269_v22, %v243_v5  ;;  %v285_v29 = vrot.slane %v269_v22, %v284_v21 }
  0x29   : > { %v272_v34 = vsub.f32 %v270_v23, %v271_v28  ;;  %v287_v35 = vmul.f32 %v285_v29, %v273_v24  ;;  %v288_v36 = vmul.f32 %v285_v29, %v274_v25  ;;  %v289_v37 = vmul.f32 %v285_v29, %v275_v26 }
  0x2a   : > { %v290_v38 = vmul.f32 %v285_v29, %v276_v27  ;;  %v291_v39 = vmul.f32 %v285_v29, %v277_v30  ;;  %v292_v40 = vmul.f32 %v285_v29, %v278_v31  ;;  %v293_v41 = vmul.f32 %v285_v29, %v279_v32 }
  0x2b   : > { %v299_v42 = vrot.slane %v272_v34, %v284_v21  ;;  %v294_v43 = vmul.f32 %v285_v29, %v280_v33 }
  0x2d   : > { %v301_v44 = vadd.f32 %v299_v42, %v287_v35  ;;  %v302_v45 = vadd.f32 %v299_v42, %v288_v36  ;;  %v303_v46 = vadd.f32 %v299_v42, %v289_v37  ;;  %v304_v47 = vadd.f32 %v299_v42, %v290_v38 }
  0x2e   : > { %v305_v48 = vadd.f32 %v299_v42, %v291_v39  ;;  %v306_v49 = vadd.f32 %v299_v42, %v292_v40  ;;  %v307_v50 = vadd.f32 %v299_v42, %v293_v41  ;;  %v308_v51 = vadd.f32 %v299_v42, %v294_v43 }
  0x2f   : > { %v309_v52 = vmax.f32 %v301_v44, 0.0  ;;  %v310_v53 = vmax.f32 %v302_v45, 0.0  ;;  %v311_v54 = vmax.f32 %v303_v46, 0.0  ;;  %v312_v55 = vmax.f32 %v304_v47, 0.0 }
  0x30   : > { %v313_v56 = vmax.f32 %v305_v48, 0.0  ;;  %v314_v57 = vmax.f32 %v306_v49, 0.0  ;;  %v315_v58 = vmax.f32 %v307_v50, 0.0  ;;  %v316_v59 = vmax.f32 %v308_v51, 0.0 }
  0x31   : > { %318 = vst.msk [vmem:[%s235_s7] sm:$0xff] %vm317_vm1, %v309_v52  ;;  %319 = vst.msk [vmem:[%s235_s7 + $0x8] sm:$0xff] %vm317_vm1, %v310_v53 }
  0x32   : > { %320 = vst.msk [vmem:[%s235_s7 + $0x10] sm:$0xff] %vm317_vm1, %v311_v54  ;;  %321 = vst.msk [vmem:[%s235_s7 + $0x18] sm:$0xff] %vm317_vm1, %v312_v55 }
  0x33   : > { %322 = vst.msk [vmem:[%s235_s7 + $0x20] sm:$0xff] %vm317_vm1, %v313_v56  ;;  %323 = vst.msk [vmem:[%s235_s7 + $0x28] sm:$0xff] %vm317_vm1, %v314_v57 }
  0x34   : > { %324 = vst.msk [vmem:[%s235_s7 + $0x30] sm:$0xff] %vm317_vm1, %v315_v58  ;;  %325 = vst.msk [vmem:[%s235_s7 + $0x38] sm:$0xff] %vm317_vm1, %v316_v59 }
  0x35 PF: > { %s14_s17 = sadd.s32 1, %s475_s17   ;;  %s568_s15 = smov %s471_s16 }
  0x36   : > { %p11_p5 = scmp.ge.s32.totalorder %s14_s17, 4   ;;  %s569_s16 = smov %s571_s18 }
  0x38   :  { %13 = sbr.rel (!%p11_p5) target bundleno = 2 (0x2), region = 66 }

// kernel: genet_gray_forward.17
= control target key start
LH: loop header
LB: loop body
LE: loop exit
PB: predicated region body
PF: predicated region fallthrough
CT: control target
= control target key end

     0   :  { %s1158_s15 = smov 0   ;;  %s1489_s0 = inlined_call_operand.vmem [shape: f32[2,10,10,20], index: 0, kind: input, shape index: {}]   ;;  %s1490_s1 = inlined_call_operand.vmem [shape: bf16[180,32], index: 1, kind: input, shape index: {}]   ;;  %s1491_s2 = inlined_call_operand.vmem [shape: f32[1,32], index: 2, kind: input, shape index: {}]   ;;  %s1492_s3 = inlined_call_operand.vmem [shape: f32[2,8,8,32], index: 3, kind: output, shape index: {0}]   ;;  %s1493_s4 = inlined_call_operand.vmem [shape: f32[2,2,32], index: 4, kind: output, shape index: {1}]  }
   0x1 LB: > { %s985_s16 = sadd.s32 4294967295, %s1122_s15   ;;  %p989_p0 = scmp.ge.s32.totalorder %s1122_s15, 1  ;;  %s1122_s15 = sphi %s1158_s15, %s15_s15  }
   0x2   : > { %p165_p1 = scmp.lt.s32.totalorder %s1122_s15, 3 }
   0x4   : > { %p166_p2 = pnand %p989_p0, %p165_p1 }
   0x5   : > { %p195_p3 = scmp.lt.s32.totalorder (!%p166_p2), %s985_s16, 1  ;;  %v1104_v0 = vld [vmem:[%s1490_s1] sm:$0xff] (!%p166_p2)   ;;  %v1124_v1 = vmov (!%p166_p2), 0   ;;  %v1105_v2 = vld [vmem:[%s1490_s1 + $0x8] sm:$0xff] (!%p166_p2)   ;;  %v1106_v3 = vld [vmem:[%s1490_s1 + $0x10] sm:$0xff] (!%p166_p2)   ;;  %s1125_s27 = smov (!%p166_p2), 40  }
   0x6   : > { %169 = sbr.rel (%p166_p2) target bundleno = 503 (0x1f7), region = 32  ;;  %770 = vmatprep.subr.bf16.mxu0 (!%p166_p2), %v1124_v1  ;;  %1062 = vmatprep.subr.bf16.mxu1 (!%p166_p2), %v1124_v1  ;;  %s1126_s28 = smov (!%p166_p2), 20   ;;  %vm242_vm0 = vcmask (!%p166_p2), 162816   ;;  %v1107_v11 = vld [vmem:[%s1490_s1 + $0x18] sm:$0xff] (!%p166_p2)   ;;  %v1108_v16 = vld [vmem:[%s1490_s1 + $0x20] sm:$0xff] (!%p166_p2)   ;;  %v1109_v18 = vld [vmem:[%s1490_s1 + $0x28] sm:$0xff] (!%p166_p2)  }
   0x7   : > { %771 = vmatpush1.bf16.msra.mxu0 (!%p166_p2), %v1104_v0  ;;  %1074 = vmatpush1.bf16.msra.mxu1 (!%p166_p2), %v1104_v0  ;;  %s1127_s7 = smov (!%p166_p2), 60   ;;  %s1128_s10 = smov (!%p166_p2), 120   ;;  %v1110_v20 = vld [vmem:[%s1490_s1 + $0x30] sm:$0xff] (!%p166_p2)   ;;  %v1111_v22 = vld [vmem:[%s1490_s1 + $0x38] sm:$0xff] (!%p166_p2)   ;;  %v1112_v24 = vld [vmem:[%s1490_s1 + $0x40] sm:$0xff] (!%p166_p2)   ;;  %vm766_vm1 = vcmask (!%p166_p2), 1041408  }
   0x8   : > { %772 = vmatprep.subr.bf16.mxu0 (!%p166_p2), %v1124_v1  ;;  %1063 = vmatprep.subr.bf16.mxu1 (!%p166_p2), %v1124_v1  ;;  %s1129_s13 = smov (!%p166_p2), 80   ;;  %s1130_s18 = smov (!%p166_p2), 12   ;;  %v1113_v26 = vld [vmem:[%s1490_s1 + $0x48] sm:$0xff] (!%p166_p2)   ;;  %v1114_v27 = vld [vmem:[%s1490_s1 + $0x50] sm:$0xff] (!%p166_p2)   ;;  %vm291_vm2 = vcmask (!%p166_p2), 326816   ;;  %vm340_vm3 = vcmask (!%p166_p2), 490816  }
   0x9   : > { %s1132_s25 = smov (!%p166_p2), 32   ;;  %v1115_v28 = vld [vmem:[%s1490_s1 + $0x58] ss:$0 sps:$4 sm:$0x33] (!%p166_p2)   ;;  %vm390_vm4 = vcmask (!%p166_p2), 654816   ;;  %vm540_vm5 = vcmask (!%p166_p2), 97280  }
   0xa   : > { %v768_v31 = vsel (!%p166_p2), %vm766_vm1, %v1115_v28, 0  ;;  %vm439_vm6 = vcmask (!%p166_p2), 818816   ;;  %vm596_vm7 = vcmask (!%p166_p2), 261216   ;;  %vm488_vm8 = vcmask (!%p166_p2), 982816  }
   0xb   : > { %773 = vmatpush1.bf16.msra.mxu0 (!%p166_p2), %v1105_v2  ;;  %1075 = vmatpush1.bf16.msra.mxu1 (!%p166_p2), %v1105_v2  ;;  %vm538_vm9 = vcmask (!%p166_p2), 1048512   ;;  %vm645_vm10 = vcmask (!%p166_p2), 425216   ;;  %vm753_vm11 = vcmask (!%p166_p2), 424960   ;;  %vm835_vm12 = vcmask (!%p166_p2), 261120  }
   0xc   : > { %774 = vmatprep.subr.bf16.mxu0 (!%p166_p2), %v1124_v1  ;;  %1064 = vmatprep.subr.bf16.mxu1 (!%p166_p2), %v1124_v1  ;;  %vm896_vm13 = vcmask (!%p166_p2), 253952  }
   0xd   : > { %s1495_s16 = smov (!%p195_p3, %s985_s16), 1 }
   0xe   : > { %s1086_s21 = smul.u32 160, %s1495_s16  ;;  %s993_s9 = sshll.u32 %s1495_s16, 1 }
   0xf   : > { %775 = vmatpush1.bf16.msra.mxu0 %v1106_v3  ;;  %1076 = vmatpush1.bf16.msra.mxu1 %v1106_v3  ;;  %s208_s12 = scalar_lea.vmem %s1493_s4, %s993_s9 }
  0x10   : > { %s1182_s24 = scalar_lea.vmem %s1489_s0, %s1086_s21  ;;  %776 = vmatprep.subr.bf16.mxu0 %v1124_v1  ;;  %1065 = vmatprep.subr.bf16.mxu1 %v1124_v1  ;;  %s1131_s21 = smov 100  }
  0x11   : > { %v300_v4 = vld [vmem:[%s1182_s24 + $0x2] sm:$0xff]  ;;  %v1194_v6 = vld [vmem:[%s1182_s24 + $0x12] sm:$0xff] }
  0x12   : > { %v251_v5 = vld [vmem:[%s1182_s24 + $0x1] sm:$0xff]  ;;  %316 = vrot.lane.b32.xlu1 %v300_v4, %s1125_s27  ;;  %v252_v8 = vld [vmem:[%s1182_s24 + $0x11] sm:$0xff] }
  0x13   : > { %267 = vrot.lane.b32.xlu0 %v251_v5, %s1126_s28  ;;  %v995_v7 = vld [vmem:[%s1182_s24 + $0x20] sm:$0xff]  ;;  %v994_v9 = vld [vmem:[%s1182_s24 + $0x10] sm:$0xff]  ;;  %777 = vmatpush1.bf16.msra.mxu0 %v1107_v11 }
  0x14   : > { %v1200_v10 = vld [vmem:[%s1182_s24 + $0x30] sm:$0xff]  ;;  %245 = vst.msk [vmem:[#allocation2 + $0x20] sm:$0xff] %vm242_vm0, %v995_v7  ;;  %244 = vst.msk [vmem:[#allocation2 + $0x10] sm:$0xff] %vm242_vm0, %v994_v9  ;;  %v1215_v12 = vld [vmem:[%s1182_s24 + $0x40] sm:$0xff]  ;;  %1077 = vmatpush1.bf16.msra.mxu1 %v1107_v11  ;;  %778 = vmatprep.subr.bf16.mxu0 %v1124_v1 }
  0x15   : > { %246 = vst.msk [vmem:[#allocation2 + $0x30] sm:$0xff] %vm242_vm0, %v1200_v10  ;;  %v1218_v13 = vld [vmem:[%s1182_s24 + $0x60] sm:$0xff]  ;;  %v1221_v14 = vld [vmem:[%s1182_s24 + $0x50] sm:$0xff]  ;;  %247 = vst.msk [vmem:[#allocation2 + $0x40] sm:$0xff] %vm242_vm0, %v1215_v12  ;;  %1066 = vmatprep.subr.bf16.mxu1 %v1124_v1 }
  0x16   : > { %318 = vrot.lane.b32.xlu1 %v1194_v6, %s1125_s27  ;;  %v1224_v15 = vld [vmem:[%s1182_s24 + $0x70] sm:$0xff]  ;;  %248 = vst.msk [vmem:[#allocation2 + $0x50] sm:$0xff] %vm242_vm0, %v1221_v14  ;;  %249 = vst.msk [vmem:[#allocation2 + $0x60] sm:$0xff] %vm242_vm0, %v1218_v13  ;;  %v234_v17 = vld [vmem:[%s1182_s24] sm:$0xff] }
  0x17   : > { %269 = vrot.lane.b32.xlu0 %v252_v8, %s1126_s28  ;;  %250 = vst.msk [vmem:[#allocation2 + $0x70] sm:$0xff] %vm242_vm0, %v1224_v15  ;;  %243 = vst.msk [vmem:[#allocation2] sm:$0xff] %vm242_vm0, %v234_v17  ;;  %779 = vmatpush1.bf16.msra.mxu0 %v1108_v16  ;;  %v1003_v19 = vld [vmem:[%s1182_s24 + $0x21] sm:$0xff]  ;;  %v1027_v21 = vld [vmem:[%s1182_s24 + $0x31] sm:$0xff] }
  0x18   : > { %1078 = vmatpush1.bf16.msra.mxu1 %v1108_v16  ;;  %780 = vmatprep.subr.bf16.mxu0 %v1124_v1  ;;  %v1011_v23 = vld [vmem:[%s1182_s24 + $0x22] sm:$0xff]  ;;  %v1035_v25 = vld [vmem:[%s1182_s24 + $0x32] sm:$0xff] }
  0x19   : > { %1067 = vmatprep.subr.bf16.mxu1 %v1124_v1  ;;  %v256_v29 = vld [vmem:[%s1182_s24 + $0x51] sm:$0xff]  ;;  %v255_v30 = vld [vmem:[%s1182_s24 + $0x41] sm:$0xff] }
  0x1a   : > { %368 = vrot.lane.b32.xlu1 %v995_v7, %s1127_s7  ;;  %v305_v32 = vld [vmem:[%s1182_s24 + $0x52] sm:$0xff]  ;;  %v304_v33 = vld [vmem:[%s1182_s24 + $0x42] sm:$0xff] }
  0x1b   : > { %366 = vrot.lane.b32.xlu0 %v994_v9, %s1127_s7  ;;  %781 = vmatpush1.bf16.msra.mxu0 %v1109_v18  ;;  %v1007_v34 = vld [vmem:[%s1182_s24 + $0x61] sm:$0xff]  ;;  %v1031_v35 = vld [vmem:[%s1182_s24 + $0x71] sm:$0xff] }
  0x1c   : > { %1079 = vmatpush1.bf16.msra.mxu1 %v1109_v18  ;;  %782 = vmatprep.subr.bf16.mxu0 %v1124_v1  ;;  %v1015_v36 = vld [vmem:[%s1182_s24 + $0x62] sm:$0xff]  ;;  %v1039_v37 = vld [vmem:[%s1182_s24 + $0x72] sm:$0xff] }
  0x1d   : > { %1068 = vmatprep.subr.bf16.mxu1 %v1124_v1  ;;  %v1001_v38 = vld [vmem:[%s1182_s24 + $0x80] sm:$0xff]  ;;  %v1025_v39 = vld [vmem:[%s1182_s24 + $0x90] sm:$0xff] }
  0x1e   : > { %516 = vrot.lane.b32.xlu1 %v1200_v10, %s1128_s10  ;;  %v1009_v40 = vld [vmem:[%s1182_s24 + $0x81] sm:$0xff]  ;;  %v1033_v41 = vld [vmem:[%s1182_s24 + $0x91] sm:$0xff] }
  0x1f   : > { %514 = vrot.lane.b32.xlu0 %v995_v7, %s1128_s10  ;;  %783 = vmatpush1.bf16.msra.mxu0 %v1110_v20  ;;  %v1017_v44 = vld [vmem:[%s1182_s24 + $0x82] sm:$0xff]  ;;  %v1041_v47 = vld [vmem:[%s1182_s24 + $0x92] sm:$0xff]  ;;  %s1061_s24 = sshll.u32 %s1495_s16, 6 }
  0x20   : > { %1080 = vmatpush1.bf16.msra.mxu1 %v1110_v20  ;;  %784 = vmatprep.subr.bf16.mxu0 %v1124_v1  ;;  %s1448_s8 = scalar_lea.vmem %s1492_s3, %s1061_s24 }
  0x21   : > { %1069 = vmatprep.subr.bf16.mxu1 %v1124_v1 }
  0x22   : > { %417 = vrot.lane.b32.xlu1 %v1003_v19, %s1129_s13 }
  0x23   : > { %415 = vrot.lane.b32.xlu0 %v252_v8, %s1129_s13  ;;  %785 = vmatpush1.bf16.msra.mxu0 %v1111_v22 }
  0x24   : > { %1081 = vmatpush1.bf16.msra.mxu1 %v1111_v22  ;;  %786 = vmatprep.subr.bf16.mxu0 %v1124_v1 }
  0x25   : > { %1070 = vmatprep.subr.bf16.mxu1 %v1124_v1 }
  0x26   : > { %574 = vrot.lane.b32.xlu1 %v1027_v21, %s1130_s18 }
  0x27   : > { %572 = vrot.lane.b32.xlu0 %v1003_v19, %s1130_s18  ;;  %787 = vmatpush1.bf16.msra.mxu0 %v1112_v24 }
  0x28   : > { %1082 = vmatpush1.bf16.msra.mxu1 %v1112_v24  ;;  %788 = vmatprep.subr.bf16.mxu0 %v1124_v1 }
  0x29   : > { %1071 = vmatprep.subr.bf16.mxu1 %v1124_v1 }
  0x2a   : > { %466 = vrot.lane.b32.xlu1 %v1011_v23, %s1131_s21 }
  0x2b   : > { %464 = vrot.lane.b32.xlu0 %v1194_v6, %s1131_s21  ;;  %789 = vmatpush1.bf16.msra.mxu0 %v1113_v26 }
  0x2c   : > { %1083 = vmatpush1.bf16.msra.mxu1 %v1113_v26  ;;  %790 = vmatprep.subr.bf16.mxu0 %v1124_v1 }
  0x2d   : > { %1072 = vmatprep.subr.bf16.mxu1 %v1124_v1 }
  0x2e   : > { %623 = vrot.lane.b32.xlu1 %v1035_v25, %s1132_s25 }
  0x2f   : > { %621 = vrot.lane.b32.xlu0 %v1011_v23, %s1132_s25  ;;  %791 = vmatpush1.bf16.msra.mxu0 %v1114_v27 }
  0x30   : > { %1084 = vmatpush1.bf16.msra.mxu1 %v1114_v27  ;;  %792 = vmatprep.subr.bf16.mxu0 %v1124_v1 }
  0x31   : > { %1073 = vmatprep.subr.bf16.mxu1 %v1124_v1 }
  0x32   : > { %273 = vrot.lane.b32.xlu1 %v1027_v21, %s1126_s28 }
  0x33   : > { %271 = vrot.lane.b32.xlu0 %v1003_v19, %s1126_s28  ;;  %793 = vmatpush1.bf16.msra.mxu0 %v768_v31 }
  0x34   : > { %1085 = vmatpush1.bf16.msra.mxu1 %v768_v31 }
  0x36   : > { %277 = vrot.lane.b32.xlu1 %v256_v29, %s1126_s28 }
  0x37   : > { %275 = vrot.lane.b32.xlu0 %v255_v30, %s1126_s28 }
  0x3a   : > { %322 = vrot.lane.b32.xlu1 %v1035_v25, %s1125_s27 }
  0x3b   : > { %320 = vrot.lane.b32.xlu0 %v1011_v23, %s1125_s27 }
  0x3e   : > { %326 = vrot.lane.b32.xlu1 %v305_v32, %s1125_s27 }
  0x3f   : > { %324 = vrot.lane.b32.xlu0 %v304_v33, %s1125_s27 }
  0x42   : > { %372 = vrot.lane.b32.xlu1 %v1215_v12, %s1127_s7 }
  0x43   : > { %370 = vrot.lane.b32.xlu0 %v1200_v10, %s1127_s7 }
  0x46   : > { %376 = vrot.lane.b32.xlu1 %v1218_v13, %s1127_s7 }
  0x47   : > { %374 = vrot.lane.b32.xlu0 %v1221_v14, %s1127_s7 }
  0x4a   : > { %520 = vrot.lane.b32.xlu1 %v1221_v14, %s1128_s10 }
  0x4b   : > { %518 = vrot.lane.b32.xlu0 %v1215_v12, %s1128_s10 }
  0x4e   : > { %524 = vrot.lane.b32.xlu1 %v1224_v15, %s1128_s10 }
  0x4f   : > { %522 = vrot.lane.b32.xlu0 %v1218_v13, %s1128_s10 }
  0x52   : > { %421 = vrot.lane.b32.xlu1 %v255_v30, %s1129_s13 }
  0x53   : > { %419 = vrot.lane.b32.xlu0 %v1027_v21, %s1129_s13 }
  0x56   : > { %425 = vrot.lane.b32.xlu1 %v1007_v34, %s1129_s13 }
  0x57   : > { %423 = vrot.lane.b32.xlu0 %v256_v29, %s1129_s13 }
  0x5a   : > { %578 = vrot.lane.b32.xlu1 %v256_v29, %s1130_s18 }
  0x5b   : > { %576 = vrot.lane.b32.xlu0 %v255_v30, %s1130_s18 }
  0x5e   : > { %582 = vrot.lane.b32.xlu1 %v1031_v35, %s1130_s18 }
  0x5f   : > { %580 = vrot.lane.b32.xlu0 %v1007_v34, %s1130_s18 }
  0x62   : > { %470 = vrot.lane.b32.xlu1 %v304_v33, %s1131_s21 }
  0x63   : > { %468 = vrot.lane.b32.xlu0 %v1035_v25, %s1131_s21 }
  0x66   : > { %474 = vrot.lane.b32.xlu1 %v1015_v36, %s1131_s21 }
  0x67   : > { %472 = vrot.lane.b32.xlu0 %v305_v32, %s1131_s21 }
  0x6a   : > { %627 = vrot.lane.b32.xlu1 %v305_v32, %s1132_s25 }
  0x6b   : > { %625 = vrot.lane.b32.xlu0 %v304_v33, %s1132_s25 }
  0x6e   : > { %631 = vrot.lane.b32.xlu1 %v1039_v37, %s1132_s25 }
  0x6f   : > { %629 = vrot.lane.b32.xlu0 %v1015_v36, %s1132_s25 }
  0x72   : > { %281 = vrot.lane.b32.xlu1 %v1031_v35, %s1126_s28 }
  0x73   : > { %279 = vrot.lane.b32.xlu0 %v1007_v34, %s1126_s28 }
  0x76   : > { %330 = vrot.lane.b32.xlu1 %v1039_v37, %s1125_s27 }
  0x77   : > { %328 = vrot.lane.b32.xlu0 %v1015_v36, %s1125_s27 }
  0x7a   : > { %380 = vrot.lane.b32.xlu1 %v1001_v38, %s1127_s7 }
  0x7b   : > { %378 = vrot.lane.b32.xlu0 %v1224_v15, %s1127_s7 }
  0x7e   : > { %528 = vrot.lane.b32.xlu1 %v1025_v39, %s1128_s10 }
  0x7f   : > { %526 = vrot.lane.b32.xlu0 %v1001_v38, %s1128_s10 }
  0x82   : > { %429 = vrot.lane.b32.xlu1 %v1009_v40, %s1129_s13 }
  0x83   : > { %427 = vrot.lane.b32.xlu0 %v1031_v35, %s1129_s13 }
  0x84   : > { %v317_v42 = vpop.permute.xlu1 %316 }
  0x85   : > { %v268_v43 = vpop.permute.xlu0 %267 }
  0x86   : > { %292 = vst.msk [vmem:[#allocation2] sm:$0xff] %vm291_vm2, %v268_v43  ;;  %586 = vrot.lane.b32.xlu1 %v1033_v41, %s1130_s18 }
  0x87   : > { %584 = vrot.lane.b32.xlu0 %v1009_v40, %s1130_s18  ;;  %341 = vst.msk [vmem:[#allocation2] sm:$0xff] %vm340_vm3, %v317_v42 }
  0x88   : > { %v319_v45 = vpop.permute.xlu1 %318 }
  0x89   : > { %v270_v46 = vpop.permute.xlu0 %269 }
  0x8a   : > { %293 = vst.msk [vmem:[#allocation2 + $0x10] sm:$0xff] %vm291_vm2, %v270_v46  ;;  %478 = vrot.lane.b32.xlu1 %v1017_v44, %s1131_s21 }
  0x8b   : > { %476 = vrot.lane.b32.xlu0 %v1039_v37, %s1131_s21  ;;  %342 = vst.msk [vmem:[#allocation2 + $0x10] sm:$0xff] %vm340_vm3, %v319_v45 }
  0x8c   : > { %v369_v48 = vpop.permute.xlu1 %368 }
  0x8d   : > { %v367_v49 = vpop.permute.xlu0 %366  ;;  %392 = vst.msk [vmem:[#allocation2 + $0x10] sm:$0xff] %vm390_vm4, %v369_v48 }
  0x8e   : > { %391 = vst.msk [vmem:[#allocation2] sm:$0xff] %vm390_vm4, %v367_v49  ;;  %635 = vrot.lane.b32.xlu1 %v1041_v47, %s1132_s25 }
  0x8f   : > { %633 = vrot.lane.b32.xlu0 %v1017_v44, %s1132_s25 }
  0x90   : > { %v517_v50 = vpop.permute.xlu1 %516 }
  0x91   : > { %v515_v51 = vpop.permute.xlu0 %514  ;;  %543 = vst.msk [vmem:[#allocation2 + $0x18] sm:$0xff] %vm540_vm5, %v517_v50 }
  0x92   : > { %541 = vst.msk [vmem:[#allocation2 + $0x8] sm:$0xff] %vm540_vm5, %v515_v51 }
  0x94   : > { %v418_v52 = vpop.permute.xlu1 %417 }
  0x95   : > { %v416_v53 = vpop.permute.xlu0 %415  ;;  %441 = vst.msk [vmem:[#allocation2 + $0x10] sm:$0xff] %vm439_vm6, %v418_v52 }
  0x96   : > { %440 = vst.msk [vmem:[#allocation2] sm:$0xff] %vm439_vm6, %v416_v53 }
  0x98   : > { %v575_v54 = vpop.permute.xlu1 %574 }
  0x99   : > { %v573_v55 = vpop.permute.xlu0 %572  ;;  %598 = vst.msk [vmem:[#allocation2 + $0x18] sm:$0xff] %vm596_vm7, %v575_v54 }
  0x9a   : > { %597 = vst.msk [vmem:[#allocation2 + $0x8] sm:$0xff] %vm596_vm7, %v573_v55 }
  0x9c   : > { %v467_v56 = vpop.permute.xlu1 %466 }
  0x9d   : > { %v465_v57 = vpop.permute.xlu0 %464  ;;  %490 = vst.msk [vmem:[#allocation2 + $0x10] sm:$0xff] %vm488_vm8, %v467_v56 }
  0x9e   : > { %489 = vst.msk [vmem:[#allocation2] sm:$0xff] %vm488_vm8, %v465_v57 }
  0x9f   : > { %542 = vst.msk [vmem:[#allocation2 + $0x10] sm:$0xff] %vm538_vm9, %v517_v50  ;;  %539 = vst.msk [vmem:[#allocation2] sm:$0xff] %vm538_vm9, %v515_v51 }
  0xa0   : > { %v624_v58 = vpop.permute.xlu1 %623 }
  0xa1   : > { %v622_v59 = vpop.permute.xlu0 %621  ;;  %647 = vst.msk [vmem:[#allocation2 + $0x18] sm:$0xff] %vm645_vm10, %v624_v58 }
  0xa2   : > { %646 = vst.msk [vmem:[#allocation2 + $0x8] sm:$0xff] %vm645_vm10, %v622_v59 }
  0xa4   : > { %v274_v60 = vpop.permute.xlu1 %273 }
  0xa5   : > { %v272_v61 = vpop.permute.xlu0 %271  ;;  %295 = vst.msk [vmem:[#allocation2 + $0x30] sm:$0xff] %vm291_vm2, %v274_v60 }
  0xa6   : > { %294 = vst.msk [vmem:[#allocation2 + $0x20] sm:$0xff] %vm291_vm2, %v272_v61  ;;  %v654_v62 = vld [vmem:[#allocation2] sm:$0xff]  ;;  %v656_v63 = vld [vmem:[#allocation2 + $0x10] sm:$0xff] }
  0xa7   : > { %v670_v5 = vpack.c.bf16 %v656_v63, %v654_v62 }
  0xa8   : > { %v278_v0 = vpop.permute.xlu1 %277  ;;  %v657_v3 = vld [vmem:[#allocation2 + $0x18] sm:$0xff] }
  0xa9   : > { %v276_v1 = vpop.permute.xlu0 %275  ;;  %v655_v2 = vld [vmem:[#allocation2 + $0x8] sm:$0xff]  ;;  %297 = vst.msk [vmem:[#allocation2 + $0x50] sm:$0xff] %vm291_vm2, %v278_v0 }
  0xaa   : > { %296 = vst.msk [vmem:[#allocation2 + $0x40] sm:$0xff] %vm291_vm2, %v276_v1  ;;  %v671_v4 = vpack.c.bf16 %v657_v3, %v655_v2 }
  0xac   : > { %1055 = vmatprep.mubr.msk.bf16.mxu0 %vm753_vm11, %v671_v4  ;;  %v323_v6 = vpop.permute.xlu1 %322  ;;  %v1042_v4 = vld [vmem:[%s1491_s2] ss:$0 sm:$0xff] }
  0xad   : > { %v321_v7 = vpop.permute.xlu0 %320  ;;  %803 = vmatmul.mubr.bf16.vlgmr.msra.gmra.mrb[0].mxu0 %v670_v5  ;;  %344 = vst.msk [vmem:[#allocation2 + $0x30] sm:$0xff] %vm340_vm3, %v323_v6 }
  0xae   : > { %343 = vst.msk [vmem:[#allocation2 + $0x20] sm:$0xff] %vm340_vm3, %v321_v7 }
  0xb0   : > { %v327_v8 = vpop.permute.xlu1 %326 }
  0xb1   : > { %v325_v9 = vpop.permute.xlu0 %324  ;;  %346 = vst.msk [vmem:[#allocation2 + $0x50] sm:$0xff] %vm340_vm3, %v327_v8 }
  0xb2   : > { %345 = vst.msk [vmem:[#allocation2 + $0x40] sm:$0xff] %vm340_vm3, %v325_v9 }
  0xb4   : > { %v373_v10 = vpop.permute.xlu1 %372 }
  0xb5   : > { %v371_v11 = vpop.permute.xlu0 %370  ;;  %394 = vst.msk [vmem:[#allocation2 + $0x30] sm:$0xff] %vm390_vm4, %v373_v10 }
  0xb6   : > { %393 = vst.msk [vmem:[#allocation2 + $0x20] sm:$0xff] %vm390_vm4, %v371_v11 }
  0xb8   : > { %v377_v12 = vpop.permute.xlu1 %376 }
  0xb9   : > { %v375_v13 = vpop.permute.xlu0 %374  ;;  %396 = vst.msk [vmem:[#allocation2 + $0x50] sm:$0xff] %vm390_vm4, %v377_v12 }
  0xba   : > { %395 = vst.msk [vmem:[#allocation2 + $0x40] sm:$0xff] %vm390_vm4, %v375_v13 }
  0xbc   : > { %v521_v14 = vpop.permute.xlu1 %520 }
  0xbd   : > { %v519_v15 = vpop.permute.xlu0 %518  ;;  %547 = vst.msk [vmem:[#allocation2 + $0x38] sm:$0xff] %vm540_vm5, %v521_v14 }
  0xbe   : > { %545 = vst.msk [vmem:[#allocation2 + $0x28] sm:$0xff] %vm540_vm5, %v519_v15 }
  0xc0   : > { %v525_v16 = vpop.permute.xlu1 %524 }
  0xc1   : > { %v523_v17 = vpop.permute.xlu0 %522  ;;  %551 = vst.msk [vmem:[#allocation2 + $0x58] sm:$0xff] %vm540_vm5, %v525_v16 }
  0xc2   : > { %549 = vst.msk [vmem:[#allocation2 + $0x48] sm:$0xff] %vm540_vm5, %v523_v17 }
  0xc4   : > { %v422_v18 = vpop.permute.xlu1 %421 }
  0xc5   : > { %v420_v19 = vpop.permute.xlu0 %419  ;;  %443 = vst.msk [vmem:[#allocation2 + $0x30] sm:$0xff] %vm439_vm6, %v422_v18 }
  0xc6   : > { %442 = vst.msk [vmem:[#allocation2 + $0x20] sm:$0xff] %vm439_vm6, %v420_v19 }
  0xc8   : > { %v426_v20 = vpop.permute.xlu1 %425 }
  0xc9   : > { %v424_v21 = vpop.permute.xlu0 %423  ;;  %445 = vst.msk [vmem:[#allocation2 + $0x50] sm:$0xff] %vm439_vm6, %v426_v20 }
  0xca   : > { %444 = vst.msk [vmem:[#allocation2 + $0x40] sm:$0xff] %vm439_vm6, %v424_v21 }
  0xcc   : > { %v579_v22 = vpop.permute.xlu1 %578 }
  0xcd   : > { %v577_v23 = vpop.permute.xlu0 %576  ;;  %600 = vst.msk [vmem:[#allocation2 + $0x38] sm:$0xff] %vm596_vm7, %v579_v22 }
  0xce   : > { %599 = vst.msk [vmem:[#allocation2 + $0x28] sm:$0xff] %vm596_vm7, %v577_v23 }
  0xd0   : > { %v583_v24 = vpop.permute.xlu1 %582 }
  0xd1   : > { %v581_v25 = vpop.permute.xlu0 %580  ;;  %602 = vst.msk [vmem:[#allocation2 + $0x58] sm:$0xff] %vm596_vm7, %v583_v24 }
  0xd2   : > { %601 = vst.msk [vmem:[#allocation2 + $0x48] sm:$0xff] %vm596_vm7, %v581_v25 }
  0xd4   : > { %v471_v26 = vpop.permute.xlu1 %470 }
  0xd5   : > { %v469_v27 = vpop.permute.xlu0 %468  ;;  %492 = vst.msk [vmem:[#allocation2 + $0x30] sm:$0xff] %vm488_vm8, %v471_v26 }
  0xd6   : > { %491 = vst.msk [vmem:[#allocation2 + $0x20] sm:$0xff] %vm488_vm8, %v469_v27 }
  0xd7   : > { %546 = vst.msk [vmem:[#allocation2 + $0x30] sm:$0xff] %vm538_vm9, %v521_v14  ;;  %544 = vst.msk [vmem:[#allocation2 + $0x20] sm:$0xff] %vm538_vm9, %v519_v15 }
  0xd8   : > { %v475_v28 = vpop.permute.xlu1 %474 }
  0xd9   : > { %v473_v29 = vpop.permute.xlu0 %472  ;;  %494 = vst.msk [vmem:[#allocation2 + $0x50] sm:$0xff] %vm488_vm8, %v475_v28 }
  0xda   : > { %493 = vst.msk [vmem:[#allocation2 + $0x40] sm:$0xff] %vm488_vm8, %v473_v29 }
  0xdb   : > { %550 = vst.msk [vmem:[#allocation2 + $0x50] sm:$0xff] %vm538_vm9, %v525_v16  ;;  %548 = vst.msk [vmem:[#allocation2 + $0x40] sm:$0xff] %vm538_vm9, %v523_v17 }
  0xdc   : > { %v628_v30 = vpop.permute.xlu1 %627 }
  0xdd   : > { %v626_v31 = vpop.permute.xlu0 %625  ;;  %649 = vst.msk [vmem:[#allocation2 + $0x38] sm:$0xff] %vm645_vm10, %v628_v30 }
  0xde   : > { %648 = vst.msk [vmem:[#allocation2 + $0x28] sm:$0xff] %vm645_vm10, %v626_v31  ;;  %v658_v34 = vld [vmem:[#allocation2 + $0x20] sm:$0xff]  ;;  %v660_v35 = vld [vmem:[#allocation2 + $0x30] sm:$0xff] }
  0xdf   : > { %v672_v41 = vpack.c.bf16 %v660_v35, %v658_v34 }
  0xe0   : > { %v632_v32 = vpop.permute.xlu1 %631 }
  0xe1   : > { %v630_v33 = vpop.permute.xlu0 %629  ;;  %651 = vst.msk [vmem:[#allocation2 + $0x58] sm:$0xff] %vm645_vm10, %v632_v32 }
  0xe2   : > { %650 = vst.msk [vmem:[#allocation2 + $0x48] sm:$0xff] %vm645_vm10, %v630_v33  ;;  %v662_v42 = vld [vmem:[#allocation2 + $0x40] sm:$0xff]  ;;  %v664_v43 = vld [vmem:[#allocation2 + $0x50] sm:$0xff] }
  0xe3   : > { %v674_v49 = vpack.c.bf16 %v664_v43, %v662_v42 }
  0xe4   : > { %v282_v36 = vpop.permute.xlu1 %281  ;;  %v661_v39 = vld [vmem:[#allocation2 + $0x38] sm:$0xff] }
  0xe5   : > { %v280_v37 = vpop.permute.xlu0 %279  ;;  %v659_v38 = vld [vmem:[#allocation2 + $0x28] sm:$0xff]  ;;  %299 = vst.msk [vmem:[#allocation2 + $0x70] sm:$0xff] %vm291_vm2, %v282_v36 }
  0xe6   : > { %298 = vst.msk [vmem:[#allocation2 + $0x60] sm:$0xff] %vm291_vm2, %v280_v37  ;;  %v673_v40 = vpack.c.bf16 %v661_v39, %v659_v38 }
  0xe8   : > { %1056 = vmatprep.mubr.msk.bf16.mxu0 %vm753_vm11, %v673_v40  ;;  %v331_v44 = vpop.permute.xlu1 %330  ;;  %v665_v47 = vld [vmem:[#allocation2 + $0x58] sm:$0xff] }
  0xe9   : > { %v329_v45 = vpop.permute.xlu0 %328  ;;  %811 = vmatmul.mubr.bf16.gmra.mrb[4].mxu0 %v672_v41  ;;  %v663_v46 = vld [vmem:[#allocation2 + $0x48] sm:$0xff]  ;;  %348 = vst.msk [vmem:[#allocation2 + $0x70] sm:$0xff] %vm340_vm3, %v331_v44 }
  0xea   : > { %347 = vst.msk [vmem:[#allocation2 + $0x60] sm:$0xff] %vm340_vm3, %v329_v45  ;;  %v675_v48 = vpack.c.bf16 %v665_v47, %v663_v46 }
  0xec   : > { %1057 = vmatprep.mubr.msk.bf16.mxu1 %vm753_vm11, %v675_v48  ;;  %v381_v50 = vpop.permute.xlu1 %380 }
  0xed   : > { %v379_v51 = vpop.permute.xlu0 %378  ;;  %819 = vmatmul.mubr.bf16.vlgmr.msra.gmra.mrb[0].mxu1 %v674_v49  ;;  %398 = vst.msk [vmem:[#allocation2 + $0x70] sm:$0xff] %vm390_vm4, %v381_v50 }
  0xee   : > { %397 = vst.msk [vmem:[#allocation2 + $0x60] sm:$0xff] %vm390_vm4, %v379_v51 }
  0xf0   : > { %v529_v52 = vpop.permute.xlu1 %528 }
  0xf1   : > { %v527_v53 = vpop.permute.xlu0 %526  ;;  %555 = vst.msk [vmem:[#allocation2 + $0x78] sm:$0xff] %vm540_vm5, %v529_v52 }
  0xf2   : > { %553 = vst.msk [vmem:[#allocation2 + $0x68] sm:$0xff] %vm540_vm5, %v527_v53 }
  0xf4   : > { %v430_v54 = vpop.permute.xlu1 %429 }
  0xf5   : > { %v428_v55 = vpop.permute.xlu0 %427  ;;  %447 = vst.msk [vmem:[#allocation2 + $0x70] sm:$0xff] %vm439_vm6, %v430_v54 }
  0xf6   : > { %446 = vst.msk [vmem:[#allocation2 + $0x60] sm:$0xff] %vm439_vm6, %v428_v55 }
  0xf8   : > { %v587_v56 = vpop.permute.xlu1 %586 }
  0xf9   : > { %v585_v57 = vpop.permute.xlu0 %584  ;;  %604 = vst.msk [vmem:[#allocation2 + $0x78] sm:$0xff] %vm596_vm7, %v587_v56 }
  0xfa   : > { %603 = vst.msk [vmem:[#allocation2 + $0x68] sm:$0xff] %vm596_vm7, %v585_v57 }
  0xfc   : > { %v479_v58 = vpop.permute.xlu1 %478 }
  0xfd   : > { %v477_v59 = vpop.permute.xlu0 %476  ;;  %496 = vst.msk [vmem:[#allocation2 + $0x70] sm:$0xff] %vm488_vm8, %v479_v58 }
  0xfe   : > { %495 = vst.msk [vmem:[#allocation2 + $0x60] sm:$0xff] %vm488_vm8, %v477_v59 }
  0xff   : > { %554 = vst.msk [vmem:[#allocation2 + $0x70] sm:$0xff] %vm538_vm9, %v529_v52  ;;  %552 = vst.msk [vmem:[#allocation2 + $0x60] sm:$0xff] %vm538_vm9, %v527_v53 }
 0x100   : > { %v636_v60 = vpop.permute.xlu1 %635 }
 0x101   : > { %v634_v61 = vpop.permute.xlu0 %633  ;;  %653 = vst.msk [vmem:[#allocation2 + $0x78] sm:$0xff] %vm645_vm10, %v636_v60 }
 0x102   : > { %652 = vst.msk [vmem:[#allocation2 + $0x68] sm:$0xff] %vm645_vm10, %v634_v61 }
 0x106   : > { %v666_v62 = vld [vmem:[#allocation2 + $0x60] sm:$0xff]  ;;  %v668_v63 = vld [vmem:[#allocation2 + $0x70] sm:$0xff] }
 0x107   : > { %v676_v3 = vpack.c.bf16 %v668_v63, %v666_v62 }
 0x108   : > { %v669_v1 = vld [vmem:[#allocation2 + $0x78] sm:$0xff] }
 0x109   : > { %v667_v0 = vld [vmem:[#allocation2 + $0x68] sm:$0xff] }
 0x10a   : > { %v677_v2 = vpack.c.bf16 %v669_v1, %v667_v0 }
 0x10c   : > { %1058 = vmatprep.mubr.msk.bf16.mxu1 %vm753_vm11, %v677_v2 }
 0x10d   : > { %827 = vmatmul.mubr.bf16.gmra.mrb[4].mxu1 %v676_v3 }
 0x180   : > { %v804_v5 = vpop.f32.mrb[0].mxu0 }
 0x181   : > { %v805_v6 = vadd.f32 %v1042_v4, %v804_v5  ;;  %v806_v7 = vpop.f32.mrb[1].mxu0 }
 0x182   : > { %v807_v8 = vpop.f32.mrb[2].mxu0 }
 0x183   : > { %v858_v9 = vmul.f32 %v805_v6, %v805_v6  ;;  %888 = vst.msk [vmem:[%s1448_s8] sm:$0xff] %vm835_vm12, %v805_v6  ;;  %v808_v10 = vadd.f32 %v1042_v4, %v807_v8  ;;  %v809_v11 = vpop.f32.mrb[3].mxu0  ;;  %v836_v12 = vsel %vm835_vm12, %v805_v6, 0.0 }
 0x185   : > { %v837_v13 = vsel %vm835_vm12, %v808_v10, 0.0  ;;  %v859_v14 = vmul.f32 %v808_v10, %v808_v10  ;;  %889 = vst.msk [vmem:[%s1448_s8 + $0x8] sm:$0xff] %vm835_vm12, %v808_v10  ;;  %v866_v16 = vsel %vm835_vm12, %v858_v9, 0.0 }
 0x186   : > { %v838_v15 = vadd.f32 %v837_v13, %v836_v12 }
 0x187   : > { %v867_v17 = vsel %vm835_vm12, %v859_v14, 0.0 }
 0x188   : > { %v868_v18 = vadd.f32 %v867_v17, %v866_v16 }
 0x1bc   : > { %v812_v19 = vpop.f32.mrb[4].mxu0 }
 0x1bd   : > { %v813_v20 = vadd.f32 %v1042_v4, %v812_v19  ;;  %v814_v21 = vpop.f32.mrb[5].mxu0 }
 0x1be   : > { %v815_v22 = vpop.f32.mrb[6].mxu0 }
 0x1bf   : > { %v839_v23 = vsel %vm835_vm12, %v813_v20, 0.0  ;;  %v860_v24 = vmul.f32 %v813_v20, %v813_v20  ;;  %890 = vst.msk [vmem:[%s1448_s8 + $0x10] sm:$0xff] %vm835_vm12, %v813_v20  ;;  %v816_v25 = vadd.f32 %v1042_v4, %v815_v22  ;;  %v817_v26 = vpop.f32.mrb[7].mxu0 }
 0x1c0   : > { %v840_v27 = vadd.f32 %v839_v23, %v838_v15  ;;  %v820_v28 = vpop.f32.mrb[0].mxu1 }
 0x1c1   : > { %v869_v29 = vsel %vm835_vm12, %v860_v24, 0.0  ;;  %v841_v30 = vsel %vm835_vm12, %v816_v25, 0.0  ;;  %v861_v31 = vmul.f32 %v816_v25, %v816_v25  ;;  %891 = vst.msk [vmem:[%s1448_s8 + $0x18] sm:$0xff] %vm835_vm12, %v816_v25  ;;  %v821_v32 = vadd.f32 %v1042_v4, %v820_v28  ;;  %v822_v33 = vpop.f32.mrb[1].mxu1 }
 0x1c2   : > { %v870_v34 = vadd.f32 %v869_v29, %v868_v18  ;;  %v842_v35 = vadd.f32 %v841_v30, %v840_v27  ;;  %v823_v36 = vpop.f32.mrb[2].mxu1 }
 0x1c3   : > { %v871_v37 = vsel %vm835_vm12, %v861_v31, 0.0  ;;  %v843_v38 = vsel %vm835_vm12, %v821_v32, 0.0  ;;  %v862_v39 = vmul.f32 %v821_v32, %v821_v32  ;;  %892 = vst.msk [vmem:[%s1448_s8 + $0x20] sm:$0xff] %vm835_vm12, %v821_v32  ;;  %v824_v40 = vadd.f32 %v1042_v4, %v823_v36  ;;  %v825_v41 = vpop.f32.mrb[3].mxu1 }
 0x1c4   : > { %v872_v42 = vadd.f32 %v871_v37, %v870_v34  ;;  %v844_v43 = vadd.f32 %v843_v38, %v842_v35 }
 0x1c5   : > { %v873_v44 = vsel %vm835_vm12, %v862_v39, 0.0  ;;  %v845_v45 = vsel %vm835_vm12, %v824_v40, 0.0  ;;  %v863_v46 = vmul.f32 %v824_v40, %v824_v40  ;;  %893 = vst.msk [vmem:[%s1448_s8 + $0x28] sm:$0xff] %vm835_vm12, %v824_v40 }
 0x1c6   : > { %v874_v47 = vadd.f32 %v873_v44, %v872_v42  ;;  %v846_v48 = vadd.f32 %v845_v45, %v844_v43 }
 0x1c7   : > { %v875_v49 = vsel %vm835_vm12, %v863_v46, 0.0 }
 0x1c8   : > { %v876_v50 = vadd.f32 %v875_v49, %v874_v47 }
 0x1e0   : > { %v828_v51 = vpop.f32.mrb[4].mxu1 }
 0x1e1   : > { %v829_v52 = vadd.f32 %v1042_v4, %v828_v51  ;;  %v830_v53 = vpop.f32.mrb[5].mxu1 }
 0x1e2   : > { %v831_v54 = vpop.f32.mrb[6].mxu1 }
 0x1e3   : > { %v847_v55 = vsel %vm835_vm12, %v829_v52, 0.0  ;;  %v864_v56 = vmul.f32 %v829_v52, %v829_v52  ;;  %894 = vst.msk [vmem:[%s1448_s8 + $0x30] sm:$0xff] %vm835_vm12, %v829_v52  ;;  %v832_v57 = vadd.f32 %v1042_v4, %v831_v54  ;;  %v833_v58 = vpop.f32.mrb[7].mxu1 }
 0x1e4   : > { %v848_v59 = vadd.f32 %v847_v55, %v846_v48 }
 0x1e5   : > { %v877_v60 = vsel %vm835_vm12, %v864_v56, 0.0  ;;  %v849_v61 = vsel %vm835_vm12, %v832_v57, 0.0  ;;  %v865_v62 = vmul.f32 %v832_v57, %v832_v57  ;;  %895 = vst.msk [vmem:[%s1448_s8 + $0x38] sm:$0xff] %vm835_vm12, %v832_v57 }
 0x1e6   : > { %v878_v63 = vadd.f32 %v877_v60, %v876_v50  ;;  %v850_v0 = vadd.f32 %v849_v61, %v848_v59 }
 0x1e7   : > { %v879_v1 = vsel %vm835_vm12, %v865_v62, 0.0 }
 0x1e8   : > { %v851_v2 = vrot.slane %v850_v0, 4  ;;  %v880_v3 = vadd.f32 %v879_v1, %v878_v63 }
 0x1ea   : > { %v852_v5 = vadd.f32 %v851_v2, %v850_v0  ;;  %v881_v6 = vrot.slane %v880_v3, 4 }
 0x1ec   : > { %v853_v7 = vrot.slane %v852_v5, 2  ;;  %v882_v4 = vadd.f32 %v881_v6, %v880_v3 }
 0x1ee   : > { %v854_v8 = vadd.f32 %v853_v7, %v852_v5  ;;  %v883_v9 = vrot.slane %v882_v4, 2 }
 0x1f0   : > { %v855_v10 = vrot.slane %v854_v8, 1  ;;  %v884_v11 = vadd.f32 %v883_v9, %v882_v4 }
 0x1f2   : > { %v856_v12 = vadd.f32 %v855_v10, %v854_v8  ;;  %v885_v13 = vrot.slane %v884_v11, 1 }
 0x1f4   : > { %v886_v14 = vadd.f32 %v885_v13, %v884_v11  ;;  %897 = vst.msk [vmem:[%s208_s12] sm:$0x1] %vm896_vm13, %v856_v12 }
 0x1f6   : > { %898 = vst.msk [vmem:[%s208_s12 + $0x1] sm:$0x1] %vm896_vm13, %v886_v14 }
 0x1f7 PF: > { %s15_s15 = sadd.s32 1, %s1122_s15  }
 0x1f8   : > { %p12_p4 = scmp.ge.s32.totalorder %s15_s15, 4  }
 0x1fa   :  { %14 = sbr.rel (!%p12_p4) target bundleno = 1 (0x1), region = 76 }

// kernel: genet_gray_forward.22
= control target key start
LH: loop header
LB: loop body
LE: loop exit
PB: predicated region body
PF: predicated region fallthrough
CT: control target
= control target key end

     0   :  { %s600_s18 = smov 0   ;;  %s602_s19 = smov 0   ;;  %s661_s0 = inlined_call_operand.vmem [shape: f32[2,8,8,32], index: 0, kind: input, shape index: {}]   ;;  %s662_s1 = inlined_call_operand.vmem [shape: f32[2,2,32], index: 1, kind: input, shape index: {}]   ;;  %s663_s2 = inlined_call_operand.vmem [shape: f32[1,32], index: 2, kind: input, shape index: {}]   ;;  %s664_s3 = inlined_call_operand.vmem [shape: f32[1,32], index: 3, kind: input, shape index: {}]   ;;  %s665_s4 = inlined_call_operand.vmem [shape: f32[2,8,8,32], index: 4, kind: input, shape index: {}]   ;;  %s666_s5 = inlined_call_operand.vmem [shape: f32[2,8,8,32], index: 5, kind: output, shape index: {}]  }
   0x1   :  { %s604_s20 = smov 0  }
   0x2 LB: > { %s27_s21 = sadd.s32 1, %s563_s19  ;;  %p506_p0 = scmp.ge.s32.totalorder %s567_s20, 1  ;;  %s567_s20 = sphi %s604_s20, %s15_s20   ;;  %s563_s19 = sphi %s602_s19, %s668_s19   ;;  %s559_s18 = sphi %s600_s18, %s667_s18  }
   0x3   : > { %p29_p1 = scmp.ge.s32.totalorder %s27_s21, 2  ;;  %p225_p2 = scmp.lt.s32.totalorder %s567_s20, 3 }
   0x5   : > { %s670_s21 = smov (%p29_p1, %s27_s21), 0  ;;  %p226_p3 = pnand %p506_p0, %p225_p2 }
   0x6   : > { %v300_v0 = vld [vmem:[%s662_s1] sm:$0x3] (!%p226_p3)  ;;  %v301_v1 = vld [vmem:[%s662_s1 + $0x2] sm:$0x3] (!%p226_p3)  ;;  %vm302_vm0 = vcmask (!%p226_p3), 254976   ;;  %v319_v12 = vlaneseq (!%p226_p3)  ;;  %p271_p4 = scmp.lt.s32.totalorder (!%p226_p3), %s559_s18, 1 }
   0x7   : > { %229 = sbr.rel (%p226_p3) target bundleno = 53 (0x35), region = 40  ;;  %v303_v2 = vsel (!%p226_p3), %vm302_vm0, %v300_v0, 0.0  ;;  %v304_v3 = vsel (!%p226_p3), %vm302_vm0, %v301_v1, 0.0  ;;  %v569_v10 = vmov (!%p226_p3), 1966171168   ;;  %vm388_vm1 = vcmask (!%p226_p3), 261120  }
   0x8   : > { %v305_v4 = vadd.f32 (!%p226_p3), %v304_v3, %v303_v2  ;;  %v317_v11 = vunpack.c.l.s4 (!%p226_p3), %v569_v10  ;;  %v320_v14 = vshrl.u32 (!%p226_p3), %v319_v12, 7  ;;  %v312_v19 = vld [vmem:[%s663_s2] sm:$0x1] (!%p226_p3) }
   0x9   : > { %v333_v23 = vld [vmem:[%s664_s3] sm:$0x1] (!%p226_p3) }
   0xa   : > { %v306_v5 = vmul.f32 (!%p226_p3), 0.0078125, %v305_v4  ;;  %v318_v13 = vunpack.c.0.s8 (!%p226_p3), %v317_v11  ;;  %v347_v21 = vsub.s32 (!%p226_p3), 0, %v320_v14 }
   0xc   : > { %v307_v6 = vmul.f32 (!%p226_p3), %v306_v5, %v306_v5  ;;  %v321_v15 = vsub.s32 (!%p226_p3), %v318_v13, %v320_v14 }
   0xe   : > { %v309_v7 = vrot.slane %v307_v6, 7  ;;  %s672_s18 = smov (!%p271_p4, %s559_s18), 1 }
   0xf   : > { %s624_s26 = sshll.u32 %s672_s18, 6 }
  0x10   : > { %v311_v8 = vsub.f32 %v306_v5, %v309_v7  ;;  %s278_s29 = scalar_lea.vmem %s661_s0, %s624_s26  ;;  %s288_s11 = scalar_lea.vmem %s665_s4, %s624_s26 }
  0x11   : > { %v336_v24 = vld [vmem:[%s278_s29] sm:$0xff]  ;;  %v337_v25 = vld [vmem:[%s278_s29 + $0x8] sm:$0xff]  ;;  %v338_v26 = vld [vmem:[%s278_s29 + $0x10] sm:$0xff]  ;;  %s298_s14 = scalar_lea.vmem %s666_s5, %s624_s26 }
  0x12   : > { %v313_v9 = vadd.f32 1e-05, %v311_v8  ;;  %v339_v27 = vld [vmem:[%s278_s29 + $0x18] sm:$0xff]  ;;  %v340_v30 = vld [vmem:[%s278_s29 + $0x20] sm:$0xff]  ;;  %v341_v31 = vld [vmem:[%s278_s29 + $0x28] sm:$0xff] }
  0x13   : > { %v342_v32 = vld [vmem:[%s278_s29 + $0x30] sm:$0xff]  ;;  %v343_v33 = vld [vmem:[%s278_s29 + $0x38] sm:$0xff]  ;;  %v372_v43 = vld [vmem:[%s288_s11] sm:$0xff] }
  0x14   : > { %543 = vrsqrt.f32 %v313_v9  ;;  %v373_v44 = vld [vmem:[%s288_s11 + $0x8] sm:$0xff]  ;;  %v374_v46 = vld [vmem:[%s288_s11 + $0x10] sm:$0xff]  ;;  %v375_v47 = vld [vmem:[%s288_s11 + $0x18] sm:$0xff] }
  0x15   : > { %v376_v48 = vld [vmem:[%s288_s11 + $0x20] sm:$0xff]  ;;  %v377_v53 = vld [vmem:[%s288_s11 + $0x28] sm:$0xff]  ;;  %v378_v54 = vld [vmem:[%s288_s11 + $0x30] sm:$0xff] }
  0x16   : > { %v379_v55 = vld [vmem:[%s288_s11 + $0x38] sm:$0xff] }
  0x1e   : > { %v544_v16 = vpop.eup %543 }
  0x1f   : > { %v322_v17 = vrot.slane %v544_v16, %v321_v15 }
  0x21   : > { %v323_v18 = vcombine.high %v322_v17, %v322_v17 }
  0x23   : > { %v330_v20 = vrot.slane %v323_v18, %v321_v15 }
  0x25   : > { %v332_v22 = vmul.f32 %v330_v20, %v312_v19 }
  0x27   : > { %v334_v28 = vmul.f32 %v332_v22, %v306_v5  ;;  %v348_v29 = vrot.slane %v332_v22, %v347_v21 }
  0x29   : > { %v335_v34 = vsub.f32 %v333_v23, %v334_v28  ;;  %v350_v35 = vmul.f32 %v348_v29, %v336_v24  ;;  %v351_v36 = vmul.f32 %v348_v29, %v337_v25  ;;  %v352_v37 = vmul.f32 %v348_v29, %v338_v26 }
  0x2a   : > { %v353_v38 = vmul.f32 %v348_v29, %v339_v27  ;;  %v354_v39 = vmul.f32 %v348_v29, %v340_v30  ;;  %v355_v40 = vmul.f32 %v348_v29, %v341_v31  ;;  %v356_v41 = vmul.f32 %v348_v29, %v342_v32 }
  0x2b   : > { %v362_v42 = vrot.slane %v335_v34, %v347_v21  ;;  %v357_v45 = vmul.f32 %v348_v29, %v343_v33 }
  0x2d   : > { %v364_v49 = vadd.f32 %v362_v42, %v350_v35  ;;  %v365_v50 = vadd.f32 %v362_v42, %v351_v36  ;;  %v366_v51 = vadd.f32 %v362_v42, %v352_v37  ;;  %v367_v52 = vadd.f32 %v362_v42, %v353_v38 }
  0x2e   : > { %v368_v56 = vadd.f32 %v362_v42, %v354_v39  ;;  %v369_v57 = vadd.f32 %v362_v42, %v355_v40  ;;  %v370_v58 = vadd.f32 %v362_v42, %v356_v41  ;;  %v371_v59 = vadd.f32 %v362_v42, %v357_v45 }
  0x2f   : > { %v380_v60 = vadd.f32 %v372_v43, %v364_v49  ;;  %v381_v61 = vadd.f32 %v373_v44, %v365_v50  ;;  %v382_v62 = vadd.f32 %v374_v46, %v366_v51  ;;  %v383_v63 = vadd.f32 %v375_v47, %v367_v52 }
  0x30   : > { %v384_v0 = vadd.f32 %v376_v48, %v368_v56  ;;  %v385_v1 = vadd.f32 %v377_v53, %v369_v57  ;;  %v386_v2 = vadd.f32 %v378_v54, %v370_v58  ;;  %v387_v3 = vadd.f32 %v379_v55, %v371_v59 }
  0x31   : > { %389 = vst.msk [vmem:[%s298_s14] sm:$0xff] %vm388_vm1, %v380_v60  ;;  %390 = vst.msk [vmem:[%s298_s14 + $0x8] sm:$0xff] %vm388_vm1, %v381_v61 }
  0x32   : > { %391 = vst.msk [vmem:[%s298_s14 + $0x10] sm:$0xff] %vm388_vm1, %v382_v62  ;;  %392 = vst.msk [vmem:[%s298_s14 + $0x18] sm:$0xff] %vm388_vm1, %v383_v63 }
  0x33   : > { %393 = vst.msk [vmem:[%s298_s14 + $0x20] sm:$0xff] %vm388_vm1, %v384_v0  ;;  %394 = vst.msk [vmem:[%s298_s14 + $0x28] sm:$0xff] %vm388_vm1, %v385_v1 }
  0x34   : > { %395 = vst.msk [vmem:[%s298_s14 + $0x30] sm:$0xff] %vm388_vm1, %v386_v2  ;;  %396 = vst.msk [vmem:[%s298_s14 + $0x38] sm:$0xff] %vm388_vm1, %v387_v3 }
  0x35 PF: > { %s15_s20 = sadd.s32 1, %s567_s20   ;;  %s667_s18 = smov %s563_s19 }
  0x36   : > { %p12_p5 = scmp.ge.s32.totalorder %s15_s20, 4   ;;  %s668_s19 = smov %s670_s21 }
  0x38   :  { %14 = sbr.rel (!%p12_p5) target bundleno = 2 (0x2), region = 73 }

// kernel: genet_gray_forward.26
= control target key start
LH: loop header
LB: loop body
LE: loop exit
PB: predicated region body
PF: predicated region fallthrough
CT: control target
= control target key end

     0   :  { %s705_s21 = smov 0   ;;  %s707_s22 = smov 0   ;;  %s780_s0 = inlined_call_operand.vmem [shape: f32[2,8,8,32], index: 0, kind: input, shape index: {}]   ;;  %s781_s1 = inlined_call_operand.vmem [shape: f32[2,2,32], index: 1, kind: input, shape index: {}]   ;;  %s782_s2 = inlined_call_operand.vmem [shape: f32[1,32], index: 2, kind: input, shape index: {}]   ;;  %s783_s3 = inlined_call_operand.vmem [shape: f32[1,32], index: 3, kind: input, shape index: {}]   ;;  %s784_s4 = inlined_call_operand.vmem [shape: f32[2,8,8,32], index: 4, kind: input, shape index: {}]   ;;  %s785_s5 = inlined_call_operand.vmem [shape: f32[2,8,8,32], index: 5, kind: input, shape index: {}]   ;;  %s786_s6 = inlined_call_operand.vmem [shape: f32[2,8,8,32], index: 6, kind: output, shape index: {}]  }
   0x1   :  { %s709_s23 = smov 0  }
   0x2 LB: > { %s28_s24 = sadd.s32 1, %s663_s22  ;;  %p603_p0 = scmp.ge.s32.totalorder %s667_s23, 1  ;;  %s667_s23 = sphi %s709_s23, %s16_s23   ;;  %s663_s22 = sphi %s707_s22, %s788_s22   ;;  %s659_s21 = sphi %s705_s21, %s787_s21  }
   0x3   : > { %p30_p1 = scmp.ge.s32.totalorder %s28_s24, 2  ;;  %p267_p2 = scmp.lt.s32.totalorder %s667_s23, 3 }
   0x5   : > { %s790_s24 = smov (%p30_p1, %s28_s24), 0  ;;  %p268_p3 = pnand %p603_p0, %p267_p2 }
   0x6   : > { %v363_v0 = vld [vmem:[%s781_s1] sm:$0x3] (!%p268_p3)  ;;  %v364_v1 = vld [vmem:[%s781_s1 + $0x2] sm:$0x3] (!%p268_p3)  ;;  %vm365_vm0 = vcmask (!%p268_p3), 254976   ;;  %v382_v12 = vlaneseq (!%p268_p3)  ;;  %p324_p4 = scmp.lt.s32.totalorder (!%p268_p3), %s659_s21, 1 }
   0x7   : > { %271 = sbr.rel (%p268_p3) target bundleno = 55 (0x37), region = 44  ;;  %v366_v2 = vsel (!%p268_p3), %vm365_vm0, %v363_v0, 0.0  ;;  %v367_v3 = vsel (!%p268_p3), %vm365_vm0, %v364_v1, 0.0  ;;  %v669_v10 = vmov (!%p268_p3), 1966171168   ;;  %vm467_vm1 = vcmask (!%p268_p3), 261120  }
   0x8   : > { %v368_v4 = vadd.f32 (!%p268_p3), %v367_v3, %v366_v2  ;;  %v380_v11 = vunpack.c.l.s4 (!%p268_p3), %v669_v10  ;;  %v383_v14 = vshrl.u32 (!%p268_p3), %v382_v12, 7  ;;  %v375_v19 = vld [vmem:[%s782_s2] sm:$0x1] (!%p268_p3) }
   0x9   : > { %v396_v23 = vld [vmem:[%s783_s3] sm:$0x1] (!%p268_p3) }
   0xa   : > { %v369_v5 = vmul.f32 (!%p268_p3), 0.0078125, %v368_v4  ;;  %v381_v13 = vunpack.c.0.s8 (!%p268_p3), %v380_v11  ;;  %v410_v21 = vsub.s32 (!%p268_p3), 0, %v383_v14 }
   0xc   : > { %v370_v6 = vmul.f32 (!%p268_p3), %v369_v5, %v369_v5  ;;  %v384_v15 = vsub.s32 (!%p268_p3), %v381_v13, %v383_v14 }
   0xe   : > { %v372_v7 = vrot.slane %v370_v6, 7  ;;  %s792_s21 = smov (!%p324_p4, %s659_s21), 1 }
   0xf   : > { %s729_s29 = sshll.u32 %s792_s21, 6 }
  0x10   : > { %v374_v8 = vsub.f32 %v369_v5, %v372_v7  ;;  %s331_s8 = scalar_lea.vmem %s780_s0, %s729_s29  ;;  %s341_s15 = scalar_lea.vmem %s784_s4, %s729_s29 }
  0x11   : > { %v399_v24 = vld [vmem:[%s331_s8] sm:$0xff]  ;;  %v400_v25 = vld [vmem:[%s331_s8 + $0x8] sm:$0xff]  ;;  %v401_v26 = vld [vmem:[%s331_s8 + $0x10] sm:$0xff]  ;;  %s749_s18 = scalar_lea.vmem %s785_s5, %s729_s29  ;;  %s361_s21 = scalar_lea.vmem %s786_s6, %s729_s29 }
  0x12   : > { %v376_v9 = vadd.f32 1e-05, %v374_v8  ;;  %v402_v27 = vld [vmem:[%s331_s8 + $0x18] sm:$0xff]  ;;  %v403_v30 = vld [vmem:[%s331_s8 + $0x20] sm:$0xff]  ;;  %v404_v31 = vld [vmem:[%s331_s8 + $0x28] sm:$0xff] }
  0x13   : > { %v405_v32 = vld [vmem:[%s331_s8 + $0x30] sm:$0xff]  ;;  %v406_v33 = vld [vmem:[%s331_s8 + $0x38] sm:$0xff]  ;;  %v435_v43 = vld [vmem:[%s341_s15] sm:$0xff] }
  0x14   : > { %643 = vrsqrt.f32 %v376_v9  ;;  %v436_v44 = vld [vmem:[%s341_s15 + $0x8] sm:$0xff]  ;;  %v451_v46 = vld [vmem:[%s749_s18] sm:$0xff]  ;;  %v437_v48 = vld [vmem:[%s341_s15 + $0x10] sm:$0xff] }
  0x15   : > { %v452_v47 = vld [vmem:[%s749_s18 + $0x8] sm:$0xff]  ;;  %v438_v49 = vld [vmem:[%s341_s15 + $0x18] sm:$0xff]  ;;  %v439_v50 = vld [vmem:[%s341_s15 + $0x20] sm:$0xff] }
  0x16   : > { %v440_v55 = vld [vmem:[%s341_s15 + $0x28] sm:$0xff]  ;;  %v441_v56 = vld [vmem:[%s341_s15 + $0x30] sm:$0xff]  ;;  %v442_v57 = vld [vmem:[%s341_s15 + $0x38] sm:$0xff] }
  0x17   : > { %v453_v58 = vld [vmem:[%s749_s18 + $0x10] sm:$0xff]  ;;  %v454_v59 = vld [vmem:[%s749_s18 + $0x18] sm:$0xff]  ;;  %v455_v61 = vld [vmem:[%s749_s18 + $0x20] sm:$0xff] }
  0x18   : > { %v457_v6 = vld [vmem:[%s749_s18 + $0x30] sm:$0xff]  ;;  %v458_v7 = vld [vmem:[%s749_s18 + $0x38] sm:$0xff] }
  0x1e   : > { %v644_v16 = vpop.eup %643 }
  0x1f   : > { %v385_v17 = vrot.slane %v644_v16, %v384_v15 }
  0x21   : > { %v386_v18 = vcombine.high %v385_v17, %v385_v17 }
  0x23   : > { %v393_v20 = vrot.slane %v386_v18, %v384_v15 }
  0x25   : > { %v395_v22 = vmul.f32 %v393_v20, %v375_v19 }
  0x27   : > { %v397_v28 = vmul.f32 %v395_v22, %v369_v5  ;;  %v411_v29 = vrot.slane %v395_v22, %v410_v21  ;;  %v456_v5 = vld [vmem:[%s749_s18 + $0x28] sm:$0xff] }
  0x29   : > { %v398_v34 = vsub.f32 %v396_v23, %v397_v28  ;;  %v413_v35 = vmul.f32 %v411_v29, %v399_v24  ;;  %v414_v36 = vmul.f32 %v411_v29, %v400_v25  ;;  %v415_v37 = vmul.f32 %v411_v29, %v401_v26 }
  0x2a   : > { %v416_v38 = vmul.f32 %v411_v29, %v402_v27  ;;  %v417_v39 = vmul.f32 %v411_v29, %v403_v30  ;;  %v418_v40 = vmul.f32 %v411_v29, %v404_v31  ;;  %v419_v41 = vmul.f32 %v411_v29, %v405_v32 }
  0x2b   : > { %v425_v42 = vrot.slane %v398_v34, %v410_v21  ;;  %v420_v45 = vmul.f32 %v411_v29, %v406_v33 }
  0x2d   : > { %v427_v51 = vadd.f32 %v425_v42, %v413_v35  ;;  %v428_v52 = vadd.f32 %v425_v42, %v414_v36  ;;  %v429_v53 = vadd.f32 %v425_v42, %v415_v37  ;;  %v430_v54 = vadd.f32 %v425_v42, %v416_v38 }
  0x2e   : > { %v431_v60 = vadd.f32 %v425_v42, %v417_v39  ;;  %v432_v62 = vadd.f32 %v425_v42, %v418_v40  ;;  %v433_v63 = vadd.f32 %v425_v42, %v419_v41  ;;  %v434_v0 = vadd.f32 %v425_v42, %v420_v45 }
  0x2f   : > { %v443_v1 = vadd.f32 %v435_v43, %v427_v51  ;;  %v444_v2 = vadd.f32 %v436_v44, %v428_v52  ;;  %v445_v3 = vadd.f32 %v437_v48, %v429_v53  ;;  %v446_v4 = vadd.f32 %v438_v49, %v430_v54 }
  0x30   : > { %v447_v8 = vadd.f32 %v439_v50, %v431_v60  ;;  %v448_v9 = vadd.f32 %v440_v55, %v432_v62  ;;  %v449_v10 = vadd.f32 %v441_v56, %v433_v63  ;;  %v450_v11 = vadd.f32 %v442_v57, %v434_v0 }
  0x31   : > { %v459_v12 = vadd.f32 %v451_v46, %v443_v1  ;;  %v460_v13 = vadd.f32 %v452_v47, %v444_v2  ;;  %v461_v14 = vadd.f32 %v453_v58, %v445_v3  ;;  %v462_v15 = vadd.f32 %v454_v59, %v446_v4 }
  0x32   : > { %v463_v16 = vadd.f32 %v455_v61, %v447_v8  ;;  %v464_v17 = vadd.f32 %v456_v5, %v448_v9  ;;  %v465_v18 = vadd.f32 %v457_v6, %v449_v10  ;;  %v466_v19 = vadd.f32 %v458_v7, %v450_v11 }
  0x33   : > { %468 = vst.msk [vmem:[%s361_s21] sm:$0xff] %vm467_vm1, %v459_v12  ;;  %469 = vst.msk [vmem:[%s361_s21 + $0x8] sm:$0xff] %vm467_vm1, %v460_v13 }
  0x34   : > { %470 = vst.msk [vmem:[%s361_s21 + $0x10] sm:$0xff] %vm467_vm1, %v461_v14  ;;  %471 = vst.msk [vmem:[%s361_s21 + $0x18] sm:$0xff] %vm467_vm1, %v462_v15 }
  0x35   : > { %472 = vst.msk [vmem:[%s361_s21 + $0x20] sm:$0xff] %vm467_vm1, %v463_v16  ;;  %473 = vst.msk [vmem:[%s361_s21 + $0x28] sm:$0xff] %vm467_vm1, %v464_v17 }
  0x36   : > { %474 = vst.msk [vmem:[%s361_s21 + $0x30] sm:$0xff] %vm467_vm1, %v465_v18  ;;  %475 = vst.msk [vmem:[%s361_s21 + $0x38] sm:$0xff] %vm467_vm1, %v466_v19 }
  0x37 PF: > { %s16_s23 = sadd.s32 1, %s667_s23   ;;  %s787_s21 = smov %s663_s22 }
  0x38   : > { %p13_p5 = scmp.ge.s32.totalorder %s16_s23, 4   ;;  %s788_s22 = smov %s790_s24 }
  0x3a   :  { %15 = sbr.rel (!%p13_p5) target bundleno = 2 (0x2), region = 80 }

// kernel: genet_gray_forward.19
= control target key start
LH: loop header
LB: loop body
LE: loop exit
PB: predicated region body
PF: predicated region fallthrough
CT: control target
= control target key end

     0   :  { %s1253_s15 = smov 0   ;;  %s1635_s0 = inlined_call_operand.vmem [shape: f32[2,10,10,32], index: 0, kind: input, shape index: {}]   ;;  %s1636_s1 = inlined_call_operand.vmem [shape: bf16[288,32], index: 1, kind: input, shape index: {}]   ;;  %s1637_s2 = inlined_call_operand.vmem [shape: f32[1,32], index: 2, kind: input, shape index: {}]   ;;  %s1638_s3 = inlined_call_operand.vmem [shape: f32[2,8,8,32], index: 3, kind: output, shape index: {0}]   ;;  %s1639_s4 = inlined_call_operand.vmem [shape: f32[2,2,32], index: 4, kind: output, shape index: {1}]  }
   0x1 LB: > { %s1030_s16 = sadd.s32 4294967295, %s1223_s15   ;;  %p1034_p0 = scmp.ge.s32.totalorder %s1223_s15, 1  ;;  %s1223_s15 = sphi %s1253_s15, %s15_s15  }
   0x2   : > { %p165_p1 = scmp.lt.s32.totalorder %s1223_s15, 3 }
   0x4   : > { %p166_p2 = pnand %p1034_p0, %p165_p1 }
   0x5   : > { %p195_p3 = scmp.lt.s32.totalorder (!%p166_p2), %s1030_s16, 1  ;;  %v1199_v0 = vld [vmem:[%s1636_s1 + $0x40] sm:$0xff] (!%p166_p2)   ;;  %v1201_v2 = vld [vmem:[%s1636_s1 + $0x48] sm:$0xff] (!%p166_p2)   ;;  %vm255_vm0 = vcmask (!%p166_p2), 261120   ;;  %v1203_v4 = vld [vmem:[%s1636_s1 + $0x50] sm:$0xff] (!%p166_p2)   ;;  %s1225_s5 = smov (!%p166_p2), 32  }
   0x6   : > { %169 = sbr.rel (%p166_p2) target bundleno = 478 (0x1de), region = 32  ;;  %v1200_v1 = vld [vmem:[%s1636_s1] sm:$0xff] (!%p166_p2)   ;;  %1113 = vmatprep.subr.bf16.mxu0 (!%p166_p2), %v1199_v0  ;;  %1171 = vmatprep.subr.bf16.mxu1 (!%p166_p2), %v1199_v0  ;;  %v1202_v3 = vld [vmem:[%s1636_s1 + $0x8] sm:$0xff] (!%p166_p2)   ;;  %v1204_v12 = vld [vmem:[%s1636_s1 + $0x10] sm:$0xff] (!%p166_p2)   ;;  %s1226_s8 = smov (!%p166_p2), 64   ;;  %vm304_vm1 = vcmask (!%p166_p2), 523520  }
   0x7   : > { %1114 = vmatpush3.bf16.msra.mxu0 (!%p166_p2), %v1200_v1  ;;  %1179 = vmatpush3.bf16.msra.mxu1 (!%p166_p2), %v1200_v1  ;;  %v1205_v32 = vld [vmem:[%s1636_s1 + $0x58] sm:$0xff] (!%p166_p2)   ;;  %v1207_v34 = vld [vmem:[%s1636_s1 + $0x60] sm:$0xff] (!%p166_p2)   ;;  %v1209_v36 = vld [vmem:[%s1636_s1 + $0x68] sm:$0xff] (!%p166_p2)   ;;  %s1227_s21 = smov (!%p166_p2), 96   ;;  %vm353_vm2 = vcmask (!%p166_p2), 785920   ;;  %vm403_vm3 = vcmask (!%p166_p2), 1048320  }
   0x8   : > { %1115 = vmatprep.subr.bf16.mxu0 (!%p166_p2), %v1201_v2  ;;  %1172 = vmatprep.subr.bf16.mxu1 (!%p166_p2), %v1201_v2  ;;  %v1206_v33 = vld [vmem:[%s1636_s1 + $0x18] sm:$0xff] (!%p166_p2)   ;;  %v1208_v35 = vld [vmem:[%s1636_s1 + $0x20] sm:$0xff] (!%p166_p2)   ;;  %v1210_v37 = vld [vmem:[%s1636_s1 + $0x28] sm:$0xff] (!%p166_p2)   ;;  %vm941_vm4 = vcmask (!%p166_p2), 253952  }
   0x9   : > { %v1211_v38 = vld [vmem:[%s1636_s1 + $0x70] sm:$0xff] (!%p166_p2)   ;;  %v1213_v40 = vld [vmem:[%s1636_s1 + $0x78] sm:$0xff] (!%p166_p2)   ;;  %v1472_v45 = vld [vmem:[%s1636_s1 + $0x80] sm:$0xff] (!%p166_p2)  }
   0xa   : > { %v1212_v39 = vld [vmem:[%s1636_s1 + $0x30] sm:$0xff] (!%p166_p2)   ;;  %v1214_v41 = vld [vmem:[%s1636_s1 + $0x38] sm:$0xff] (!%p166_p2)  }
   0xb   : > { %1116 = vmatpush3.bf16.msra.mxu0 (!%p166_p2), %v1202_v3  ;;  %1180 = vmatpush3.bf16.msra.mxu1 (!%p166_p2), %v1202_v3 }
   0xc   : > { %1117 = vmatprep.subr.bf16.mxu0 (!%p166_p2), %v1203_v4  ;;  %1173 = vmatprep.subr.bf16.mxu1 (!%p166_p2), %v1203_v4 }
   0xd   : > { %s1641_s16 = smov (!%p195_p3, %s1030_s16), 1 }
   0xe   : > { %s1187_s23 = smul.u32 160, %s1641_s16  ;;  %s1112_s12 = sshll.u32 %s1641_s16, 6 }
   0xf   : > { %1118 = vmatpush3.bf16.msra.mxu0 %v1204_v12  ;;  %1181 = vmatpush3.bf16.msra.mxu1 %v1204_v12  ;;  %s1594_s17 = scalar_lea.vmem %s1638_s3, %s1112_s12  ;;  %s1038_s18 = sshll.u32 %s1641_s16, 1 }
  0x10   : > { %s1279_s28 = scalar_lea.vmem %s1635_s0, %s1187_s23  ;;  %1119 = vmatprep.subr.bf16.mxu0 %v1205_v32  ;;  %1174 = vmatprep.subr.bf16.mxu1 %v1205_v32 }
  0x11   : > { %v1285_v5 = vld [vmem:[%s1279_s28 + $0x12] sm:$0xff]  ;;  %v264_v6 = vld [vmem:[%s1279_s28 + $0x1] sm:$0xff] }
  0x12   : > { %v1289_v7 = vld [vmem:[%s1279_s28 + $0x22] sm:$0xff]  ;;  %444 = vrot.lane.b32.xlu0 %v1285_v5, %s1225_s5  ;;  %280 = vrot.lane.b32.xlu1 %v264_v6, %s1225_s5  ;;  %v265_v8 = vld [vmem:[%s1279_s28 + $0x11] sm:$0xff] }
  0x13   : > { %v1296_v9 = vld [vmem:[%s1279_s28 + $0x20] sm:$0xff]  ;;  %581 = vst.msk [vmem:[#allocation2 + $0x10] sm:$0xff] %vm255_vm0, %v1289_v7  ;;  %v1301_v10 = vld [vmem:[%s1279_s28 + $0x30] sm:$0xff]  ;;  %420 = vst.msk [vmem:[#allocation2 + $0x8] sm:$0xff] %vm255_vm0, %v265_v8  ;;  %1120 = vmatpush3.bf16.msra.mxu0 %v1206_v33  ;;  %1182 = vmatpush3.bf16.msra.mxu1 %v1206_v33 }
  0x14   : > { %v1304_v11 = vld [vmem:[%s1279_s28 + $0x21] sm:$0xff]  ;;  %258 = vst.msk [vmem:[#allocation2 + $0x30] sm:$0xff] %vm255_vm0, %v1296_v9  ;;  %v1313_v13 = vld [vmem:[%s1279_s28 + $0x31] sm:$0xff]  ;;  %259 = vst.msk [vmem:[#allocation2 + $0x48] sm:$0xff] %vm255_vm0, %v1301_v10  ;;  %1121 = vmatprep.subr.bf16.mxu0 %v1207_v34  ;;  %1175 = vmatprep.subr.bf16.mxu1 %v1207_v34 }
  0x15   : > { %v1316_v14 = vld [vmem:[%s1279_s28 + $0x10] sm:$0xff]  ;;  %421 = vst.msk [vmem:[#allocation2 + $0x20] sm:$0xff] %vm255_vm0, %v1304_v11  ;;  %v1326_v16 = vld [vmem:[%s1279_s28 + $0x82] sm:$0xff]  ;;  %422 = vst.msk [vmem:[#allocation2 + $0x38] sm:$0xff] %vm255_vm0, %v1313_v13 }
  0x16   : > { %v1319_v15 = vld [vmem:[%s1279_s28 + $0x72] sm:$0xff]  ;;  %v1329_v17 = vld [vmem:[%s1279_s28 + $0x61] sm:$0xff]  ;;  %257 = vst.msk [vmem:[#allocation2 + $0x18] sm:$0xff] %vm255_vm0, %v1316_v14  ;;  %446 = vrot.lane.b32.xlu0 %v1289_v7, %s1225_s5  ;;  %282 = vrot.lane.b32.xlu1 %v265_v8, %s1225_s5  ;;  %587 = vst.msk [vmem:[#allocation2 + $0xa0] sm:$0xff] %vm255_vm0, %v1326_v16 }
  0x17   : > { %v1332_v18 = vld [vmem:[%s1279_s28 + $0x71] sm:$0xff]  ;;  %586 = vst.msk [vmem:[#allocation2 + $0x88] sm:$0xff] %vm255_vm0, %v1319_v15  ;;  %425 = vst.msk [vmem:[#allocation2 + $0x80] sm:$0xff] %vm255_vm0, %v1329_v17  ;;  %v1350_v19 = vld [vmem:[%s1279_s28 + $0x62] sm:$0xff]  ;;  %1122 = vmatpush3.bf16.msra.mxu0 %v1208_v35  ;;  %1183 = vmatpush3.bf16.msra.mxu1 %v1208_v35 }
  0x18   : > { %426 = vst.msk [vmem:[#allocation2 + $0x98] sm:$0xff] %vm255_vm0, %v1332_v18  ;;  %v1353_v20 = vld [vmem:[%s1279_s28 + $0x81] sm:$0xff]  ;;  %v1356_v21 = vld [vmem:[%s1279_s28 + $0x70] sm:$0xff]  ;;  %585 = vst.msk [vmem:[#allocation2 + $0x70] sm:$0xff] %vm255_vm0, %v1350_v19  ;;  %1123 = vmatprep.subr.bf16.mxu0 %v1209_v36  ;;  %1176 = vmatprep.subr.bf16.mxu1 %v1209_v36 }
  0x19   : > { %v1359_v22 = vld [vmem:[%s1279_s28 + $0x32] sm:$0xff]  ;;  %v1362_v23 = vld [vmem:[%s1279_s28 + $0x42] sm:$0xff]  ;;  %427 = vst.msk [vmem:[#allocation2 + $0xb0] sm:$0xff] %vm255_vm0, %v1353_v20  ;;  %263 = vst.msk [vmem:[#allocation2 + $0xa8] sm:$0xff] %vm255_vm0, %v1356_v21 }
  0x1a   : > { %v313_v24 = vld [vmem:[%s1279_s28 + $0x2] sm:$0xff]  ;;  %v1373_v26 = vld [vmem:[%s1279_s28 + $0x50] sm:$0xff]  ;;  %582 = vst.msk [vmem:[#allocation2 + $0x28] sm:$0xff] %vm255_vm0, %v1359_v22  ;;  %583 = vst.msk [vmem:[#allocation2 + $0x40] sm:$0xff] %vm255_vm0, %v1362_v23  ;;  %493 = vrot.lane.b32.xlu0 %v1296_v9, %s1226_s8  ;;  %495 = vrot.lane.b32.xlu1 %v1301_v10, %s1226_s8 }
  0x1b   : > { %v1370_v25 = vld [vmem:[%s1279_s28 + $0x40] sm:$0xff]  ;;  %v1389_v28 = vld [vmem:[%s1279_s28 + $0x51] sm:$0xff]  ;;  %261 = vst.msk [vmem:[#allocation2 + $0x78] sm:$0xff] %vm255_vm0, %v1373_v26  ;;  %1124 = vmatpush3.bf16.msra.mxu0 %v1210_v37  ;;  %1184 = vmatpush3.bf16.msra.mxu1 %v1210_v37 }
  0x1c   : > { %v1376_v27 = vld [vmem:[%s1279_s28 + $0x41] sm:$0xff]  ;;  %v1392_v29 = vld [vmem:[%s1279_s28 + $0x52] sm:$0xff]  ;;  %260 = vst.msk [vmem:[#allocation2 + $0x60] sm:$0xff] %vm255_vm0, %v1370_v25  ;;  %424 = vst.msk [vmem:[#allocation2 + $0x68] sm:$0xff] %vm255_vm0, %v1389_v28  ;;  %1125 = vmatprep.subr.bf16.mxu0 %v1211_v38  ;;  %1177 = vmatprep.subr.bf16.mxu1 %v1211_v38 }
  0x1d   : > { %423 = vst.msk [vmem:[#allocation2 + $0x50] sm:$0xff] %vm255_vm0, %v1376_v27  ;;  %v1401_v30 = vld [vmem:[%s1279_s28 + $0x60] sm:$0xff]  ;;  %584 = vst.msk [vmem:[#allocation2 + $0x58] sm:$0xff] %vm255_vm0, %v1392_v29  ;;  %v1070_v43 = vld [vmem:[%s1279_s28 + $0x90] sm:$0xff] }
  0x1e   : > { %v247_v31 = vld [vmem:[%s1279_s28] sm:$0xff]  ;;  %262 = vst.msk [vmem:[#allocation2 + $0x90] sm:$0xff] %vm255_vm0, %v1401_v30  ;;  %329 = vrot.lane.b32.xlu0 %v313_v24, %s1226_s8  ;;  %331 = vrot.lane.b32.xlu1 %v1285_v5, %s1226_s8  ;;  %v1078_v44 = vld [vmem:[%s1279_s28 + $0x91] sm:$0xff]  ;;  %v606_v32 = vld [vmem:[#allocation2 + $0x88] sm:$0xff] }
  0x1f   : > { %256 = vst.msk [vmem:[#allocation2] sm:$0xff] %vm255_vm0, %v247_v31  ;;  %1126 = vmatpush3.bf16.msra.mxu0 %v1212_v39  ;;  %1185 = vmatpush3.bf16.msra.mxu1 %v1212_v39  ;;  %v1069_v42 = vld [vmem:[%s1279_s28 + $0x80] sm:$0xff]  ;;  %v1086_v46 = vld [vmem:[%s1279_s28 + $0x92] sm:$0xff] }
  0x20   : > { %1127 = vmatprep.subr.bf16.mxu0 %v1213_v40  ;;  %1178 = vmatprep.subr.bf16.mxu1 %v1213_v40  ;;  %588 = vst.msk [vmem:[#allocation2 + $0xb8] sm:$0xff] %vm255_vm0, %v1086_v46  ;;  %v603_v31 = vld [vmem:[#allocation2 + $0x70] sm:$0xff]  ;;  %v609_v39 = vld [vmem:[#allocation2 + $0xa0] sm:$0xff] }
  0x21   : > { %v621_v36 = vpack.c.bf16 %v606_v32, %v603_v31 }
  0x22   : > { %541 = vrot.lane.b32.xlu0 %v1304_v11, %s1227_s21  ;;  %543 = vrot.lane.b32.xlu1 %v1313_v13, %s1227_s21 }
  0x23   : > { %1128 = vmatpush3.bf16.msra.mxu0 %v1214_v41  ;;  %1186 = vmatpush3.bf16.msra.mxu1 %v1214_v41 }
  0x24   : > { %1159 = vmatprep.subr.bf16.mxu1 %v1472_v45 }
  0x26   : > { %379 = vrot.lane.b32.xlu0 %v1316_v14, %s1227_s21  ;;  %381 = vrot.lane.b32.xlu1 %v1296_v9, %s1227_s21 }
  0x27   : > { %v612_v40 = vld [vmem:[#allocation2 + $0xb8] sm:$0xff] }
  0x28   : > { %v624_v41 = vpack.c.bf16 %v612_v40, %v609_v39 }
  0x2a   : > { %456 = vrot.lane.b32.xlu0 %v1319_v15, %s1225_s5  ;;  %458 = vrot.lane.b32.xlu1 %v1326_v16, %s1225_s5 }
  0x2e   : > { %292 = vrot.lane.b32.xlu0 %v1329_v17, %s1225_s5  ;;  %294 = vrot.lane.b32.xlu1 %v1332_v18, %s1225_s5 }
  0x32   : > { %505 = vrot.lane.b32.xlu0 %v1069_v42, %s1226_s8  ;;  %507 = vrot.lane.b32.xlu1 %v1070_v43, %s1226_s8 }
  0x36   : > { %341 = vrot.lane.b32.xlu0 %v1350_v19, %s1226_s8  ;;  %343 = vrot.lane.b32.xlu1 %v1319_v15, %s1226_s8 }
  0x3a   : > { %553 = vrot.lane.b32.xlu0 %v1353_v20, %s1227_s21  ;;  %555 = vrot.lane.b32.xlu1 %v1078_v44, %s1227_s21 }
  0x3e   : > { %391 = vrot.lane.b32.xlu0 %v1356_v21, %s1227_s21  ;;  %393 = vrot.lane.b32.xlu1 %v1069_v42, %s1227_s21 }
  0x42   : > { %448 = vrot.lane.b32.xlu0 %v1359_v22, %s1225_s5  ;;  %450 = vrot.lane.b32.xlu1 %v1362_v23, %s1225_s5 }
  0x46   : > { %284 = vrot.lane.b32.xlu0 %v1304_v11, %s1225_s5  ;;  %286 = vrot.lane.b32.xlu1 %v1313_v13, %s1225_s5 }
  0x4a   : > { %497 = vrot.lane.b32.xlu0 %v1370_v25, %s1226_s8  ;;  %499 = vrot.lane.b32.xlu1 %v1373_v26, %s1226_s8 }
  0x4e   : > { %333 = vrot.lane.b32.xlu0 %v1289_v7, %s1226_s8  ;;  %335 = vrot.lane.b32.xlu1 %v1359_v22, %s1226_s8 }
  0x52   : > { %545 = vrot.lane.b32.xlu0 %v1376_v27, %s1227_s21  ;;  %547 = vrot.lane.b32.xlu1 %v1389_v28, %s1227_s21 }
  0x56   : > { %383 = vrot.lane.b32.xlu0 %v1301_v10, %s1227_s21  ;;  %385 = vrot.lane.b32.xlu1 %v1370_v25, %s1227_s21 }
  0x5a   : > { %452 = vrot.lane.b32.xlu0 %v1392_v29, %s1225_s5  ;;  %454 = vrot.lane.b32.xlu1 %v1350_v19, %s1225_s5  ;;  %v594_v19 = vld [vmem:[#allocation2 + $0x28] sm:$0xff] }
  0x5e   : > { %288 = vrot.lane.b32.xlu0 %v1376_v27, %s1225_s5  ;;  %290 = vrot.lane.b32.xlu1 %v1389_v28, %s1225_s5 }
  0x62   : > { %501 = vrot.lane.b32.xlu0 %v1401_v30, %s1226_s8  ;;  %503 = vrot.lane.b32.xlu1 %v1356_v21, %s1226_s8 }
  0x66   : > { %337 = vrot.lane.b32.xlu0 %v1362_v23, %s1226_s8  ;;  %339 = vrot.lane.b32.xlu1 %v1392_v29, %s1226_s8  ;;  %v597_v29 = vld [vmem:[#allocation2 + $0x40] sm:$0xff] }
  0x6a   : > { %549 = vrot.lane.b32.xlu0 %v1329_v17, %s1227_s21  ;;  %551 = vrot.lane.b32.xlu1 %v1332_v18, %s1227_s21  ;;  %v591_v18 = vld [vmem:[#allocation2 + $0x10] sm:$0xff] }
  0x6b   : > { %v615_v24 = vpack.c.bf16 %v594_v19, %v591_v18 }
  0x6e   : > { %387 = vrot.lane.b32.xlu0 %v1373_v26, %s1227_s21  ;;  %389 = vrot.lane.b32.xlu1 %v1401_v30, %s1227_s21  ;;  %v1216_v26 = vld [vmem:[%s1636_s1 + $0x88] sm:$0xff]   ;;  %v600_v30 = vld [vmem:[#allocation2 + $0x58] sm:$0xff]  ;;  %s208_s21 = scalar_lea.vmem %s1639_s4, %s1038_s18 }
  0x6f   : > { %v618_v33 = vpack.c.bf16 %v600_v30, %v597_v29 }
  0x84   : > { %v445_v47 = vpop.permute.xlu0 %444  ;;  %v281_v48 = vpop.permute.xlu1 %280 }
  0x85   : > { %468 = vst.msk [vmem:[#allocation2 + $0x8] sm:$0xff] %vm304_vm1, %v445_v47  ;;  %305 = vst.msk [vmem:[#allocation2] sm:$0xff] %vm304_vm1, %v281_v48 }
  0x88   : > { %v447_v49 = vpop.permute.xlu0 %446  ;;  %v283_v50 = vpop.permute.xlu1 %282 }
  0x89   : > { %469 = vst.msk [vmem:[#allocation2 + $0x20] sm:$0xff] %vm304_vm1, %v447_v49  ;;  %306 = vst.msk [vmem:[#allocation2 + $0x18] sm:$0xff] %vm304_vm1, %v283_v50 }
  0x8c   : > { %v494_v51 = vpop.permute.xlu0 %493  ;;  %v496_v52 = vpop.permute.xlu1 %495 }
  0x8d   : > { %517 = vst.msk [vmem:[#allocation2 + $0x8] sm:$0xff] %vm353_vm2, %v494_v51  ;;  %518 = vst.msk [vmem:[#allocation2 + $0x20] sm:$0xff] %vm353_vm2, %v496_v52 }
  0x90   : > { %v330_v53 = vpop.permute.xlu0 %329  ;;  %v332_v54 = vpop.permute.xlu1 %331 }
  0x91   : > { %354 = vst.msk [vmem:[#allocation2] sm:$0xff] %vm353_vm2, %v330_v53  ;;  %355 = vst.msk [vmem:[#allocation2 + $0x18] sm:$0xff] %vm353_vm2, %v332_v54 }
  0x94   : > { %v542_v55 = vpop.permute.xlu0 %541  ;;  %v544_v56 = vpop.permute.xlu1 %543 }
  0x95   : > { %565 = vst.msk [vmem:[#allocation2 + $0x8] sm:$0xff] %vm403_vm3, %v542_v55  ;;  %566 = vst.msk [vmem:[#allocation2 + $0x20] sm:$0xff] %vm403_vm3, %v544_v56 }
  0x98   : > { %v380_v57 = vpop.permute.xlu0 %379  ;;  %v382_v58 = vpop.permute.xlu1 %381 }
  0x99   : > { %404 = vst.msk [vmem:[#allocation2] sm:$0xff] %vm403_vm3, %v380_v57  ;;  %405 = vst.msk [vmem:[#allocation2 + $0x18] sm:$0xff] %vm403_vm3, %v382_v58 }
  0x9c   : > { %v457_v59 = vpop.permute.xlu0 %456  ;;  %v459_v60 = vpop.permute.xlu1 %458  ;;  %v590_v61 = vld [vmem:[#allocation2 + $0x8] sm:$0xff]  ;;  %v593_v62 = vld [vmem:[#allocation2 + $0x20] sm:$0xff] }
  0x9d   : > { %474 = vst.msk [vmem:[#allocation2 + $0x98] sm:$0xff] %vm304_vm1, %v457_v59  ;;  %475 = vst.msk [vmem:[#allocation2 + $0xb0] sm:$0xff] %vm304_vm1, %v459_v60  ;;  %v614_v63 = vpack.c.bf16 %v593_v62, %v590_v61 }
  0x9f   : > { %783 = vmatprep.mubr.bf16.mxu0 %v614_v63 }
  0xa0   : > { %v293_v0 = vpop.permute.xlu0 %292  ;;  %v295_v1 = vpop.permute.xlu1 %294  ;;  %v589_v2 = vld [vmem:[#allocation2] sm:$0xff]  ;;  %v592_v3 = vld [vmem:[#allocation2 + $0x18] sm:$0xff] }
  0xa1   : > { %311 = vst.msk [vmem:[#allocation2 + $0x90] sm:$0xff] %vm304_vm1, %v293_v0  ;;  %312 = vst.msk [vmem:[#allocation2 + $0xa8] sm:$0xff] %vm304_vm1, %v295_v1  ;;  %v613_v4 = vpack.c.bf16 %v592_v3, %v589_v2 }
  0xa3   : > { %784 = vmatmul.mubr.bf16.vlgmr.msra.gmra.mrb[0].mxu0 %v613_v4 }
  0xa4   : > { %v506_v5 = vpop.permute.xlu0 %505  ;;  %v508_v6 = vpop.permute.xlu1 %507 }
  0xa5   : > { %523 = vst.msk [vmem:[#allocation2 + $0x98] sm:$0xff] %vm353_vm2, %v506_v5  ;;  %524 = vst.msk [vmem:[#allocation2 + $0xb0] sm:$0xff] %vm353_vm2, %v508_v6 }
  0xa8   : > { %v342_v7 = vpop.permute.xlu0 %341  ;;  %v344_v8 = vpop.permute.xlu1 %343 }
  0xa9   : > { %360 = vst.msk [vmem:[#allocation2 + $0x90] sm:$0xff] %vm353_vm2, %v342_v7  ;;  %361 = vst.msk [vmem:[#allocation2 + $0xa8] sm:$0xff] %vm353_vm2, %v344_v8 }
  0xac   : > { %v554_v9 = vpop.permute.xlu0 %553  ;;  %v556_v10 = vpop.permute.xlu1 %555 }
  0xad   : > { %571 = vst.msk [vmem:[#allocation2 + $0x98] sm:$0xff] %vm403_vm3, %v554_v9  ;;  %572 = vst.msk [vmem:[#allocation2 + $0xb0] sm:$0xff] %vm403_vm3, %v556_v10 }
  0xb0   : > { %v392_v11 = vpop.permute.xlu0 %391  ;;  %v394_v12 = vpop.permute.xlu1 %393 }
  0xb1   : > { %410 = vst.msk [vmem:[#allocation2 + $0x90] sm:$0xff] %vm403_vm3, %v392_v11  ;;  %411 = vst.msk [vmem:[#allocation2 + $0xa8] sm:$0xff] %vm403_vm3, %v394_v12 }
  0xb4   : > { %v449_v13 = vpop.permute.xlu0 %448  ;;  %v451_v14 = vpop.permute.xlu1 %450  ;;  %v608_v15 = vld [vmem:[#allocation2 + $0x98] sm:$0xff]  ;;  %v611_v16 = vld [vmem:[#allocation2 + $0xb0] sm:$0xff] }
  0xb5   : > { %470 = vst.msk [vmem:[#allocation2 + $0x38] sm:$0xff] %vm304_vm1, %v449_v13  ;;  %471 = vst.msk [vmem:[#allocation2 + $0x50] sm:$0xff] %vm304_vm1, %v451_v14  ;;  %v623_v17 = vpack.c.bf16 %v611_v16, %v608_v15  ;;  %v1087_v16 = vld [vmem:[%s1637_s2] ss:$0 sm:$0xff] }
  0xb7   : > { %807 = vmatprep.mubr.bf16.mxu1 %v623_v17 }
  0xb8   : > { %v285_v20 = vpop.permute.xlu0 %284  ;;  %v287_v21 = vpop.permute.xlu1 %286  ;;  %v607_v22 = vld [vmem:[#allocation2 + $0x90] sm:$0xff]  ;;  %v610_v23 = vld [vmem:[#allocation2 + $0xa8] sm:$0xff] }
  0xb9   : > { %307 = vst.msk [vmem:[#allocation2 + $0x30] sm:$0xff] %vm304_vm1, %v285_v20  ;;  %308 = vst.msk [vmem:[#allocation2 + $0x48] sm:$0xff] %vm304_vm1, %v287_v21  ;;  %v622_v25 = vpack.c.bf16 %v610_v23, %v607_v22 }
  0xbb   : > { %808 = vmatmul.mubr.bf16.vlgmr.msra.gmra.mrb[0].mxu1 %v622_v25 }
  0xbc   : > { %v498_v27 = vpop.permute.xlu0 %497  ;;  %v500_v28 = vpop.permute.xlu1 %499  ;;  %1160 = vmatpush3.bf16.msra.mxu1 %v1472_v45  ;;  %1163 = vmatprep.mubr.msk.bf16.mxu1 %vm255_vm0, %v615_v24 }
  0xbd   : > { %519 = vst.msk [vmem:[#allocation2 + $0x38] sm:$0xff] %vm353_vm2, %v498_v27  ;;  %520 = vst.msk [vmem:[#allocation2 + $0x50] sm:$0xff] %vm353_vm2, %v500_v28  ;;  %1161 = vmatprep.subr.bf16.mxu1 %v1216_v26 }
  0xc0   : > { %v334_v34 = vpop.permute.xlu0 %333  ;;  %v336_v35 = vpop.permute.xlu1 %335  ;;  %1162 = vmatpush3.bf16.msra.mxu1 %v1216_v26 }
  0xc1   : > { %356 = vst.msk [vmem:[#allocation2 + $0x30] sm:$0xff] %vm353_vm2, %v334_v34  ;;  %357 = vst.msk [vmem:[#allocation2 + $0x48] sm:$0xff] %vm353_vm2, %v336_v35 }
  0xc3   : > { %1164 = vmatmul.mubr.msk.bf16.vlgmr.msra.gmra.mrb[4].mxu1 %vm255_vm0, %v618_v33 }
  0xc4   : > { %v546_v37 = vpop.permute.xlu0 %545  ;;  %v548_v38 = vpop.permute.xlu1 %547  ;;  %1167 = vmatprep.mubr.msk.bf16.mxu1 %vm255_vm0, %v621_v36 }
  0xc5   : > { %567 = vst.msk [vmem:[#allocation2 + $0x38] sm:$0xff] %vm403_vm3, %v546_v37  ;;  %568 = vst.msk [vmem:[#allocation2 + $0x50] sm:$0xff] %vm403_vm3, %v548_v38 }
  0xc8   : > { %v384_v42 = vpop.permute.xlu0 %383  ;;  %v386_v43 = vpop.permute.xlu1 %385 }
  0xc9   : > { %406 = vst.msk [vmem:[#allocation2 + $0x30] sm:$0xff] %vm403_vm3, %v384_v42  ;;  %407 = vst.msk [vmem:[#allocation2 + $0x48] sm:$0xff] %vm403_vm3, %v386_v43 }
  0xcb   : > { %1168 = vmatmul.mubr.msk.bf16.gmra.mrb[8].mxu1 %vm255_vm0, %v624_v41 }
  0xcc   : > { %v453_v44 = vpop.permute.xlu0 %452  ;;  %v455_v45 = vpop.permute.xlu1 %454  ;;  %v596_v46 = vld [vmem:[#allocation2 + $0x38] sm:$0xff]  ;;  %v599_v47 = vld [vmem:[#allocation2 + $0x50] sm:$0xff] }
  0xcd   : > { %472 = vst.msk [vmem:[#allocation2 + $0x68] sm:$0xff] %vm304_vm1, %v453_v44  ;;  %473 = vst.msk [vmem:[#allocation2 + $0x80] sm:$0xff] %vm304_vm1, %v455_v45  ;;  %v617_v48 = vpack.c.bf16 %v599_v47, %v596_v46 }
  0xcf   : > { %791 = vmatprep.mubr.bf16.mxu0 %v617_v48 }
  0xd0   : > { %v289_v49 = vpop.permute.xlu0 %288  ;;  %v291_v50 = vpop.permute.xlu1 %290  ;;  %v595_v51 = vld [vmem:[#allocation2 + $0x30] sm:$0xff]  ;;  %v598_v52 = vld [vmem:[#allocation2 + $0x48] sm:$0xff] }
  0xd1   : > { %309 = vst.msk [vmem:[#allocation2 + $0x60] sm:$0xff] %vm304_vm1, %v289_v49  ;;  %310 = vst.msk [vmem:[#allocation2 + $0x78] sm:$0xff] %vm304_vm1, %v291_v50  ;;  %v616_v53 = vpack.c.bf16 %v598_v52, %v595_v51 }
  0xd3   : > { %792 = vmatmul.mubr.bf16.gmra.mrb[4].mxu0 %v616_v53 }
  0xd4   : > { %v502_v54 = vpop.permute.xlu0 %501  ;;  %v504_v55 = vpop.permute.xlu1 %503 }
  0xd5   : > { %521 = vst.msk [vmem:[#allocation2 + $0x68] sm:$0xff] %vm353_vm2, %v502_v54  ;;  %522 = vst.msk [vmem:[#allocation2 + $0x80] sm:$0xff] %vm353_vm2, %v504_v55 }
  0xd8   : > { %v338_v56 = vpop.permute.xlu0 %337  ;;  %v340_v57 = vpop.permute.xlu1 %339 }
  0xd9   : > { %358 = vst.msk [vmem:[#allocation2 + $0x60] sm:$0xff] %vm353_vm2, %v338_v56  ;;  %359 = vst.msk [vmem:[#allocation2 + $0x78] sm:$0xff] %vm353_vm2, %v340_v57 }
  0xdc   : > { %v550_v58 = vpop.permute.xlu0 %549  ;;  %v552_v59 = vpop.permute.xlu1 %551 }
  0xdd   : > { %569 = vst.msk [vmem:[#allocation2 + $0x68] sm:$0xff] %vm403_vm3, %v550_v58  ;;  %570 = vst.msk [vmem:[#allocation2 + $0x80] sm:$0xff] %vm403_vm3, %v552_v59 }
  0xe0   : > { %v388_v60 = vpop.permute.xlu0 %387  ;;  %v390_v61 = vpop.permute.xlu1 %389 }
  0xe1   : > { %408 = vst.msk [vmem:[#allocation2 + $0x60] sm:$0xff] %vm403_vm3, %v388_v60  ;;  %409 = vst.msk [vmem:[#allocation2 + $0x78] sm:$0xff] %vm403_vm3, %v390_v61 }
  0xe4   : > { %v602_v62 = vld [vmem:[#allocation2 + $0x68] sm:$0xff]  ;;  %v605_v63 = vld [vmem:[#allocation2 + $0x80] sm:$0xff] }
  0xe5   : > { %v620_v0 = vpack.c.bf16 %v605_v63, %v602_v62 }
  0xe7   : > { %799 = vmatprep.mubr.bf16.mxu0 %v620_v0 }
  0xe8   : > { %v601_v1 = vld [vmem:[#allocation2 + $0x60] sm:$0xff]  ;;  %v604_v2 = vld [vmem:[#allocation2 + $0x78] sm:$0xff] }
  0xe9   : > { %v619_v3 = vpack.c.bf16 %v604_v2, %v601_v1 }
  0xeb   : > { %800 = vmatmul.mubr.bf16.gmra.mrb[8].mxu0 %v619_v3 }
 0x176   : > { %v1129_v4 = vpop.f32.mrb[0].mxu0 }
 0x177   : > { %v1130_v5 = vpop.f32.mrb[1].mxu0 }
 0x178   : > { %v1131_v6 = vadd.f32 %v1130_v5, %v1129_v4  ;;  %v1132_v7 = vpop.f32.mrb[2].mxu0 }
 0x179   : > { %v1133_v8 = vpop.f32.mrb[3].mxu0 }
 0x17a   : > { %v1134_v9 = vadd.f32 %v1133_v8, %v1132_v7  ;;  %v786_v18 = vadd.f32 %v1131_v6, %v1087_v16 }
 0x17c   : > { %v789_v22 = vadd.f32 %v1134_v9, %v1087_v16 }
 0x18e   : > { %v1147_v10 = vpop.f32.mrb[0].mxu1 }
 0x18f   : > { %v1148_v11 = vpop.f32.mrb[1].mxu1 }
 0x190   : > { %v1149_v12 = vadd.f32 %v1148_v11, %v1147_v10  ;;  %v1150_v13 = vpop.f32.mrb[2].mxu1 }
 0x191   : > { %v1151_v14 = vpop.f32.mrb[3].mxu1 }
 0x192   : > { %v1152_v15 = vadd.f32 %v1151_v14, %v1150_v13  ;;  %v810_v30 = vadd.f32 %v1149_v12, %v1087_v16 }
 0x194   : > { %v813_v37 = vadd.f32 %v1152_v15, %v1087_v16 }
 0x196   : > { %v1165_v17 = vpop.f32.mrb[4].mxu1 }
 0x197   : > { %v850_v19 = vpop.f32.mrb[5].mxu1 }
 0x198   : > { %v851_v20 = vadd.f32 %v850_v19, %v786_v18  ;;  %v1166_v21 = vpop.f32.mrb[6].mxu1 }
 0x199   : > { %v853_v23 = vpop.f32.mrb[7].mxu1 }
 0x19a   : > { %v903_v24 = vmul.f32 %v851_v20, %v851_v20  ;;  %933 = vst.msk [vmem:[%s1594_s17] sm:$0xff] %vm255_vm0, %v851_v20  ;;  %v854_v25 = vadd.f32 %v853_v23, %v789_v22  ;;  %v881_v26 = vsel %vm255_vm0, %v851_v20, 0.0 }
 0x19c   : > { %v882_v27 = vsel %vm255_vm0, %v854_v25, 0.0  ;;  %v904_v28 = vmul.f32 %v854_v25, %v854_v25  ;;  %934 = vst.msk [vmem:[%s1594_s17 + $0x8] sm:$0xff] %vm255_vm0, %v854_v25  ;;  %v911_v31 = vsel %vm255_vm0, %v903_v24, 0.0 }
 0x19d   : > { %v883_v29 = vadd.f32 %v882_v27, %v881_v26 }
 0x19e   : > { %v912_v32 = vsel %vm255_vm0, %v904_v28, 0.0  ;;  %v1169_v33 = vpop.f32.mrb[8].mxu1 }
 0x19f   : > { %v913_v34 = vadd.f32 %v912_v32, %v911_v31  ;;  %v875_v35 = vadd.f32 %v1169_v33, %v810_v30  ;;  %v866_v36 = vpop.f32.mrb[9].mxu1 }
 0x1a0   : > { %v1170_v38 = vpop.f32.mrb[10].mxu1 }
 0x1a1   : > { %939 = vst.msk [vmem:[%s1594_s17 + $0x30] sm:$0xff] %vm255_vm0, %v875_v35  ;;  %v878_v39 = vadd.f32 %v1170_v38, %v813_v37  ;;  %v869_v40 = vpop.f32.mrb[11].mxu1  ;;  %v909_v10 = vmul.f32 %v875_v35, %v875_v35 }
 0x1a3   : > { %940 = vst.msk [vmem:[%s1594_s17 + $0x38] sm:$0xff] %vm255_vm0, %v878_v39  ;;  %v894_v22 = vsel %vm255_vm0, %v878_v39, 0.0 }
 0x1a6   : > { %v1135_v41 = vpop.f32.mrb[4].mxu0 }
 0x1a7   : > { %v1136_v42 = vpop.f32.mrb[5].mxu0 }
 0x1a8   : > { %v1137_v43 = vadd.f32 %v1136_v42, %v1135_v41  ;;  %v1138_v44 = vpop.f32.mrb[6].mxu0 }
 0x1a9   : > { %v1139_v45 = vpop.f32.mrb[7].mxu0 }
 0x1aa   : > { %v794_v46 = vadd.f32 %v1137_v43, %v1087_v16  ;;  %v1140_v47 = vadd.f32 %v1139_v45, %v1138_v44 }
 0x1ac   : > { %v859_v48 = vadd.f32 %v1165_v17, %v794_v46  ;;  %v797_v49 = vadd.f32 %v1140_v47, %v1087_v16  ;;  %v892_v17 = vsel %vm255_vm0, %v875_v35, 0.0 }
 0x1ae   : > { %v884_v50 = vsel %vm255_vm0, %v859_v48, 0.0  ;;  %v905_v51 = vmul.f32 %v859_v48, %v859_v48  ;;  %935 = vst.msk [vmem:[%s1594_s17 + $0x10] sm:$0xff] %vm255_vm0, %v859_v48  ;;  %v862_v52 = vadd.f32 %v1166_v21, %v797_v49  ;;  %v922_v21 = vsel %vm255_vm0, %v909_v10, 0.0 }
 0x1af   : > { %v885_v53 = vadd.f32 %v884_v50, %v883_v29 }
 0x1b0   : > { %v914_v54 = vsel %vm255_vm0, %v905_v51, 0.0  ;;  %v886_v55 = vsel %vm255_vm0, %v862_v52, 0.0  ;;  %v906_v56 = vmul.f32 %v862_v52, %v862_v52  ;;  %936 = vst.msk [vmem:[%s1594_s17 + $0x18] sm:$0xff] %vm255_vm0, %v862_v52 }
 0x1b1   : > { %v915_v57 = vadd.f32 %v914_v54, %v913_v34  ;;  %v887_v58 = vadd.f32 %v886_v55, %v885_v53 }
 0x1b2   : > { %v916_v59 = vsel %vm255_vm0, %v906_v56, 0.0 }
 0x1b3   : > { %v917_v60 = vadd.f32 %v916_v59, %v915_v57 }
 0x1be   : > { %v1141_v61 = vpop.f32.mrb[8].mxu0 }
 0x1bf   : > { %v1142_v62 = vpop.f32.mrb[9].mxu0 }
 0x1c0   : > { %v1143_v63 = vadd.f32 %v1142_v62, %v1141_v61  ;;  %v1144_v0 = vpop.f32.mrb[10].mxu0 }
 0x1c1   : > { %v1145_v1 = vpop.f32.mrb[11].mxu0 }
 0x1c2   : > { %v802_v2 = vadd.f32 %v1143_v63, %v1087_v16  ;;  %v1146_v3 = vadd.f32 %v1145_v1, %v1144_v0 }
 0x1c4   : > { %v867_v4 = vadd.f32 %v866_v36, %v802_v2  ;;  %v805_v5 = vadd.f32 %v1146_v3, %v1087_v16  ;;  %v910_v16 = vmul.f32 %v878_v39, %v878_v39 }
 0x1c6   : > { %v907_v6 = vmul.f32 %v867_v4, %v867_v4  ;;  %937 = vst.msk [vmem:[%s1594_s17 + $0x20] sm:$0xff] %vm255_vm0, %v867_v4  ;;  %v870_v7 = vadd.f32 %v869_v40, %v805_v5  ;;  %v888_v8 = vsel %vm255_vm0, %v867_v4, 0.0  ;;  %v924_v25 = vsel %vm255_vm0, %v910_v16, 0.0 }
 0x1c7   : > { %v889_v9 = vadd.f32 %v888_v8, %v887_v58 }
 0x1c8   : > { %v890_v11 = vsel %vm255_vm0, %v870_v7, 0.0  ;;  %v908_v12 = vmul.f32 %v870_v7, %v870_v7  ;;  %v918_v13 = vsel %vm255_vm0, %v907_v6, 0.0  ;;  %938 = vst.msk [vmem:[%s1594_s17 + $0x28] sm:$0xff] %vm255_vm0, %v870_v7 }
 0x1c9   : > { %v891_v14 = vadd.f32 %v890_v11, %v889_v9  ;;  %v919_v15 = vadd.f32 %v918_v13, %v917_v60 }
 0x1ca   : > { %v920_v18 = vsel %vm255_vm0, %v908_v12, 0.0 }
 0x1cb   : > { %v893_v19 = vadd.f32 %v892_v17, %v891_v14  ;;  %v921_v20 = vadd.f32 %v920_v18, %v919_v15 }
 0x1cd   : > { %v895_v23 = vadd.f32 %v894_v22, %v893_v19  ;;  %v923_v24 = vadd.f32 %v922_v21, %v921_v20 }
 0x1cf   : > { %v896_v26 = vrot.slane %v895_v23, 4  ;;  %v925_v27 = vadd.f32 %v924_v25, %v923_v24 }
 0x1d1   : > { %v897_v28 = vadd.f32 %v896_v26, %v895_v23  ;;  %v926_v29 = vrot.slane %v925_v27, 4 }
 0x1d3   : > { %v898_v30 = vrot.slane %v897_v28, 2  ;;  %v927_v31 = vadd.f32 %v926_v29, %v925_v27 }
 0x1d5   : > { %v899_v32 = vadd.f32 %v898_v30, %v897_v28  ;;  %v928_v33 = vrot.slane %v927_v31, 2 }
 0x1d7   : > { %v900_v34 = vrot.slane %v899_v32, 1  ;;  %v929_v35 = vadd.f32 %v928_v33, %v927_v31 }
 0x1d9   : > { %v901_v36 = vadd.f32 %v900_v34, %v899_v32  ;;  %v930_v37 = vrot.slane %v929_v35, 1 }
 0x1db   : > { %v931_v38 = vadd.f32 %v930_v37, %v929_v35  ;;  %942 = vst.msk [vmem:[%s208_s21] sm:$0x1] %vm941_vm4, %v901_v36 }
 0x1dd   : > { %943 = vst.msk [vmem:[%s208_s21 + $0x1] sm:$0x1] %vm941_vm4, %v931_v38 }
 0x1de PF: > { %s15_s15 = sadd.s32 1, %s1223_s15  }
 0x1df   : > { %p12_p4 = scmp.ge.s32.totalorder %s15_s15, 4  }
 0x1e1   :  { %14 = sbr.rel (!%p12_p4) target bundleno = 1 (0x1), region = 76 }

// kernel: genet_gray_forward.28
= control target key start
LH: loop header
LB: loop body
LE: loop exit
PB: predicated region body
PF: predicated region fallthrough
CT: control target
= control target key end

     0   :  { %s608_s18 = smov 0   ;;  %s610_s19 = smov 0   ;;  %s669_s0 = inlined_call_operand.vmem [shape: f32[2,8,8,16], index: 0, kind: input, shape index: {}]   ;;  %s670_s1 = inlined_call_operand.vmem [shape: f32[2,2,16], index: 1, kind: input, shape index: {}]   ;;  %s671_s2 = inlined_call_operand.vmem [shape: f32[1,16], index: 2, kind: input, shape index: {}]   ;;  %s672_s3 = inlined_call_operand.vmem [shape: f32[1,16], index: 3, kind: input, shape index: {}]   ;;  %s673_s4 = inlined_call_operand.vmem [shape: f32[2,8,8,16], index: 4, kind: input, shape index: {}]   ;;  %s674_s5 = inlined_call_operand.vmem [shape: f32[2,8,8,16], index: 5, kind: output, shape index: {}]  }
   0x1   :  { %s612_s20 = smov 0  }
   0x2 LB: > { %s27_s21 = sadd.s32 1, %s571_s19  ;;  %p514_p0 = scmp.ge.s32.totalorder %s575_s20, 1  ;;  %s575_s20 = sphi %s612_s20, %s15_s20   ;;  %s571_s19 = sphi %s610_s19, %s676_s19   ;;  %s567_s18 = sphi %s608_s18, %s675_s18  }
   0x3   : > { %p29_p1 = scmp.ge.s32.totalorder %s27_s21, 2  ;;  %p225_p2 = scmp.lt.s32.totalorder %s575_s20, 3 }
   0x5   : > { %s678_s21 = smov (%p29_p1, %s27_s21), 0  ;;  %p226_p3 = pnand %p514_p0, %p225_p2 }
   0x6   : > { %v300_v0 = vld [vmem:[%s670_s1] sm:$0x3] (!%p226_p3)  ;;  %v301_v1 = vld [vmem:[%s670_s1 + $0x2] sm:$0x3] (!%p226_p3)  ;;  %vm302_vm0 = vcmask (!%p226_p3), 123904   ;;  %v319_v12 = vlaneseq (!%p226_p3)  ;;  %p271_p4 = scmp.lt.s32.totalorder (!%p226_p3), %s567_s18, 1 }
   0x7   : > { %229 = sbr.rel (%p226_p3) target bundleno = 55 (0x37), region = 40  ;;  %v303_v2 = vsel (!%p226_p3), %vm302_vm0, %v300_v0, 0.0  ;;  %v304_v3 = vsel (!%p226_p3), %vm302_vm0, %v301_v1, 0.0  ;;  %v577_v10 = vmov (!%p226_p3), 1966171168   ;;  %vm396_vm1 = vcmask (!%p226_p3), 130048  }
   0x8   : > { %v305_v4 = vadd.f32 (!%p226_p3), %v304_v3, %v303_v2  ;;  %v317_v11 = vunpack.c.l.s4 (!%p226_p3), %v577_v10  ;;  %v320_v14 = vshrl.u32 (!%p226_p3), %v319_v12, 7  ;;  %v312_v19 = vld [vmem:[%s671_s2] sm:$0x1] (!%p226_p3) }
   0x9   : > { %v333_v23 = vld [vmem:[%s672_s3] sm:$0x1] (!%p226_p3) }
   0xa   : > { %v306_v5 = vmul.f32 (!%p226_p3), 0.0078125, %v305_v4  ;;  %v318_v13 = vunpack.c.0.s8 (!%p226_p3), %v317_v11  ;;  %v347_v21 = vsub.s32 (!%p226_p3), 0, %v320_v14 }
   0xc   : > { %v307_v6 = vmul.f32 (!%p226_p3), %v306_v5, %v306_v5  ;;  %v321_v15 = vsub.s32 (!%p226_p3), %v318_v13, %v320_v14 }
   0xe   : > { %v309_v7 = vrot.slane %v307_v6, 7  ;;  %s680_s18 = smov (!%p271_p4, %s567_s18), 1 }
   0xf   : > { %s632_s26 = sshll.u32 %s680_s18, 6 }
  0x10   : > { %v311_v8 = vsub.f32 %v306_v5, %v309_v7  ;;  %s278_s29 = scalar_lea.vmem %s669_s0, %s632_s26  ;;  %s288_s11 = scalar_lea.vmem %s673_s4, %s632_s26 }
  0x11   : > { %v336_v24 = vld [vmem:[%s278_s29] sm:$0xff]  ;;  %v337_v25 = vld [vmem:[%s278_s29 + $0x8] sm:$0xff]  ;;  %v338_v26 = vld [vmem:[%s278_s29 + $0x10] sm:$0xff]  ;;  %s298_s14 = scalar_lea.vmem %s674_s5, %s632_s26 }
  0x12   : > { %v313_v9 = vadd.f32 1e-05, %v311_v8  ;;  %v339_v27 = vld [vmem:[%s278_s29 + $0x18] sm:$0xff]  ;;  %v340_v30 = vld [vmem:[%s278_s29 + $0x20] sm:$0xff]  ;;  %v341_v31 = vld [vmem:[%s278_s29 + $0x28] sm:$0xff] }
  0x13   : > { %v342_v32 = vld [vmem:[%s278_s29 + $0x30] sm:$0xff]  ;;  %v343_v33 = vld [vmem:[%s278_s29 + $0x38] sm:$0xff]  ;;  %v380_v45 = vld [vmem:[%s288_s11] sm:$0xff] }
  0x14   : > { %551 = vrsqrt.f32 %v313_v9  ;;  %v381_v47 = vld [vmem:[%s288_s11 + $0x8] sm:$0xff]  ;;  %v382_v49 = vld [vmem:[%s288_s11 + $0x10] sm:$0xff]  ;;  %v383_v51 = vld [vmem:[%s288_s11 + $0x18] sm:$0xff] }
  0x15   : > { %v384_v53 = vld [vmem:[%s288_s11 + $0x20] sm:$0xff]  ;;  %v385_v55 = vld [vmem:[%s288_s11 + $0x28] sm:$0xff]  ;;  %v386_v62 = vld [vmem:[%s288_s11 + $0x30] sm:$0xff] }
  0x16   : > { %v387_v63 = vld [vmem:[%s288_s11 + $0x38] sm:$0xff] }
  0x1e   : > { %v552_v16 = vpop.eup %551 }
  0x1f   : > { %v322_v17 = vrot.slane %v552_v16, %v321_v15 }
  0x21   : > { %v323_v18 = vcombine.high %v322_v17, %v322_v17 }
  0x23   : > { %v330_v20 = vrot.slane %v323_v18, %v321_v15 }
  0x25   : > { %v332_v22 = vmul.f32 %v330_v20, %v312_v19 }
  0x27   : > { %v334_v28 = vmul.f32 %v332_v22, %v306_v5  ;;  %v348_v29 = vrot.slane %v332_v22, %v347_v21 }
  0x29   : > { %v335_v34 = vsub.f32 %v333_v23, %v334_v28  ;;  %v350_v35 = vmul.f32 %v348_v29, %v336_v24  ;;  %v351_v36 = vmul.f32 %v348_v29, %v337_v25  ;;  %v352_v37 = vmul.f32 %v348_v29, %v338_v26 }
  0x2a   : > { %v353_v38 = vmul.f32 %v348_v29, %v339_v27  ;;  %v354_v39 = vmul.f32 %v348_v29, %v340_v30  ;;  %v355_v40 = vmul.f32 %v348_v29, %v341_v31  ;;  %v356_v41 = vmul.f32 %v348_v29, %v342_v32 }
  0x2b   : > { %v362_v42 = vrot.slane %v335_v34, %v347_v21  ;;  %v357_v43 = vmul.f32 %v348_v29, %v343_v33 }
  0x2d   : > { %v364_v44 = vadd.f32 %v362_v42, %v350_v35  ;;  %v365_v46 = vadd.f32 %v362_v42, %v351_v36  ;;  %v366_v48 = vadd.f32 %v362_v42, %v352_v37  ;;  %v367_v50 = vadd.f32 %v362_v42, %v353_v38 }
  0x2e   : > { %v368_v52 = vadd.f32 %v362_v42, %v354_v39  ;;  %v369_v54 = vadd.f32 %v362_v42, %v355_v40  ;;  %v370_v56 = vadd.f32 %v362_v42, %v356_v41  ;;  %v371_v57 = vadd.f32 %v362_v42, %v357_v43 }
  0x2f   : > { %v372_v58 = vmax.f32 %v364_v44, 0.0  ;;  %v373_v59 = vmax.f32 %v365_v46, 0.0  ;;  %v374_v60 = vmax.f32 %v366_v48, 0.0  ;;  %v375_v61 = vmax.f32 %v367_v50, 0.0 }
  0x30   : > { %v376_v0 = vmax.f32 %v368_v52, 0.0  ;;  %v377_v1 = vmax.f32 %v369_v54, 0.0  ;;  %v378_v2 = vmax.f32 %v370_v56, 0.0  ;;  %v379_v3 = vmax.f32 %v371_v57, 0.0 }
  0x31   : > { %v388_v4 = vadd.f32 %v380_v45, %v372_v58  ;;  %v389_v5 = vadd.f32 %v381_v47, %v373_v59  ;;  %v390_v6 = vadd.f32 %v382_v49, %v374_v60  ;;  %v391_v7 = vadd.f32 %v383_v51, %v375_v61 }
  0x32   : > { %v392_v8 = vadd.f32 %v384_v53, %v376_v0  ;;  %v393_v9 = vadd.f32 %v385_v55, %v377_v1  ;;  %v394_v10 = vadd.f32 %v386_v62, %v378_v2  ;;  %v395_v11 = vadd.f32 %v387_v63, %v379_v3 }
  0x33   : > { %397 = vst.msk [vmem:[%s298_s14] sm:$0xff] %vm396_vm1, %v388_v4  ;;  %398 = vst.msk [vmem:[%s298_s14 + $0x8] sm:$0xff] %vm396_vm1, %v389_v5 }
  0x34   : > { %399 = vst.msk [vmem:[%s298_s14 + $0x10] sm:$0xff] %vm396_vm1, %v390_v6  ;;  %400 = vst.msk [vmem:[%s298_s14 + $0x18] sm:$0xff] %vm396_vm1, %v391_v7 }
  0x35   : > { %401 = vst.msk [vmem:[%s298_s14 + $0x20] sm:$0xff] %vm396_vm1, %v392_v8  ;;  %402 = vst.msk [vmem:[%s298_s14 + $0x28] sm:$0xff] %vm396_vm1, %v393_v9 }
  0x36   : > { %403 = vst.msk [vmem:[%s298_s14 + $0x30] sm:$0xff] %vm396_vm1, %v394_v10  ;;  %404 = vst.msk [vmem:[%s298_s14 + $0x38] sm:$0xff] %vm396_vm1, %v395_v11 }
  0x37 PF: > { %s15_s20 = sadd.s32 1, %s575_s20   ;;  %s675_s18 = smov %s571_s19 }
  0x38   : > { %p12_p5 = scmp.ge.s32.totalorder %s15_s20, 4   ;;  %s676_s19 = smov %s678_s21 }
  0x3a   :  { %14 = sbr.rel (!%p12_p5) target bundleno = 2 (0x2), region = 73 }

// kernel: genet_gray_forward.27
= control target key start
LH: loop header
LB: loop body
LE: loop exit
PB: predicated region body
PF: predicated region fallthrough
CT: control target
= control target key end

     0   :  { %s1254_s15 = smov 0   ;;  %s1636_s0 = inlined_call_operand.vmem [shape: f32[2,10,10,32], index: 0, kind: input, shape index: {}]   ;;  %s1637_s1 = inlined_call_operand.vmem [shape: bf16[288,16], index: 1, kind: input, shape index: {}]   ;;  %s1638_s2 = inlined_call_operand.vmem [shape: f32[1,16], index: 2, kind: input, shape index: {}]   ;;  %s1639_s3 = inlined_call_operand.vmem [shape: f32[2,8,8,16], index: 3, kind: output, shape index: {0}]   ;;  %s1640_s4 = inlined_call_operand.vmem [shape: f32[2,2,16], index: 4, kind: output, shape index: {1}]  }
   0x1 LB: > { %s1031_s16 = sadd.s32 4294967295, %s1224_s15   ;;  %p1035_p0 = scmp.ge.s32.totalorder %s1224_s15, 1  ;;  %s1224_s15 = sphi %s1254_s15, %s15_s15  }
   0x2   : > { %p165_p1 = scmp.lt.s32.totalorder %s1224_s15, 3 }
   0x4   : > { %p166_p2 = pnand %p1035_p0, %p165_p1 }
   0x5   : > { %p195_p3 = scmp.lt.s32.totalorder (!%p166_p2), %s1031_s16, 1  ;;  %v1200_v0 = vld [vmem:[%s1637_s1 + $0x40] sm:$0xff] (!%p166_p2)   ;;  %v1202_v2 = vld [vmem:[%s1637_s1 + $0x48] sm:$0xff] (!%p166_p2)   ;;  %vm255_vm0 = vcmask (!%p166_p2), 261120   ;;  %v1204_v4 = vld [vmem:[%s1637_s1 + $0x50] sm:$0xff] (!%p166_p2)   ;;  %s1226_s5 = smov (!%p166_p2), 32  }
   0x6   : > { %169 = sbr.rel (%p166_p2) target bundleno = 478 (0x1de), region = 32  ;;  %v1201_v1 = vld [vmem:[%s1637_s1] sm:$0xff] (!%p166_p2)   ;;  %1114 = vmatprep.subr.bf16.mxu0 (!%p166_p2), %v1200_v0  ;;  %1172 = vmatprep.subr.bf16.mxu1 (!%p166_p2), %v1200_v0  ;;  %v1203_v3 = vld [vmem:[%s1637_s1 + $0x8] sm:$0xff] (!%p166_p2)   ;;  %v1205_v12 = vld [vmem:[%s1637_s1 + $0x10] sm:$0xff] (!%p166_p2)   ;;  %s1227_s8 = smov (!%p166_p2), 64   ;;  %vm304_vm1 = vcmask (!%p166_p2), 523520  }
   0x7   : > { %1115 = vmatpush3.bf16.msra.mxu0 (!%p166_p2), %v1201_v1  ;;  %1180 = vmatpush3.bf16.msra.mxu1 (!%p166_p2), %v1201_v1  ;;  %v1206_v32 = vld [vmem:[%s1637_s1 + $0x58] sm:$0xff] (!%p166_p2)   ;;  %v1208_v34 = vld [vmem:[%s1637_s1 + $0x60] sm:$0xff] (!%p166_p2)   ;;  %v1210_v36 = vld [vmem:[%s1637_s1 + $0x68] sm:$0xff] (!%p166_p2)   ;;  %s1228_s21 = smov (!%p166_p2), 96   ;;  %vm353_vm2 = vcmask (!%p166_p2), 785920   ;;  %vm403_vm3 = vcmask (!%p166_p2), 1048320  }
   0x8   : > { %1116 = vmatprep.subr.bf16.mxu0 (!%p166_p2), %v1202_v2  ;;  %1173 = vmatprep.subr.bf16.mxu1 (!%p166_p2), %v1202_v2  ;;  %v1207_v33 = vld [vmem:[%s1637_s1 + $0x18] sm:$0xff] (!%p166_p2)   ;;  %v1209_v35 = vld [vmem:[%s1637_s1 + $0x20] sm:$0xff] (!%p166_p2)   ;;  %v1211_v37 = vld [vmem:[%s1637_s1 + $0x28] sm:$0xff] (!%p166_p2)   ;;  %vm881_vm4 = vcmask (!%p166_p2), 130048   ;;  %vm942_vm5 = vcmask (!%p166_p2), 122880  }
   0x9   : > { %v1212_v38 = vld [vmem:[%s1637_s1 + $0x70] sm:$0xff] (!%p166_p2)   ;;  %v1214_v40 = vld [vmem:[%s1637_s1 + $0x78] sm:$0xff] (!%p166_p2)   ;;  %v1473_v45 = vld [vmem:[%s1637_s1 + $0x80] sm:$0xff] (!%p166_p2)  }
   0xa   : > { %v1213_v39 = vld [vmem:[%s1637_s1 + $0x30] sm:$0xff] (!%p166_p2)   ;;  %v1215_v41 = vld [vmem:[%s1637_s1 + $0x38] sm:$0xff] (!%p166_p2)  }
   0xb   : > { %1117 = vmatpush3.bf16.msra.mxu0 (!%p166_p2), %v1203_v3  ;;  %1181 = vmatpush3.bf16.msra.mxu1 (!%p166_p2), %v1203_v3 }
   0xc   : > { %1118 = vmatprep.subr.bf16.mxu0 (!%p166_p2), %v1204_v4  ;;  %1174 = vmatprep.subr.bf16.mxu1 (!%p166_p2), %v1204_v4 }
   0xd   : > { %s1642_s16 = smov (!%p195_p3, %s1031_s16), 1 }
   0xe   : > { %s1188_s23 = smul.u32 160, %s1642_s16  ;;  %s1113_s12 = sshll.u32 %s1642_s16, 6 }
   0xf   : > { %1119 = vmatpush3.bf16.msra.mxu0 %v1205_v12  ;;  %1182 = vmatpush3.bf16.msra.mxu1 %v1205_v12  ;;  %s1595_s17 = scalar_lea.vmem %s1639_s3, %s1113_s12  ;;  %s1039_s18 = sshll.u32 %s1642_s16, 1 }
  0x10   : > { %s1280_s28 = scalar_lea.vmem %s1636_s0, %s1188_s23  ;;  %1120 = vmatprep.subr.bf16.mxu0 %v1206_v32  ;;  %1175 = vmatprep.subr.bf16.mxu1 %v1206_v32 }
  0x11   : > { %v1286_v5 = vld [vmem:[%s1280_s28 + $0x12] sm:$0xff]  ;;  %v264_v6 = vld [vmem:[%s1280_s28 + $0x1] sm:$0xff] }
  0x12   : > { %v1290_v7 = vld [vmem:[%s1280_s28 + $0x22] sm:$0xff]  ;;  %444 = vrot.lane.b32.xlu0 %v1286_v5, %s1226_s5  ;;  %280 = vrot.lane.b32.xlu1 %v264_v6, %s1226_s5  ;;  %v265_v8 = vld [vmem:[%s1280_s28 + $0x11] sm:$0xff] }
  0x13   : > { %v1297_v9 = vld [vmem:[%s1280_s28 + $0x20] sm:$0xff]  ;;  %581 = vst.msk [vmem:[#allocation2 + $0x10] sm:$0xff] %vm255_vm0, %v1290_v7  ;;  %v1302_v10 = vld [vmem:[%s1280_s28 + $0x30] sm:$0xff]  ;;  %420 = vst.msk [vmem:[#allocation2 + $0x8] sm:$0xff] %vm255_vm0, %v265_v8  ;;  %1121 = vmatpush3.bf16.msra.mxu0 %v1207_v33  ;;  %1183 = vmatpush3.bf16.msra.mxu1 %v1207_v33 }
  0x14   : > { %v1305_v11 = vld [vmem:[%s1280_s28 + $0x21] sm:$0xff]  ;;  %258 = vst.msk [vmem:[#allocation2 + $0x30] sm:$0xff] %vm255_vm0, %v1297_v9  ;;  %v1314_v13 = vld [vmem:[%s1280_s28 + $0x31] sm:$0xff]  ;;  %259 = vst.msk [vmem:[#allocation2 + $0x48] sm:$0xff] %vm255_vm0, %v1302_v10  ;;  %1122 = vmatprep.subr.bf16.mxu0 %v1208_v34  ;;  %1176 = vmatprep.subr.bf16.mxu1 %v1208_v34 }
  0x15   : > { %v1317_v14 = vld [vmem:[%s1280_s28 + $0x10] sm:$0xff]  ;;  %421 = vst.msk [vmem:[#allocation2 + $0x20] sm:$0xff] %vm255_vm0, %v1305_v11  ;;  %v1327_v16 = vld [vmem:[%s1280_s28 + $0x82] sm:$0xff]  ;;  %422 = vst.msk [vmem:[#allocation2 + $0x38] sm:$0xff] %vm255_vm0, %v1314_v13 }
  0x16   : > { %v1320_v15 = vld [vmem:[%s1280_s28 + $0x72] sm:$0xff]  ;;  %v1330_v17 = vld [vmem:[%s1280_s28 + $0x61] sm:$0xff]  ;;  %257 = vst.msk [vmem:[#allocation2 + $0x18] sm:$0xff] %vm255_vm0, %v1317_v14  ;;  %446 = vrot.lane.b32.xlu0 %v1290_v7, %s1226_s5  ;;  %282 = vrot.lane.b32.xlu1 %v265_v8, %s1226_s5  ;;  %587 = vst.msk [vmem:[#allocation2 + $0xa0] sm:$0xff] %vm255_vm0, %v1327_v16 }
  0x17   : > { %v1333_v18 = vld [vmem:[%s1280_s28 + $0x71] sm:$0xff]  ;;  %586 = vst.msk [vmem:[#allocation2 + $0x88] sm:$0xff] %vm255_vm0, %v1320_v15  ;;  %425 = vst.msk [vmem:[#allocation2 + $0x80] sm:$0xff] %vm255_vm0, %v1330_v17  ;;  %v1351_v19 = vld [vmem:[%s1280_s28 + $0x62] sm:$0xff]  ;;  %1123 = vmatpush3.bf16.msra.mxu0 %v1209_v35  ;;  %1184 = vmatpush3.bf16.msra.mxu1 %v1209_v35 }
  0x18   : > { %426 = vst.msk [vmem:[#allocation2 + $0x98] sm:$0xff] %vm255_vm0, %v1333_v18  ;;  %v1354_v20 = vld [vmem:[%s1280_s28 + $0x81] sm:$0xff]  ;;  %v1357_v21 = vld [vmem:[%s1280_s28 + $0x70] sm:$0xff]  ;;  %585 = vst.msk [vmem:[#allocation2 + $0x70] sm:$0xff] %vm255_vm0, %v1351_v19  ;;  %1124 = vmatprep.subr.bf16.mxu0 %v1210_v36  ;;  %1177 = vmatprep.subr.bf16.mxu1 %v1210_v36 }
  0x19   : > { %v1360_v22 = vld [vmem:[%s1280_s28 + $0x32] sm:$0xff]  ;;  %v1363_v23 = vld [vmem:[%s1280_s28 + $0x42] sm:$0xff]  ;;  %427 = vst.msk [vmem:[#allocation2 + $0xb0] sm:$0xff] %vm255_vm0, %v1354_v20  ;;  %263 = vst.msk [vmem:[#allocation2 + $0xa8] sm:$0xff] %vm255_vm0, %v1357_v21 }
  0x1a   : > { %v313_v24 = vld [vmem:[%s1280_s28 + $0x2] sm:$0xff]  ;;  %v1374_v26 = vld [vmem:[%s1280_s28 + $0x50] sm:$0xff]  ;;  %582 = vst.msk [vmem:[#allocation2 + $0x28] sm:$0xff] %vm255_vm0, %v1360_v22  ;;  %583 = vst.msk [vmem:[#allocation2 + $0x40] sm:$0xff] %vm255_vm0, %v1363_v23  ;;  %493 = vrot.lane.b32.xlu0 %v1297_v9, %s1227_s8  ;;  %495 = vrot.lane.b32.xlu1 %v1302_v10, %s1227_s8 }
  0x1b   : > { %v1371_v25 = vld [vmem:[%s1280_s28 + $0x40] sm:$0xff]  ;;  %v1390_v28 = vld [vmem:[%s1280_s28 + $0x51] sm:$0xff]  ;;  %261 = vst.msk [vmem:[#allocation2 + $0x78] sm:$0xff] %vm255_vm0, %v1374_v26  ;;  %1125 = vmatpush3.bf16.msra.mxu0 %v1211_v37  ;;  %1185 = vmatpush3.bf16.msra.mxu1 %v1211_v37 }
  0x1c   : > { %v1377_v27 = vld [vmem:[%s1280_s28 + $0x41] sm:$0xff]  ;;  %v1393_v29 = vld [vmem:[%s1280_s28 + $0x52] sm:$0xff]  ;;  %260 = vst.msk [vmem:[#allocation2 + $0x60] sm:$0xff] %vm255_vm0, %v1371_v25  ;;  %424 = vst.msk [vmem:[#allocation2 + $0x68] sm:$0xff] %vm255_vm0, %v1390_v28  ;;  %1126 = vmatprep.subr.bf16.mxu0 %v1212_v38  ;;  %1178 = vmatprep.subr.bf16.mxu1 %v1212_v38 }
  0x1d   : > { %423 = vst.msk [vmem:[#allocation2 + $0x50] sm:$0xff] %vm255_vm0, %v1377_v27  ;;  %v1402_v30 = vld [vmem:[%s1280_s28 + $0x60] sm:$0xff]  ;;  %584 = vst.msk [vmem:[#allocation2 + $0x58] sm:$0xff] %vm255_vm0, %v1393_v29  ;;  %v1071_v43 = vld [vmem:[%s1280_s28 + $0x90] sm:$0xff] }
  0x1e   : > { %v247_v31 = vld [vmem:[%s1280_s28] sm:$0xff]  ;;  %262 = vst.msk [vmem:[#allocation2 + $0x90] sm:$0xff] %vm255_vm0, %v1402_v30  ;;  %329 = vrot.lane.b32.xlu0 %v313_v24, %s1227_s8  ;;  %331 = vrot.lane.b32.xlu1 %v1286_v5, %s1227_s8  ;;  %v1079_v44 = vld [vmem:[%s1280_s28 + $0x91] sm:$0xff]  ;;  %v606_v32 = vld [vmem:[#allocation2 + $0x88] sm:$0xff] }
  0x1f   : > { %256 = vst.msk [vmem:[#allocation2] sm:$0xff] %vm255_vm0, %v247_v31  ;;  %1127 = vmatpush3.bf16.msra.mxu0 %v1213_v39  ;;  %1186 = vmatpush3.bf16.msra.mxu1 %v1213_v39  ;;  %v1070_v42 = vld [vmem:[%s1280_s28 + $0x80] sm:$0xff]  ;;  %v1087_v46 = vld [vmem:[%s1280_s28 + $0x92] sm:$0xff] }
  0x20   : > { %1128 = vmatprep.subr.bf16.mxu0 %v1214_v40  ;;  %1179 = vmatprep.subr.bf16.mxu1 %v1214_v40  ;;  %588 = vst.msk [vmem:[#allocation2 + $0xb8] sm:$0xff] %vm255_vm0, %v1087_v46  ;;  %v603_v31 = vld [vmem:[#allocation2 + $0x70] sm:$0xff]  ;;  %v609_v39 = vld [vmem:[#allocation2 + $0xa0] sm:$0xff] }
  0x21   : > { %v621_v36 = vpack.c.bf16 %v606_v32, %v603_v31 }
  0x22   : > { %541 = vrot.lane.b32.xlu0 %v1305_v11, %s1228_s21  ;;  %543 = vrot.lane.b32.xlu1 %v1314_v13, %s1228_s21 }
  0x23   : > { %1129 = vmatpush3.bf16.msra.mxu0 %v1215_v41  ;;  %1187 = vmatpush3.bf16.msra.mxu1 %v1215_v41 }
  0x24   : > { %1160 = vmatprep.subr.bf16.mxu1 %v1473_v45 }
  0x26   : > { %379 = vrot.lane.b32.xlu0 %v1317_v14, %s1228_s21  ;;  %381 = vrot.lane.b32.xlu1 %v1297_v9, %s1228_s21 }
  0x27   : > { %v612_v40 = vld [vmem:[#allocation2 + $0xb8] sm:$0xff] }
  0x28   : > { %v624_v41 = vpack.c.bf16 %v612_v40, %v609_v39 }
  0x2a   : > { %456 = vrot.lane.b32.xlu0 %v1320_v15, %s1226_s5  ;;  %458 = vrot.lane.b32.xlu1 %v1327_v16, %s1226_s5 }
  0x2e   : > { %292 = vrot.lane.b32.xlu0 %v1330_v17, %s1226_s5  ;;  %294 = vrot.lane.b32.xlu1 %v1333_v18, %s1226_s5 }
  0x32   : > { %505 = vrot.lane.b32.xlu0 %v1070_v42, %s1227_s8  ;;  %507 = vrot.lane.b32.xlu1 %v1071_v43, %s1227_s8 }
  0x36   : > { %341 = vrot.lane.b32.xlu0 %v1351_v19, %s1227_s8  ;;  %343 = vrot.lane.b32.xlu1 %v1320_v15, %s1227_s8 }
  0x3a   : > { %553 = vrot.lane.b32.xlu0 %v1354_v20, %s1228_s21  ;;  %555 = vrot.lane.b32.xlu1 %v1079_v44, %s1228_s21 }
  0x3e   : > { %391 = vrot.lane.b32.xlu0 %v1357_v21, %s1228_s21  ;;  %393 = vrot.lane.b32.xlu1 %v1070_v42, %s1228_s21 }
  0x42   : > { %448 = vrot.lane.b32.xlu0 %v1360_v22, %s1226_s5  ;;  %450 = vrot.lane.b32.xlu1 %v1363_v23, %s1226_s5 }
  0x46   : > { %284 = vrot.lane.b32.xlu0 %v1305_v11, %s1226_s5  ;;  %286 = vrot.lane.b32.xlu1 %v1314_v13, %s1226_s5 }
  0x4a   : > { %497 = vrot.lane.b32.xlu0 %v1371_v25, %s1227_s8  ;;  %499 = vrot.lane.b32.xlu1 %v1374_v26, %s1227_s8 }
  0x4e   : > { %333 = vrot.lane.b32.xlu0 %v1290_v7, %s1227_s8  ;;  %335 = vrot.lane.b32.xlu1 %v1360_v22, %s1227_s8 }
  0x52   : > { %545 = vrot.lane.b32.xlu0 %v1377_v27, %s1228_s21  ;;  %547 = vrot.lane.b32.xlu1 %v1390_v28, %s1228_s21 }
  0x56   : > { %383 = vrot.lane.b32.xlu0 %v1302_v10, %s1228_s21  ;;  %385 = vrot.lane.b32.xlu1 %v1371_v25, %s1228_s21 }
  0x5a   : > { %452 = vrot.lane.b32.xlu0 %v1393_v29, %s1226_s5  ;;  %454 = vrot.lane.b32.xlu1 %v1351_v19, %s1226_s5  ;;  %v594_v19 = vld [vmem:[#allocation2 + $0x28] sm:$0xff] }
  0x5e   : > { %288 = vrot.lane.b32.xlu0 %v1377_v27, %s1226_s5  ;;  %290 = vrot.lane.b32.xlu1 %v1390_v28, %s1226_s5 }
  0x62   : > { %501 = vrot.lane.b32.xlu0 %v1402_v30, %s1227_s8  ;;  %503 = vrot.lane.b32.xlu1 %v1357_v21, %s1227_s8 }
  0x66   : > { %337 = vrot.lane.b32.xlu0 %v1363_v23, %s1227_s8  ;;  %339 = vrot.lane.b32.xlu1 %v1393_v29, %s1227_s8  ;;  %v597_v29 = vld [vmem:[#allocation2 + $0x40] sm:$0xff] }
  0x6a   : > { %549 = vrot.lane.b32.xlu0 %v1330_v17, %s1228_s21  ;;  %551 = vrot.lane.b32.xlu1 %v1333_v18, %s1228_s21  ;;  %v591_v18 = vld [vmem:[#allocation2 + $0x10] sm:$0xff] }
  0x6b   : > { %v615_v24 = vpack.c.bf16 %v594_v19, %v591_v18 }
  0x6e   : > { %387 = vrot.lane.b32.xlu0 %v1374_v26, %s1228_s21  ;;  %389 = vrot.lane.b32.xlu1 %v1402_v30, %s1228_s21  ;;  %v1217_v26 = vld [vmem:[%s1637_s1 + $0x88] sm:$0xff]   ;;  %v600_v30 = vld [vmem:[#allocation2 + $0x58] sm:$0xff]  ;;  %s208_s21 = scalar_lea.vmem %s1640_s4, %s1039_s18 }
  0x6f   : > { %v618_v33 = vpack.c.bf16 %v600_v30, %v597_v29 }
  0x84   : > { %v445_v47 = vpop.permute.xlu0 %444  ;;  %v281_v48 = vpop.permute.xlu1 %280 }
  0x85   : > { %468 = vst.msk [vmem:[#allocation2 + $0x8] sm:$0xff] %vm304_vm1, %v445_v47  ;;  %305 = vst.msk [vmem:[#allocation2] sm:$0xff] %vm304_vm1, %v281_v48 }
  0x88   : > { %v447_v49 = vpop.permute.xlu0 %446  ;;  %v283_v50 = vpop.permute.xlu1 %282 }
  0x89   : > { %469 = vst.msk [vmem:[#allocation2 + $0x20] sm:$0xff] %vm304_vm1, %v447_v49  ;;  %306 = vst.msk [vmem:[#allocation2 + $0x18] sm:$0xff] %vm304_vm1, %v283_v50 }
  0x8c   : > { %v494_v51 = vpop.permute.xlu0 %493  ;;  %v496_v52 = vpop.permute.xlu1 %495 }
  0x8d   : > { %517 = vst.msk [vmem:[#allocation2 + $0x8] sm:$0xff] %vm353_vm2, %v494_v51  ;;  %518 = vst.msk [vmem:[#allocation2 + $0x20] sm:$0xff] %vm353_vm2, %v496_v52 }
  0x90   : > { %v330_v53 = vpop.permute.xlu0 %329  ;;  %v332_v54 = vpop.permute.xlu1 %331 }
  0x91   : > { %354 = vst.msk [vmem:[#allocation2] sm:$0xff] %vm353_vm2, %v330_v53  ;;  %355 = vst.msk [vmem:[#allocation2 + $0x18] sm:$0xff] %vm353_vm2, %v332_v54 }
  0x94   : > { %v542_v55 = vpop.permute.xlu0 %541  ;;  %v544_v56 = vpop.permute.xlu1 %543 }
  0x95   : > { %565 = vst.msk [vmem:[#allocation2 + $0x8] sm:$0xff] %vm403_vm3, %v542_v55  ;;  %566 = vst.msk [vmem:[#allocation2 + $0x20] sm:$0xff] %vm403_vm3, %v544_v56 }
  0x98   : > { %v380_v57 = vpop.permute.xlu0 %379  ;;  %v382_v58 = vpop.permute.xlu1 %381 }
  0x99   : > { %404 = vst.msk [vmem:[#allocation2] sm:$0xff] %vm403_vm3, %v380_v57  ;;  %405 = vst.msk [vmem:[#allocation2 + $0x18] sm:$0xff] %vm403_vm3, %v382_v58 }
  0x9c   : > { %v457_v59 = vpop.permute.xlu0 %456  ;;  %v459_v60 = vpop.permute.xlu1 %458  ;;  %v590_v61 = vld [vmem:[#allocation2 + $0x8] sm:$0xff]  ;;  %v593_v62 = vld [vmem:[#allocation2 + $0x20] sm:$0xff] }
  0x9d   : > { %474 = vst.msk [vmem:[#allocation2 + $0x98] sm:$0xff] %vm304_vm1, %v457_v59  ;;  %475 = vst.msk [vmem:[#allocation2 + $0xb0] sm:$0xff] %vm304_vm1, %v459_v60  ;;  %v614_v63 = vpack.c.bf16 %v593_v62, %v590_v61 }
  0x9f   : > { %783 = vmatprep.mubr.bf16.mxu0 %v614_v63 }
  0xa0   : > { %v293_v0 = vpop.permute.xlu0 %292  ;;  %v295_v1 = vpop.permute.xlu1 %294  ;;  %v589_v2 = vld [vmem:[#allocation2] sm:$0xff]  ;;  %v592_v3 = vld [vmem:[#allocation2 + $0x18] sm:$0xff] }
  0xa1   : > { %311 = vst.msk [vmem:[#allocation2 + $0x90] sm:$0xff] %vm304_vm1, %v293_v0  ;;  %312 = vst.msk [vmem:[#allocation2 + $0xa8] sm:$0xff] %vm304_vm1, %v295_v1  ;;  %v613_v4 = vpack.c.bf16 %v592_v3, %v589_v2 }
  0xa3   : > { %784 = vmatmul.mubr.bf16.vlgmr.msra.gmra.mrb[0].mxu0 %v613_v4 }
  0xa4   : > { %v506_v5 = vpop.permute.xlu0 %505  ;;  %v508_v6 = vpop.permute.xlu1 %507 }
  0xa5   : > { %523 = vst.msk [vmem:[#allocation2 + $0x98] sm:$0xff] %vm353_vm2, %v506_v5  ;;  %524 = vst.msk [vmem:[#allocation2 + $0xb0] sm:$0xff] %vm353_vm2, %v508_v6 }
  0xa8   : > { %v342_v7 = vpop.permute.xlu0 %341  ;;  %v344_v8 = vpop.permute.xlu1 %343 }
  0xa9   : > { %360 = vst.msk [vmem:[#allocation2 + $0x90] sm:$0xff] %vm353_vm2, %v342_v7  ;;  %361 = vst.msk [vmem:[#allocation2 + $0xa8] sm:$0xff] %vm353_vm2, %v344_v8 }
  0xac   : > { %v554_v9 = vpop.permute.xlu0 %553  ;;  %v556_v10 = vpop.permute.xlu1 %555 }
  0xad   : > { %571 = vst.msk [vmem:[#allocation2 + $0x98] sm:$0xff] %vm403_vm3, %v554_v9  ;;  %572 = vst.msk [vmem:[#allocation2 + $0xb0] sm:$0xff] %vm403_vm3, %v556_v10 }
  0xb0   : > { %v392_v11 = vpop.permute.xlu0 %391  ;;  %v394_v12 = vpop.permute.xlu1 %393 }
  0xb1   : > { %410 = vst.msk [vmem:[#allocation2 + $0x90] sm:$0xff] %vm403_vm3, %v392_v11  ;;  %411 = vst.msk [vmem:[#allocation2 + $0xa8] sm:$0xff] %vm403_vm3, %v394_v12 }
  0xb4   : > { %v449_v13 = vpop.permute.xlu0 %448  ;;  %v451_v14 = vpop.permute.xlu1 %450  ;;  %v608_v15 = vld [vmem:[#allocation2 + $0x98] sm:$0xff]  ;;  %v611_v16 = vld [vmem:[#allocation2 + $0xb0] sm:$0xff] }
  0xb5   : > { %470 = vst.msk [vmem:[#allocation2 + $0x38] sm:$0xff] %vm304_vm1, %v449_v13  ;;  %471 = vst.msk [vmem:[#allocation2 + $0x50] sm:$0xff] %vm304_vm1, %v451_v14  ;;  %v623_v17 = vpack.c.bf16 %v611_v16, %v608_v15  ;;  %v1088_v16 = vld [vmem:[%s1638_s2] ss:$0 sm:$0xff] }
  0xb7   : > { %807 = vmatprep.mubr.bf16.mxu1 %v623_v17 }
  0xb8   : > { %v285_v20 = vpop.permute.xlu0 %284  ;;  %v287_v21 = vpop.permute.xlu1 %286  ;;  %v607_v22 = vld [vmem:[#allocation2 + $0x90] sm:$0xff]  ;;  %v610_v23 = vld [vmem:[#allocation2 + $0xa8] sm:$0xff] }
  0xb9   : > { %307 = vst.msk [vmem:[#allocation2 + $0x30] sm:$0xff] %vm304_vm1, %v285_v20  ;;  %308 = vst.msk [vmem:[#allocation2 + $0x48] sm:$0xff] %vm304_vm1, %v287_v21  ;;  %v622_v25 = vpack.c.bf16 %v610_v23, %v607_v22 }
  0xbb   : > { %808 = vmatmul.mubr.bf16.vlgmr.msra.gmra.mrb[0].mxu1 %v622_v25 }
  0xbc   : > { %v498_v27 = vpop.permute.xlu0 %497  ;;  %v500_v28 = vpop.permute.xlu1 %499  ;;  %1161 = vmatpush3.bf16.msra.mxu1 %v1473_v45  ;;  %1164 = vmatprep.mubr.msk.bf16.mxu1 %vm255_vm0, %v615_v24 }
  0xbd   : > { %519 = vst.msk [vmem:[#allocation2 + $0x38] sm:$0xff] %vm353_vm2, %v498_v27  ;;  %520 = vst.msk [vmem:[#allocation2 + $0x50] sm:$0xff] %vm353_vm2, %v500_v28  ;;  %1162 = vmatprep.subr.bf16.mxu1 %v1217_v26 }
  0xc0   : > { %v334_v34 = vpop.permute.xlu0 %333  ;;  %v336_v35 = vpop.permute.xlu1 %335  ;;  %1163 = vmatpush3.bf16.msra.mxu1 %v1217_v26 }
  0xc1   : > { %356 = vst.msk [vmem:[#allocation2 + $0x30] sm:$0xff] %vm353_vm2, %v334_v34  ;;  %357 = vst.msk [vmem:[#allocation2 + $0x48] sm:$0xff] %vm353_vm2, %v336_v35 }
  0xc3   : > { %1165 = vmatmul.mubr.msk.bf16.vlgmr.msra.gmra.mrb[4].mxu1 %vm255_vm0, %v618_v33 }
  0xc4   : > { %v546_v37 = vpop.permute.xlu0 %545  ;;  %v548_v38 = vpop.permute.xlu1 %547  ;;  %1168 = vmatprep.mubr.msk.bf16.mxu1 %vm255_vm0, %v621_v36 }
  0xc5   : > { %567 = vst.msk [vmem:[#allocation2 + $0x38] sm:$0xff] %vm403_vm3, %v546_v37  ;;  %568 = vst.msk [vmem:[#allocation2 + $0x50] sm:$0xff] %vm403_vm3, %v548_v38 }
  0xc8   : > { %v384_v42 = vpop.permute.xlu0 %383  ;;  %v386_v43 = vpop.permute.xlu1 %385 }
  0xc9   : > { %406 = vst.msk [vmem:[#allocation2 + $0x30] sm:$0xff] %vm403_vm3, %v384_v42  ;;  %407 = vst.msk [vmem:[#allocation2 + $0x48] sm:$0xff] %vm403_vm3, %v386_v43 }
  0xcb   : > { %1169 = vmatmul.mubr.msk.bf16.gmra.mrb[8].mxu1 %vm255_vm0, %v624_v41 }
  0xcc   : > { %v453_v44 = vpop.permute.xlu0 %452  ;;  %v455_v45 = vpop.permute.xlu1 %454  ;;  %v596_v46 = vld [vmem:[#allocation2 + $0x38] sm:$0xff]  ;;  %v599_v47 = vld [vmem:[#allocation2 + $0x50] sm:$0xff] }
  0xcd   : > { %472 = vst.msk [vmem:[#allocation2 + $0x68] sm:$0xff] %vm304_vm1, %v453_v44  ;;  %473 = vst.msk [vmem:[#allocation2 + $0x80] sm:$0xff] %vm304_vm1, %v455_v45  ;;  %v617_v48 = vpack.c.bf16 %v599_v47, %v596_v46 }
  0xcf   : > { %791 = vmatprep.mubr.bf16.mxu0 %v617_v48 }
  0xd0   : > { %v289_v49 = vpop.permute.xlu0 %288  ;;  %v291_v50 = vpop.permute.xlu1 %290  ;;  %v595_v51 = vld [vmem:[#allocation2 + $0x30] sm:$0xff]  ;;  %v598_v52 = vld [vmem:[#allocation2 + $0x48] sm:$0xff] }
  0xd1   : > { %309 = vst.msk [vmem:[#allocation2 + $0x60] sm:$0xff] %vm304_vm1, %v289_v49  ;;  %310 = vst.msk [vmem:[#allocation2 + $0x78] sm:$0xff] %vm304_vm1, %v291_v50  ;;  %v616_v53 = vpack.c.bf16 %v598_v52, %v595_v51 }
  0xd3   : > { %792 = vmatmul.mubr.bf16.gmra.mrb[4].mxu0 %v616_v53 }
  0xd4   : > { %v502_v54 = vpop.permute.xlu0 %501  ;;  %v504_v55 = vpop.permute.xlu1 %503 }
  0xd5   : > { %521 = vst.msk [vmem:[#allocation2 + $0x68] sm:$0xff] %vm353_vm2, %v502_v54  ;;  %522 = vst.msk [vmem:[#allocation2 + $0x80] sm:$0xff] %vm353_vm2, %v504_v55 }
  0xd8   : > { %v338_v56 = vpop.permute.xlu0 %337  ;;  %v340_v57 = vpop.permute.xlu1 %339 }
  0xd9   : > { %358 = vst.msk [vmem:[#allocation2 + $0x60] sm:$0xff] %vm353_vm2, %v338_v56  ;;  %359 = vst.msk [vmem:[#allocation2 + $0x78] sm:$0xff] %vm353_vm2, %v340_v57 }
  0xdc   : > { %v550_v58 = vpop.permute.xlu0 %549  ;;  %v552_v59 = vpop.permute.xlu1 %551 }
  0xdd   : > { %569 = vst.msk [vmem:[#allocation2 + $0x68] sm:$0xff] %vm403_vm3, %v550_v58  ;;  %570 = vst.msk [vmem:[#allocation2 + $0x80] sm:$0xff] %vm403_vm3, %v552_v59 }
  0xe0   : > { %v388_v60 = vpop.permute.xlu0 %387  ;;  %v390_v61 = vpop.permute.xlu1 %389 }
  0xe1   : > { %408 = vst.msk [vmem:[#allocation2 + $0x60] sm:$0xff] %vm403_vm3, %v388_v60  ;;  %409 = vst.msk [vmem:[#allocation2 + $0x78] sm:$0xff] %vm403_vm3, %v390_v61 }
  0xe4   : > { %v602_v62 = vld [vmem:[#allocation2 + $0x68] sm:$0xff]  ;;  %v605_v63 = vld [vmem:[#allocation2 + $0x80] sm:$0xff] }
  0xe5   : > { %v620_v0 = vpack.c.bf16 %v605_v63, %v602_v62 }
  0xe7   : > { %799 = vmatprep.mubr.bf16.mxu0 %v620_v0 }
  0xe8   : > { %v601_v1 = vld [vmem:[#allocation2 + $0x60] sm:$0xff]  ;;  %v604_v2 = vld [vmem:[#allocation2 + $0x78] sm:$0xff] }
  0xe9   : > { %v619_v3 = vpack.c.bf16 %v604_v2, %v601_v1 }
  0xeb   : > { %800 = vmatmul.mubr.bf16.gmra.mrb[8].mxu0 %v619_v3 }
 0x176   : > { %v1130_v4 = vpop.f32.mrb[0].mxu0 }
 0x177   : > { %v1131_v5 = vpop.f32.mrb[1].mxu0 }
 0x178   : > { %v1132_v6 = vadd.f32 %v1131_v5, %v1130_v4  ;;  %v1133_v7 = vpop.f32.mrb[2].mxu0 }
 0x179   : > { %v1134_v8 = vpop.f32.mrb[3].mxu0 }
 0x17a   : > { %v1135_v9 = vadd.f32 %v1134_v8, %v1133_v7  ;;  %v786_v18 = vadd.f32 %v1132_v6, %v1088_v16 }
 0x17c   : > { %v789_v22 = vadd.f32 %v1135_v9, %v1088_v16 }
 0x18e   : > { %v1148_v10 = vpop.f32.mrb[0].mxu1 }
 0x18f   : > { %v1149_v11 = vpop.f32.mrb[1].mxu1 }
 0x190   : > { %v1150_v12 = vadd.f32 %v1149_v11, %v1148_v10  ;;  %v1151_v13 = vpop.f32.mrb[2].mxu1 }
 0x191   : > { %v1152_v14 = vpop.f32.mrb[3].mxu1 }
 0x192   : > { %v1153_v15 = vadd.f32 %v1152_v14, %v1151_v13  ;;  %v810_v30 = vadd.f32 %v1150_v12, %v1088_v16 }
 0x194   : > { %v813_v37 = vadd.f32 %v1153_v15, %v1088_v16 }
 0x196   : > { %v1166_v17 = vpop.f32.mrb[4].mxu1 }
 0x197   : > { %v850_v19 = vpop.f32.mrb[5].mxu1 }
 0x198   : > { %v851_v20 = vadd.f32 %v850_v19, %v786_v18  ;;  %v1167_v21 = vpop.f32.mrb[6].mxu1 }
 0x199   : > { %v853_v23 = vpop.f32.mrb[7].mxu1 }
 0x19a   : > { %v904_v24 = vmul.f32 %v851_v20, %v851_v20  ;;  %934 = vst.msk [vmem:[%s1595_s17] sm:$0xff] %vm881_vm4, %v851_v20  ;;  %v854_v25 = vadd.f32 %v853_v23, %v789_v22  ;;  %v882_v26 = vsel %vm881_vm4, %v851_v20, 0.0 }
 0x19c   : > { %v883_v27 = vsel %vm881_vm4, %v854_v25, 0.0  ;;  %v905_v28 = vmul.f32 %v854_v25, %v854_v25  ;;  %935 = vst.msk [vmem:[%s1595_s17 + $0x8] sm:$0xff] %vm881_vm4, %v854_v25  ;;  %v912_v31 = vsel %vm881_vm4, %v904_v24, 0.0 }
 0x19d   : > { %v884_v29 = vadd.f32 %v883_v27, %v882_v26 }
 0x19e   : > { %v913_v32 = vsel %vm881_vm4, %v905_v28, 0.0  ;;  %v1170_v33 = vpop.f32.mrb[8].mxu1 }
 0x19f   : > { %v914_v34 = vadd.f32 %v913_v32, %v912_v31  ;;  %v875_v35 = vadd.f32 %v1170_v33, %v810_v30  ;;  %v866_v36 = vpop.f32.mrb[9].mxu1 }
 0x1a0   : > { %v1171_v38 = vpop.f32.mrb[10].mxu1 }
 0x1a1   : > { %940 = vst.msk [vmem:[%s1595_s17 + $0x30] sm:$0xff] %vm881_vm4, %v875_v35  ;;  %v878_v39 = vadd.f32 %v1171_v38, %v813_v37  ;;  %v869_v40 = vpop.f32.mrb[11].mxu1  ;;  %v910_v10 = vmul.f32 %v875_v35, %v875_v35 }
 0x1a3   : > { %941 = vst.msk [vmem:[%s1595_s17 + $0x38] sm:$0xff] %vm881_vm4, %v878_v39  ;;  %v895_v22 = vsel %vm881_vm4, %v878_v39, 0.0 }
 0x1a6   : > { %v1136_v41 = vpop.f32.mrb[4].mxu0 }
 0x1a7   : > { %v1137_v42 = vpop.f32.mrb[5].mxu0 }
 0x1a8   : > { %v1138_v43 = vadd.f32 %v1137_v42, %v1136_v41  ;;  %v1139_v44 = vpop.f32.mrb[6].mxu0 }
 0x1a9   : > { %v1140_v45 = vpop.f32.mrb[7].mxu0 }
 0x1aa   : > { %v794_v46 = vadd.f32 %v1138_v43, %v1088_v16  ;;  %v1141_v47 = vadd.f32 %v1140_v45, %v1139_v44 }
 0x1ac   : > { %v859_v48 = vadd.f32 %v1166_v17, %v794_v46  ;;  %v797_v49 = vadd.f32 %v1141_v47, %v1088_v16  ;;  %v893_v17 = vsel %vm881_vm4, %v875_v35, 0.0 }
 0x1ae   : > { %v885_v50 = vsel %vm881_vm4, %v859_v48, 0.0  ;;  %v906_v51 = vmul.f32 %v859_v48, %v859_v48  ;;  %936 = vst.msk [vmem:[%s1595_s17 + $0x10] sm:$0xff] %vm881_vm4, %v859_v48  ;;  %v862_v52 = vadd.f32 %v1167_v21, %v797_v49  ;;  %v923_v21 = vsel %vm881_vm4, %v910_v10, 0.0 }
 0x1af   : > { %v886_v53 = vadd.f32 %v885_v50, %v884_v29 }
 0x1b0   : > { %v915_v54 = vsel %vm881_vm4, %v906_v51, 0.0  ;;  %v887_v55 = vsel %vm881_vm4, %v862_v52, 0.0  ;;  %v907_v56 = vmul.f32 %v862_v52, %v862_v52  ;;  %937 = vst.msk [vmem:[%s1595_s17 + $0x18] sm:$0xff] %vm881_vm4, %v862_v52 }
 0x1b1   : > { %v916_v57 = vadd.f32 %v915_v54, %v914_v34  ;;  %v888_v58 = vadd.f32 %v887_v55, %v886_v53 }
 0x1b2   : > { %v917_v59 = vsel %vm881_vm4, %v907_v56, 0.0 }
 0x1b3   : > { %v918_v60 = vadd.f32 %v917_v59, %v916_v57 }
 0x1be   : > { %v1142_v61 = vpop.f32.mrb[8].mxu0 }
 0x1bf   : > { %v1143_v62 = vpop.f32.mrb[9].mxu0 }
 0x1c0   : > { %v1144_v63 = vadd.f32 %v1143_v62, %v1142_v61  ;;  %v1145_v0 = vpop.f32.mrb[10].mxu0 }
 0x1c1   : > { %v1146_v1 = vpop.f32.mrb[11].mxu0 }
 0x1c2   : > { %v802_v2 = vadd.f32 %v1144_v63, %v1088_v16  ;;  %v1147_v3 = vadd.f32 %v1146_v1, %v1145_v0 }
 0x1c4   : > { %v867_v4 = vadd.f32 %v866_v36, %v802_v2  ;;  %v805_v5 = vadd.f32 %v1147_v3, %v1088_v16  ;;  %v911_v16 = vmul.f32 %v878_v39, %v878_v39 }
 0x1c6   : > { %v908_v6 = vmul.f32 %v867_v4, %v867_v4  ;;  %938 = vst.msk [vmem:[%s1595_s17 + $0x20] sm:$0xff] %vm881_vm4, %v867_v4  ;;  %v870_v7 = vadd.f32 %v869_v40, %v805_v5  ;;  %v889_v8 = vsel %vm881_vm4, %v867_v4, 0.0  ;;  %v925_v25 = vsel %vm881_vm4, %v911_v16, 0.0 }
 0x1c7   : > { %v890_v9 = vadd.f32 %v889_v8, %v888_v58 }
 0x1c8   : > { %v891_v11 = vsel %vm881_vm4, %v870_v7, 0.0  ;;  %v909_v12 = vmul.f32 %v870_v7, %v870_v7  ;;  %v919_v13 = vsel %vm881_vm4, %v908_v6, 0.0  ;;  %939 = vst.msk [vmem:[%s1595_s17 + $0x28] sm:$0xff] %vm881_vm4, %v870_v7 }
 0x1c9   : > { %v892_v14 = vadd.f32 %v891_v11, %v890_v9  ;;  %v920_v15 = vadd.f32 %v919_v13, %v918_v60 }
 0x1ca   : > { %v921_v18 = vsel %vm881_vm4, %v909_v12, 0.0 }
 0x1cb   : > { %v894_v19 = vadd.f32 %v893_v17, %v892_v14  ;;  %v922_v20 = vadd.f32 %v921_v18, %v920_v15 }
 0x1cd   : > { %v896_v23 = vadd.f32 %v895_v22, %v894_v19  ;;  %v924_v24 = vadd.f32 %v923_v21, %v922_v20 }
 0x1cf   : > { %v897_v26 = vrot.slane %v896_v23, 4  ;;  %v926_v27 = vadd.f32 %v925_v25, %v924_v24 }
 0x1d1   : > { %v898_v28 = vadd.f32 %v897_v26, %v896_v23  ;;  %v927_v29 = vrot.slane %v926_v27, 4 }
 0x1d3   : > { %v899_v30 = vrot.slane %v898_v28, 2  ;;  %v928_v31 = vadd.f32 %v927_v29, %v926_v27 }
 0x1d5   : > { %v900_v32 = vadd.f32 %v899_v30, %v898_v28  ;;  %v929_v33 = vrot.slane %v928_v31, 2 }
 0x1d7   : > { %v901_v34 = vrot.slane %v900_v32, 1  ;;  %v930_v35 = vadd.f32 %v929_v33, %v928_v31 }
 0x1d9   : > { %v902_v36 = vadd.f32 %v901_v34, %v900_v32  ;;  %v931_v37 = vrot.slane %v930_v35, 1 }
 0x1db   : > { %v932_v38 = vadd.f32 %v931_v37, %v930_v35  ;;  %943 = vst.msk [vmem:[%s208_s21] sm:$0x1] %vm942_vm5, %v902_v36 }
 0x1dd   : > { %944 = vst.msk [vmem:[%s208_s21 + $0x1] sm:$0x1] %vm942_vm5, %v932_v38 }
 0x1de PF: > { %s15_s15 = sadd.s32 1, %s1224_s15  }
 0x1df   : > { %p12_p4 = scmp.ge.s32.totalorder %s15_s15, 4  }
 0x1e1   :  { %14 = sbr.rel (!%p12_p4) target bundleno = 1 (0x1), region = 76 }

// kernel: genet_gray_forward.29
= control target key start
LH: loop header
LB: loop body
LE: loop exit
PB: predicated region body
PF: predicated region fallthrough
CT: control target
= control target key end

     0   :  { %vm57_vm0 = vcmask 130048   ;;  %vm211_vm1 = vcmask 31744   ;;  %s489_s1 = inlined_call_operand.vmem [shape: bf16[16,4], index: 1, kind: input, shape index: {}]   ;;  %s490_s0 = inlined_call_operand.vmem [shape: f32[128,16], index: 0, kind: input, shape index: {}]   ;;  %s491_s2 = inlined_call_operand.vmem [shape: f32[1,4], index: 2, kind: input, shape index: {}]   ;;  %s492_s3 = inlined_call_operand.vmem [shape: f32[128,4], index: 3, kind: input, shape index: {}]   ;;  %s493_s4 = inlined_call_operand.vmem [shape: f32[128,4], index: 4, kind: output, shape index: {}]  }
   0x1   :  { %v271_v0 = vld [vmem:[%s489_s1] sm:$0xff]   ;;  %v19_v2 = vld [vmem:[%s490_s0 + $0x8] sm:$0xff]  ;;  %v20_v6 = vld [vmem:[%s490_s0 + $0x10] sm:$0xff] }
   0x2   :  { %v18_v1 = vld [vmem:[%s490_s0] sm:$0xff]  ;;  %251 = vmatprep.subr.bf16.mxu0 %v271_v0  ;;  %269 = vmatprep.subr.bf16.mxu1 %v271_v0  ;;  %v27_v5 = vld [vmem:[%s490_s0 + $0x48] sm:$0xff]  ;;  %v21_v7 = vld [vmem:[%s490_s0 + $0x18] sm:$0xff] }
   0x3   :  { %v26_v3 = vld [vmem:[%s490_s0 + $0x40] sm:$0xff]  ;;  %v34_v4 = vpack.c.bf16 %v19_v2, %v18_v1  ;;  %252 = vmatpush3.bf16.msra.mxu0 %v271_v0  ;;  %270 = vmatpush3.bf16.msra.mxu1 %v271_v0  ;;  %v35_v9 = vpack.c.bf16 %v21_v7, %v20_v6  ;;  %v28_v10 = vld [vmem:[%s490_s0 + $0x50] sm:$0xff]  ;;  %v29_v11 = vld [vmem:[%s490_s0 + $0x58] sm:$0xff] }
   0x4   :  { %v38_v8 = vpack.c.bf16 %v27_v5, %v26_v3  ;;  %v22_v12 = vld [vmem:[%s490_s0 + $0x20] sm:$0xff]  ;;  %v39_v13 = vpack.c.bf16 %v29_v11, %v28_v10  ;;  %v23_v14 = vld [vmem:[%s490_s0 + $0x28] sm:$0xff]  ;;  %v24_v19 = vld [vmem:[%s490_s0 + $0x30] sm:$0xff] }
   0x5   :  { %253 = vmatprep.mubr.msk.bf16.mxu0 %vm57_vm0, %v34_v4  ;;  %v30_v15 = vld [vmem:[%s490_s0 + $0x60] sm:$0xff]  ;;  %v31_v16 = vld [vmem:[%s490_s0 + $0x68] sm:$0xff]  ;;  %v36_v17 = vpack.c.bf16 %v23_v14, %v22_v12  ;;  %v25_v20 = vld [vmem:[%s490_s0 + $0x38] sm:$0xff] }
   0x6   :  { %261 = vmatprep.mubr.msk.bf16.mxu1 %vm57_vm0, %v38_v8  ;;  %v40_v18 = vpack.c.bf16 %v31_v16, %v30_v15  ;;  %254 = vmatmul.mubr.msk.bf16.vlgmr.msra.gmra.mrb[0].mxu0 %vm57_vm0, %v35_v9  ;;  %v32_v21 = vld [vmem:[%s490_s0 + $0x70] sm:$0xff]  ;;  %v33_v22 = vld [vmem:[%s490_s0 + $0x78] sm:$0xff]  ;;  %v37_v23 = vpack.c.bf16 %v25_v20, %v24_v19  ;;  %v359_v25 = vld [vmem:[%s491_s2] ss:$0 sm:$0xff] }
   0x7   :  { %262 = vmatmul.mubr.msk.bf16.vlgmr.msra.gmra.mrb[0].mxu1 %vm57_vm0, %v39_v13  ;;  %257 = vmatprep.mubr.msk.bf16.mxu0 %vm57_vm0, %v36_v17  ;;  %v41_v24 = vpack.c.bf16 %v33_v22, %v32_v21  ;;  %v181_v27 = vld [vmem:[%s492_s3 + $0x10] sm:$0xff]  ;;  %v179_v33 = vld [vmem:[%s492_s3] sm:$0xff]  ;;  %v182_v39 = vld [vmem:[%s492_s3 + $0x18] sm:$0xff] }
   0x8   :  { %265 = vmatprep.mubr.msk.bf16.mxu1 %vm57_vm0, %v40_v18  ;;  %v189_v29 = vld [vmem:[%s492_s3 + $0x50] sm:$0xff]  ;;  %v187_v35 = vld [vmem:[%s492_s3 + $0x40] sm:$0xff]  ;;  %v190_v41 = vld [vmem:[%s492_s3 + $0x58] sm:$0xff] }
   0x9   :  { %v180_v47 = vld [vmem:[%s492_s3 + $0x8] sm:$0xff]  ;;  %v185_v59 = vld [vmem:[%s492_s3 + $0x30] sm:$0xff]  ;;  %v183_v1 = vld [vmem:[%s492_s3 + $0x20] sm:$0xff] }
   0xa   :  { %v188_v49 = vld [vmem:[%s492_s3 + $0x48] sm:$0xff]  ;;  %v193_v61 = vld [vmem:[%s492_s3 + $0x70] sm:$0xff]  ;;  %v191_v3 = vld [vmem:[%s492_s3 + $0x60] sm:$0xff] }
   0xb   :  { %v186_v7 = vld [vmem:[%s492_s3 + $0x38] sm:$0xff]  ;;  %v184_v15 = vld [vmem:[%s492_s3 + $0x28] sm:$0xff] }
   0xc   :  { %v194_v9 = vld [vmem:[%s492_s3 + $0x78] sm:$0xff]  ;;  %v192_v17 = vld [vmem:[%s492_s3 + $0x68] sm:$0xff] }
   0xe   :  { %258 = vmatmul.mubr.msk.bf16.gmra.mrb[4].mxu0 %vm57_vm0, %v37_v23 }
   0xf   :  { %266 = vmatmul.mubr.msk.bf16.gmra.mrb[4].mxu1 %vm57_vm0, %v41_v24 }
  0xd9   :  { %v255_v26 = vpop.f32.mrb[0].mxu0 }
  0xda   :  { %v263_v28 = vpop.f32.mrb[0].mxu1  ;;  %v125_v30 = vadd.f32 %v255_v26, %v359_v25  ;;  %v116_v32 = vpop.f32.mrb[1].mxu0 }
  0xdb   :  { %v157_v31 = vadd.f32 %v263_v28, %v359_v25  ;;  %v148_v34 = vpop.f32.mrb[1].mxu1  ;;  %v117_v36 = vadd.f32 %v359_v25, %v116_v32  ;;  %v256_v38 = vpop.f32.mrb[2].mxu0 }
  0xdc   :  { %v149_v37 = vadd.f32 %v359_v25, %v148_v34  ;;  %v264_v40 = vpop.f32.mrb[2].mxu1  ;;  %v197_v42 = vadd.f32 %v181_v27, %v125_v30  ;;  %v128_v44 = vadd.f32 %v256_v38, %v359_v25  ;;  %v119_v46 = vpop.f32.mrb[3].mxu0 }
  0xdd   :  { %v205_v43 = vadd.f32 %v189_v29, %v157_v31  ;;  %v160_v45 = vadd.f32 %v264_v40, %v359_v25  ;;  %v151_v48 = vpop.f32.mrb[3].mxu1  ;;  %v195_v50 = vadd.f32 %v179_v33, %v117_v36  ;;  %v120_v52 = vadd.f32 %v359_v25, %v119_v46 }
  0xde   :  { %v203_v51 = vadd.f32 %v187_v35, %v149_v37  ;;  %v152_v53 = vadd.f32 %v359_v25, %v151_v48  ;;  %214 = vst.msk [vmem:[%s493_s4 + $0x10] sm:$0xff] %vm211_vm1, %v197_v42  ;;  %v198_v54 = vadd.f32 %v182_v39, %v128_v44 }
  0xdf   :  { %222 = vst.msk [vmem:[%s493_s4 + $0x50] sm:$0xff] %vm211_vm1, %v205_v43  ;;  %v206_v55 = vadd.f32 %v190_v41, %v160_v45  ;;  %212 = vst.msk [vmem:[%s493_s4] sm:$0xff] %vm211_vm1, %v195_v50  ;;  %v196_v56 = vadd.f32 %v180_v47, %v120_v52 }
  0xe0   :  { %220 = vst.msk [vmem:[%s493_s4 + $0x40] sm:$0xff] %vm211_vm1, %v203_v51  ;;  %v204_v57 = vadd.f32 %v188_v49, %v152_v53  ;;  %215 = vst.msk [vmem:[%s493_s4 + $0x18] sm:$0xff] %vm211_vm1, %v198_v54 }
  0xe1   :  { %223 = vst.msk [vmem:[%s493_s4 + $0x58] sm:$0xff] %vm211_vm1, %v206_v55  ;;  %213 = vst.msk [vmem:[%s493_s4 + $0x8] sm:$0xff] %vm211_vm1, %v196_v56  ;;  %v259_v58 = vpop.f32.mrb[4].mxu0 }
  0xe2   :  { %221 = vst.msk [vmem:[%s493_s4 + $0x48] sm:$0xff] %vm211_vm1, %v204_v57  ;;  %v267_v60 = vpop.f32.mrb[4].mxu1  ;;  %v141_v62 = vadd.f32 %v259_v58, %v359_v25  ;;  %v132_v0 = vpop.f32.mrb[5].mxu0 }
  0xe3   :  { %v173_v63 = vadd.f32 %v267_v60, %v359_v25  ;;  %v164_v2 = vpop.f32.mrb[5].mxu1  ;;  %v133_v4 = vadd.f32 %v359_v25, %v132_v0  ;;  %v260_v6 = vpop.f32.mrb[6].mxu0 }
  0xe4   :  { %v165_v5 = vadd.f32 %v359_v25, %v164_v2  ;;  %v268_v8 = vpop.f32.mrb[6].mxu1  ;;  %v201_v10 = vadd.f32 %v185_v59, %v141_v62  ;;  %v144_v12 = vadd.f32 %v260_v6, %v359_v25  ;;  %v135_v14 = vpop.f32.mrb[7].mxu0 }
  0xe5   :  { %v209_v11 = vadd.f32 %v193_v61, %v173_v63  ;;  %v176_v13 = vadd.f32 %v268_v8, %v359_v25  ;;  %v167_v16 = vpop.f32.mrb[7].mxu1  ;;  %v199_v18 = vadd.f32 %v183_v1, %v133_v4  ;;  %v136_v20 = vadd.f32 %v359_v25, %v135_v14 }
  0xe6   :  { %v207_v19 = vadd.f32 %v191_v3, %v165_v5  ;;  %v168_v21 = vadd.f32 %v359_v25, %v167_v16  ;;  %218 = vst.msk [vmem:[%s493_s4 + $0x30] sm:$0xff] %vm211_vm1, %v201_v10  ;;  %v202_v22 = vadd.f32 %v186_v7, %v144_v12 }
  0xe7   :  { %226 = vst.msk [vmem:[%s493_s4 + $0x70] sm:$0xff] %vm211_vm1, %v209_v11  ;;  %v210_v23 = vadd.f32 %v194_v9, %v176_v13  ;;  %216 = vst.msk [vmem:[%s493_s4 + $0x20] sm:$0xff] %vm211_vm1, %v199_v18  ;;  %v200_v24 = vadd.f32 %v184_v15, %v136_v20 }
  0xe8   :  { %224 = vst.msk [vmem:[%s493_s4 + $0x60] sm:$0xff] %vm211_vm1, %v207_v19  ;;  %v208_v25 = vadd.f32 %v192_v17, %v168_v21  ;;  %219 = vst.msk [vmem:[%s493_s4 + $0x38] sm:$0xff] %vm211_vm1, %v202_v22 }
  0xe9   :  { %227 = vst.msk [vmem:[%s493_s4 + $0x78] sm:$0xff] %vm211_vm1, %v210_v23  ;;  %217 = vst.msk [vmem:[%s493_s4 + $0x28] sm:$0xff] %vm211_vm1, %v200_v24 }
  0xea   :  { %225 = vst.msk [vmem:[%s493_s4 + $0x68] sm:$0xff] %vm211_vm1, %v208_v25 }

</bundles_post_ra>
